<compile_context>
chip_gen: v6e
topology: v6e:2x2x1
jax: 0.10.0
libtpu: 0.0.40
codegen_flags: <defaults>
</compile_context>

<pallas_src>
import jax
import jax.numpy as jnp
from jax.experimental import pallas as pl
from jax.experimental.pallas import tpu as pltpu


# ----------------------------------------------------------------------------
# VMEM-budget-aware tiling helpers
# ----------------------------------------------------------------------------

def _vmem_capacity_bytes():
    """Per-core VMEM capacity; conservative 64 MiB fallback (fits v7x)."""
    try:
        return int(pltpu.get_tpu_info().vmem_capacity_bytes)
    except Exception:
        return 64 * 1024 * 1024


def _vmem_bytes(Tc, Bt, D, H, x_sz, w_sz, y_sz):
    """Rough per-core VMEM footprint of one pallas_call instance."""
    return (2 * Tc * Bt * D * x_sz           # x chunk stream (double-buffered)
            + 2 * Tc * Bt * H * y_sz         # y chunk stream (double-buffered)
            + 2 * (D + H) * 4 * H * w_sz     # resident W_ih^T + W_hh^T (double-buffered)
            + 2 * 4 * H * 4                  # bias
            + 8 * Bt * H * 4                 # h0/c0/hn/cn blocks (double-buffered)
            + Tc * Bt * 4 * H * 4            # gin scratch (f32, single-buffered)
            + 2 * Bt * H * 4)                # h/c carry scratch (f32)


def _choose_batch_tile(B):
    """Prefer 8-aligned tiles that yield >=2 batch tiles (v7x megacore), 128 first
    (fills the MXU M-tile without oversizing the streamed VMEM blocks)."""
    pref = (128, 256, 64, 32, 16, 8)
    divs = [bt for bt in pref if B % bt == 0]
    multi = [bt for bt in divs if B // bt >= 2]
    if multi:
        return multi[0]
    if divs:
        return divs[0]
    return B                                  # small / odd batch: one (padded) tile


def _choose_time_chunk(T, Bt, D, H, x_sz, w_sz, y_sz, budget, max_chunk=64):
    """Largest chunk <= max_chunk dividing T whose buffers fit the VMEM budget."""
    best = 1
    for tc in range(1, min(T, max_chunk) + 1):
        if T % tc == 0 and _vmem_bytes(tc, Bt, D, H, x_sz, w_sz, y_sz) <= budget:
            best = tc
    return best


# ----------------------------------------------------------------------------
# Recurrent Pallas kernel (one layer; grid = (batch_tiles, time_chunks))
# ----------------------------------------------------------------------------

def _lstm_recurrent_kernel(x_ref, wih_ref, whh_ref, bias_ref, h0_ref, c0_ref,
                           y_ref, hn_ref, cn_ref, gin_sc, h_sc, c_sc):
    """x_ref  : (Tc, Bt, D)   layer-input chunk
       wih_ref: (D, 4H)       W_ih^T (resident across the whole grid)
       whh_ref: (H, 4H)       W_hh^T (resident across the whole grid)
       bias   : (1, 4H)       b_ih + b_hh (f32)
       h0/c0  : (Bt, H)       initial state for this batch tile
       y_ref  : (Tc, Bt, H)   hidden outputs for this chunk
       hn/cn  : (Bt, H)       final state (revisited block; last write survives)
       gin_sc : (Tc, Bt, 4H)  f32 scratch: x @ W_ih^T + bias for the whole chunk
       h_sc/c_sc: (Bt, H)     f32 scratch carrying the recurrent state."""
    t_chunk = pl.program_id(1)
    Tc, Bt, D = x_ref.shape
    H = h_sc.shape[-1]

    @pl.when(t_chunk == 0)
    def _():
        h_sc[...] = h0_ref[...].astype(jnp.float32)
        c_sc[...] = c0_ref[...].astype(jnp.float32)

    wih = wih_ref[...]
    whh = whh_ref[...]
    bias = bias_ref[...].astype(jnp.float32)              # (1, 4H)

    # Partial unroll: scheduler visibility without blowing up vreg live ranges.
    unroll = 8 if Tc % 8 == 0 else (4 if Tc % 4 == 0 else (2 if Tc % 2 == 0 else 1))

    # ---- fused input projection for the whole chunk ---------------------------
    if Bt % 8 == 0:
        # One big (Tc*Bt, D) x (D, 4H) MXU GEMM; the (Tc, Bt) merge is
        # layout-trivial because Bt is sublane-aligned.
        x2 = x_ref[...].reshape(Tc * Bt, D).astype(wih.dtype)
        gin2 = jnp.dot(x2, wih, preferred_element_type=jnp.float32) + bias
        gin_sc[...] = gin2.reshape(Tc, Bt, 4 * H)
    else:
        # Correctness fallback for sublane-unaligned batch tiles (tiny shapes).
        def gin_step(s, carry):
            gin_sc[s] = (jnp.dot(x_ref[s].astype(wih.dtype), wih,
                                 preferred_element_type=jnp.float32) + bias)
            return carry
        jax.lax.fori_loop(0, Tc, gin_step, 0, unroll=unroll)

    # ---- sequential recurrence: only h @ W_hh^T + gate math remain ------------
    def sigmoid(v):                                        # 1 EUP op (tanh) per gate
        return 0.5 * jnp.tanh(0.5 * v) + 0.5

    def step(s, carry):
        h, c = carry
        gates = gin_sc[s] + jnp.dot(h.astype(whh.dtype), whh,
                                    preferred_element_type=jnp.float32)
        # PyTorch gate order: i, f, g, o.
        i_g = sigmoid(gates[:, 0 * H:1 * H])
        f_g = sigmoid(gates[:, 1 * H:2 * H])
        g_g = jnp.tanh(gates[:, 2 * H:3 * H])
        o_g = sigmoid(gates[:, 3 * H:4 * H])
        c_new = f_g * c + i_g * g_g
        h_new = o_g * jnp.tanh(c_new)
        y_ref[s] = h_new.astype(y_ref.dtype)
        return h_new, c_new

    h_fin, c_fin = jax.lax.fori_loop(0, Tc, step, (h_sc[...], c_sc[...]),
                                     unroll=unroll)

    h_sc[...] = h_fin
    c_sc[...] = c_fin
    # Revisited output blocks: written every chunk; the last chunk's value is the
    # one written back to HBM at the batch-tile boundary.
    hn_ref[...] = h_fin.astype(hn_ref.dtype)
    cn_ref[...] = c_fin.astype(cn_ref.dtype)


def _run_lstm_layer(x_tm, wih_t, whh_t, bias, h0, c0, out_dtype):
    """x_tm: (T, B, D) time-major layer input.
    Returns (y_tm (T,B,H), h_n (B,H), c_n (B,H))."""
    T, B, D = x_tm.shape
    H = h0.shape[-1]
    x_sz = jnp.dtype(x_tm.dtype).itemsize
    w_sz = jnp.dtype(whh_t.dtype).itemsize
    y_sz = jnp.dtype(out_dtype).itemsize

    cap = _vmem_capacity_bytes()
    budget = (cap // 8) * 7                     # keep ~1/8 headroom for the compiler
    Bt = _choose_batch_tile(B)
    Tc = _choose_time_chunk(T, Bt, D, H, x_sz, w_sz, y_sz, budget)
    nb, nt = B // Bt, T // Tc
    vmem_limit = int(max(32 * 1024 * 1024, min(cap - (2 << 20), 127 << 20)))

    grid_spec = pltpu.PrefetchScalarGridSpec(
        num_scalar_prefetch=0,
        grid=(nb, nt),
        in_specs=[
            pl.BlockSpec((Tc, Bt, D), lambda b, t: (t, b, 0)),    # x chunk
            pl.BlockSpec((D, 4 * H), lambda b, t: (0, 0)),        # W_ih^T (resident)
            pl.BlockSpec((H, 4 * H), lambda b, t: (0, 0)),        # W_hh^T (resident)
            pl.BlockSpec((1, 4 * H), lambda b, t: (0, 0)),        # bias
            pl.BlockSpec((Bt, H), lambda b, t: (b, 0)),           # h0 tile
            pl.BlockSpec((Bt, H), lambda b, t: (b, 0)),           # c0 tile
        ],
        out_specs=[
            pl.BlockSpec((Tc, Bt, H), lambda b, t: (t, b, 0)),    # y chunk
            pl.BlockSpec((Bt, H), lambda b, t: (b, 0)),           # h_n tile
            pl.BlockSpec((Bt, H), lambda b, t: (b, 0)),           # c_n tile
        ],
        scratch_shapes=[
            pltpu.VMEM((Tc, Bt, 4 * H), jnp.float32),             # chunk input gates
            pltpu.VMEM((Bt, H), jnp.float32),                     # h carry
            pltpu.VMEM((Bt, H), jnp.float32),                     # c carry
        ],
    )

    y_tm, h_n, c_n = pl.pallas_call(
        _lstm_recurrent_kernel,
        out_shape=(
            jax.ShapeDtypeStruct((T, B, H), out_dtype),
            jax.ShapeDtypeStruct((B, H), out_dtype),
            jax.ShapeDtypeStruct((B, H), out_dtype),
        ),
        grid_spec=grid_spec,
        compiler_params=pltpu.CompilerParams(
            dimension_semantics=("parallel", "arbitrary"),        # batch ||, time seq
            vmem_limit_bytes=vmem_limit),
    )(x_tm, wih_t, whh_t, bias, h0, c0)
    return y_tm, h_n, c_n


# ----------------------------------------------------------------------------
# Parameters & forward
# ----------------------------------------------------------------------------

def init_lstm_params(key, input_size, hidden_size, num_layers,
                     param_dtype=jnp.bfloat16):
    """PyTorch-style init: all params ~ U(-1/sqrt(H), 1/sqrt(H)).

    Weights are stored transposed ((D,4H)/(H,4H)) in PyTorch gate order (i,f,g,o),
    in `param_dtype` (bf16 by default: half the resident weight VMEM and ~2x MXU
    throughput).  Bias, gate math and the h/c carry stay f32."""
    k = 1.0 / jnp.sqrt(jnp.asarray(hidden_size, jnp.float32))
    params = []
    for layer in range(num_layers):
        d_in = input_size if layer == 0 else hidden_size
        key, k1, k2, k3, k4 = jax.random.split(key, 5)
        w_ih = jax.random.uniform(k1, (4 * hidden_size, d_in), jnp.float32, -k, k)
        w_hh = jax.random.uniform(k2, (4 * hidden_size, hidden_size), jnp.float32, -k, k)
        b_ih = jax.random.uniform(k3, (4 * hidden_size,), jnp.float32, -k, k)
        b_hh = jax.random.uniform(k4, (4 * hidden_size,), jnp.float32, -k, k)
        params.append({
            "wih_t": w_ih.T.astype(param_dtype),                  # (d_in, 4H)
            "whh_t": w_hh.T.astype(param_dtype),                  # (H, 4H)
            "bias": (b_ih + b_hh).reshape(1, 4 * hidden_size),    # f32 (1, 4H)
        })
    return params


def lstm_layer_forward(inputs, hidden, params):
    """Equivalent of LSTMLayer.forward (eval mode).

    inputs: (B, T, input_size)  [batch_first=True]
    hidden: (h0, c0), each (num_layers, B, H)
    returns (output (B, T, H), (h_n, c_n) each (num_layers, B, H))."""
    h0, c0 = hidden
    out_dtype = inputs.dtype
    x_tm = jnp.transpose(inputs, (1, 0, 2))                       # (T, B, D)
    h_finals, c_finals = [], []
    for layer, p in enumerate(params):
        y_tm, h_n, c_n = _run_lstm_layer(x_tm, p["wih_t"], p["whh_t"], p["bias"],
                                         h0[layer], c0[layer], out_dtype)
        # TODO(synk): inter-layer dropout (nn.LSTM `dropout`) is train-only; identity here.
        x_tm = y_tm
        h_finals.append(h_n)
        c_finals.append(c_n)
    output = jnp.transpose(x_tm, (1, 0, 2))                       # back to (B, T, H)
    return output, (jnp.stack(h_finals, axis=0), jnp.stack(c_finals, axis=0))


# ----------------------------------------------------------------------------
# Pure-JAX reference (lax.scan, matching-precision) for correctness checking
# ----------------------------------------------------------------------------

def _sigmoid_via_tanh(x):
    return 0.5 * jnp.tanh(0.5 * x) + 0.5


def _lstm_reference(inputs, hidden, params):
    h0, c0 = hidden
    x = inputs
    h_finals, c_finals = [], []
    for layer, p in enumerate(params):
        H = h0.shape[-1]
        wih, whh, bias = p["wih_t"], p["whh_t"], p["bias"][0]
        wd = whh.dtype

        def cell(carry, x_t, wih=wih, whh=whh, bias=bias, wd=wd, H=H):
            h, c = carry
            gates = (jnp.dot(x_t.astype(wd), wih, preferred_element_type=jnp.float32)
                     + jnp.dot(h.astype(wd), whh, preferred_element_type=jnp.float32)
                     + bias)
            i = _sigmoid_via_tanh(gates[:, 0 * H:1 * H])
            f = _sigmoid_via_tanh(gates[:, 1 * H:2 * H])
            g = jnp.tanh(gates[:, 2 * H:3 * H])
            o = _sigmoid_via_tanh(gates[:, 3 * H:4 * H])
            c = f * c + i * g
            h = o * jnp.tanh(c)
            return (h, c), h

        (h_n, c_n), ys = jax.lax.scan(
            cell,
            (h0[layer].astype(jnp.float32), c0[layer].astype(jnp.float32)),
            jnp.transpose(x, (1, 0, 2)))
        x = jnp.transpose(ys, (1, 0, 2)).astype(inputs.dtype)
        h_finals.append(h_n.astype(inputs.dtype))
        c_finals.append(c_n.astype(inputs.dtype))
    return x, (jnp.stack(h_finals), jnp.stack(c_finals))


if __name__ == "__main__":
    batch = 2
    seq = 8
    input_size = 16
    hidden_size = 32
    num_layers = 2
    dropout = 0.1  # inactive in eval-mode forward

    key = jax.random.PRNGKey(0)
    kx, kp = jax.random.split(key)
    x = jax.random.normal(kx, (batch, seq, input_size), jnp.float32)
    params = init_lstm_params(kp, input_size, hidden_size, num_layers)

    # init_hidden equivalent: zeros of shape (num_layers, B, H)
    h0 = jnp.zeros((num_layers, batch, hidden_size), jnp.float32)
    c0 = jnp.zeros((num_layers, batch, hidden_size), jnp.float32)

    fwd = jax.jit(lstm_layer_forward)
    output, (h_n, c_n) = fwd(x, (h0, c0), params)
    jax.block_until_ready((output, h_n, c_n))

    # sanity check against a matching-precision pure-JAX reference
    out_ref, (h_ref, c_ref) = _lstm_reference(x, (h0, c0), params)
    assert output.shape == (batch, seq, hidden_size)
    assert h_n.shape == (num_layers, batch, hidden_size)
    assert c_n.shape == (num_layers, batch, hidden_size)
    assert jnp.allclose(output, out_ref, atol=2e-3, rtol=2e-3), "output mismatch"
    assert jnp.allclose(h_n, h_ref, atol=2e-3, rtol=2e-3), "h_n mismatch"
    assert jnp.allclose(c_n, c_ref, atol=2e-3, rtol=2e-3), "c_n mismatch"

    print("KERNEL_OK")
</pallas_src>

<mosaic_0001>
module attributes {stable_mosaic.version = 11 : i64} {
  func.func @_lstm_recurrent_kernel(%arg0: i32, %arg1: i32, %arg2: memref<8x2x32xf32, #tpu.memory_space<vmem>>, %arg3: memref<32x128xbf16, #tpu.memory_space<vmem>>, %arg4: memref<32x128xbf16, #tpu.memory_space<vmem>>, %arg5: memref<1x128xf32, #tpu.memory_space<vmem>>, %arg6: memref<2x32xf32, #tpu.memory_space<vmem>>, %arg7: memref<2x32xf32, #tpu.memory_space<vmem>>, %arg8: memref<8x2x32xf32, #tpu.memory_space<vmem>>, %arg9: memref<2x32xf32, #tpu.memory_space<vmem>>, %arg10: memref<2x32xf32, #tpu.memory_space<vmem>>, %arg11: memref<8x2x128xf32, #tpu.memory_space<vmem>>, %arg12: memref<2x32xf32, #tpu.memory_space<vmem>>, %arg13: memref<2x32xf32, #tpu.memory_space<vmem>>) attributes {dimension_semantics = [#tpu.dimension_semantics<parallel>, #tpu.dimension_semantics<arbitrary>], iteration_bounds = array<i64: 1, 1>, scalar_prefetch = 0 : i64, scratch_operands = 3 : i64, tpu.core_type = #tpu.core_type<tc>, window_params = [{transform_indices = @transform_0, window_bounds = array<i64: 8, 2, 32>}, {pipeline_mode = #tpu.pipeline_mode<synchronous>, transform_indices = @transform_1, window_bounds = array<i64: 32, 128>}, {pipeline_mode = #tpu.pipeline_mode<synchronous>, transform_indices = @transform_2, window_bounds = array<i64: 32, 128>}, {pipeline_mode = #tpu.pipeline_mode<synchronous>, transform_indices = @transform_3, window_bounds = array<i64: 1, 128>}, {transform_indices = @transform_4, window_bounds = array<i64: 2, 32>}, {transform_indices = @transform_5, window_bounds = array<i64: 2, 32>}, {transform_indices = @transform_6, window_bounds = array<i64: 8, 2, 32>}, {transform_indices = @transform_7, window_bounds = array<i64: 2, 32>}, {transform_indices = @transform_8, window_bounds = array<i64: 2, 32>}]} {
    %c0_i32 = arith.constant 0 : i32
    %0 = arith.cmpi eq, %arg1, %c0_i32 : i32
    %1 = arith.extui %0 : i1 to i32
    %c0_i32_0 = arith.constant 0 : i32
    %2 = arith.cmpi ne, %1, %c0_i32_0 : i32
    scf.if %2 {
      %c0_179 = arith.constant 0 : index
      %c0_180 = arith.constant 0 : index
      %428 = vector.load %arg6[%c0_179, %c0_180] : memref<2x32xf32, #tpu.memory_space<vmem>>, vector<2x32xf32>
      %c0_181 = arith.constant 0 : index
      %c0_182 = arith.constant 0 : index
      %429 = vector.load %arg12[%c0_181, %c0_182] : memref<2x32xf32, #tpu.memory_space<vmem>>, vector<2x32xf32>
      tpu.vector_store %arg12[%c0_181, %c0_182], %428 {strides = array<i32>} : memref<2x32xf32, #tpu.memory_space<vmem>>, vector<2x32xf32>,
      %c0_183 = arith.constant 0 : index
      %c0_184 = arith.constant 0 : index
      %430 = vector.load %arg7[%c0_183, %c0_184] : memref<2x32xf32, #tpu.memory_space<vmem>>, vector<2x32xf32>
      %c0_185 = arith.constant 0 : index
      %c0_186 = arith.constant 0 : index
      %431 = vector.load %arg13[%c0_185, %c0_186] : memref<2x32xf32, #tpu.memory_space<vmem>>, vector<2x32xf32>
      tpu.vector_store %arg13[%c0_185, %c0_186], %430 {strides = array<i32>} : memref<2x32xf32, #tpu.memory_space<vmem>>, vector<2x32xf32>,
    } else {
    }
    %c0 = arith.constant 0 : index
    %c0_1 = arith.constant 0 : index
    %3 = vector.load %arg3[%c0, %c0_1] : memref<32x128xbf16, #tpu.memory_space<vmem>>, vector<32x128xbf16>
    %c0_2 = arith.constant 0 : index
    %c0_3 = arith.constant 0 : index
    %4 = vector.load %arg4[%c0_2, %c0_3] : memref<32x128xbf16, #tpu.memory_space<vmem>>, vector<32x128xbf16>
    %c0_4 = arith.constant 0 : index
    %c0_5 = arith.constant 0 : index
    %5 = vector.load %arg5[%c0_4, %c0_5] : memref<1x128xf32, #tpu.memory_space<vmem>>, vector<1x128xf32>
    %c0_i32_6 = arith.constant 0 : i32
    %6 = arith.index_cast %c0_i32_6 : i32 to index
    %c0_7 = arith.constant 0 : index
    %c0_8 = arith.constant 0 : index
    %7 = vector.load %arg2[%6, %c0_7, %c0_8] : memref<8x2x32xf32, #tpu.memory_space<vmem>>, vector<1x2x32xf32>
    %8 = vector.shape_cast %7 : vector<1x2x32xf32> to vector<2x32xf32>
    %9 = arith.truncf %8 : vector<2x32xf32> to vector<2x32xbf16>
    %cst = arith.constant dense<0.000000e+00> : vector<2x128xf32>
    %10 = tpu.matmul %9, %3, %cst {dimension_numbers = #tpu.dot_dimension_numbers<[1], [0], [0], [1], [0, 0, 1, 1], [], []>} : vector<2x32xbf16>, vector<32x128xbf16>, vector<2x128xf32> -> vector<2x128xf32>
    %11 = vector.broadcast %5 : vector<1x128xf32> to vector<2x128xf32>
    %12 = arith.addf %10, %11 : vector<2x128xf32>
    %13 = arith.index_cast %c0_i32_6 : i32 to index
    %c0_9 = arith.constant 0 : index
    %c0_10 = arith.constant 0 : index
    %14 = vector.load %arg11[%13, %c0_9, %c0_10] : memref<8x2x128xf32, #tpu.memory_space<vmem>>, vector<1x2x128xf32>
    %15 = vector.shape_cast %14 : vector<1x2x128xf32> to vector<2x128xf32>
    %16 = vector.shape_cast %12 : vector<2x128xf32> to vector<1x2x128xf32>
    tpu.vector_store %arg11[%13, %c0_9, %c0_10], %16 {strides = array<i32>} : memref<8x2x128xf32, #tpu.memory_space<vmem>>, vector<1x2x128xf32>,
    %c1_i32 = arith.constant 1 : i32
    %17 = arith.index_cast %c1_i32 : i32 to index
    %c0_11 = arith.constant 0 : index
    %c0_12 = arith.constant 0 : index
    %18 = vector.load %arg2[%17, %c0_11, %c0_12] : memref<8x2x32xf32, #tpu.memory_space<vmem>>, vector<1x2x32xf32>
    %19 = vector.shape_cast %18 : vector<1x2x32xf32> to vector<2x32xf32>
    %20 = arith.truncf %19 : vector<2x32xf32> to vector<2x32xbf16>
    %cst_13 = arith.constant dense<0.000000e+00> : vector<2x128xf32>
    %21 = tpu.matmul %20, %3, %cst_13 {dimension_numbers = #tpu.dot_dimension_numbers<[1], [0], [0], [1], [0, 0, 1, 1], [], []>} : vector<2x32xbf16>, vector<32x128xbf16>, vector<2x128xf32> -> vector<2x128xf32>
    %22 = vector.broadcast %5 : vector<1x128xf32> to vector<2x128xf32>
    %23 = arith.addf %21, %22 : vector<2x128xf32>
    %24 = arith.index_cast %c1_i32 : i32 to index
    %c0_14 = arith.constant 0 : index
    %c0_15 = arith.constant 0 : index
    %25 = vector.load %arg11[%24, %c0_14, %c0_15] : memref<8x2x128xf32, #tpu.memory_space<vmem>>, vector<1x2x128xf32>
    %26 = vector.shape_cast %25 : vector<1x2x128xf32> to vector<2x128xf32>
    %27 = vector.shape_cast %23 : vector<2x128xf32> to vector<1x2x128xf32>
    tpu.vector_store %arg11[%24, %c0_14, %c0_15], %27 {strides = array<i32>} : memref<8x2x128xf32, #tpu.memory_space<vmem>>, vector<1x2x128xf32>,
    %c2_i32 = arith.constant 2 : i32
    %28 = arith.index_cast %c2_i32 : i32 to index
    %c0_16 = arith.constant 0 : index
    %c0_17 = arith.constant 0 : index
    %29 = vector.load %arg2[%28, %c0_16, %c0_17] : memref<8x2x32xf32, #tpu.memory_space<vmem>>, vector<1x2x32xf32>
    %30 = vector.shape_cast %29 : vector<1x2x32xf32> to vector<2x32xf32>
    %31 = arith.truncf %30 : vector<2x32xf32> to vector<2x32xbf16>
    %cst_18 = arith.constant dense<0.000000e+00> : vector<2x128xf32>
    %32 = tpu.matmul %31, %3, %cst_18 {dimension_numbers = #tpu.dot_dimension_numbers<[1], [0], [0], [1], [0, 0, 1, 1], [], []>} : vector<2x32xbf16>, vector<32x128xbf16>, vector<2x128xf32> -> vector<2x128xf32>
    %33 = vector.broadcast %5 : vector<1x128xf32> to vector<2x128xf32>
    %34 = arith.addf %32, %33 : vector<2x128xf32>
    %35 = arith.index_cast %c2_i32 : i32 to index
    %c0_19 = arith.constant 0 : index
    %c0_20 = arith.constant 0 : index
    %36 = vector.load %arg11[%35, %c0_19, %c0_20] : memref<8x2x128xf32, #tpu.memory_space<vmem>>, vector<1x2x128xf32>
    %37 = vector.shape_cast %36 : vector<1x2x128xf32> to vector<2x128xf32>
    %38 = vector.shape_cast %34 : vector<2x128xf32> to vector<1x2x128xf32>
    tpu.vector_store %arg11[%35, %c0_19, %c0_20], %38 {strides = array<i32>} : memref<8x2x128xf32, #tpu.memory_space<vmem>>, vector<1x2x128xf32>,
    %c3_i32 = arith.constant 3 : i32
    %39 = arith.index_cast %c3_i32 : i32 to index
    %c0_21 = arith.constant 0 : index
    %c0_22 = arith.constant 0 : index
    %40 = vector.load %arg2[%39, %c0_21, %c0_22] : memref<8x2x32xf32, #tpu.memory_space<vmem>>, vector<1x2x32xf32>
    %41 = vector.shape_cast %40 : vector<1x2x32xf32> to vector<2x32xf32>
    %42 = arith.truncf %41 : vector<2x32xf32> to vector<2x32xbf16>
    %cst_23 = arith.constant dense<0.000000e+00> : vector<2x128xf32>
    %43 = tpu.matmul %42, %3, %cst_23 {dimension_numbers = #tpu.dot_dimension_numbers<[1], [0], [0], [1], [0, 0, 1, 1], [], []>} : vector<2x32xbf16>, vector<32x128xbf16>, vector<2x128xf32> -> vector<2x128xf32>
    %44 = vector.broadcast %5 : vector<1x128xf32> to vector<2x128xf32>
    %45 = arith.addf %43, %44 : vector<2x128xf32>
    %46 = arith.index_cast %c3_i32 : i32 to index
    %c0_24 = arith.constant 0 : index
    %c0_25 = arith.constant 0 : index
    %47 = vector.load %arg11[%46, %c0_24, %c0_25] : memref<8x2x128xf32, #tpu.memory_space<vmem>>, vector<1x2x128xf32>
    %48 = vector.shape_cast %47 : vector<1x2x128xf32> to vector<2x128xf32>
    %49 = vector.shape_cast %45 : vector<2x128xf32> to vector<1x2x128xf32>
    tpu.vector_store %arg11[%46, %c0_24, %c0_25], %49 {strides = array<i32>} : memref<8x2x128xf32, #tpu.memory_space<vmem>>, vector<1x2x128xf32>,
    %c4_i32 = arith.constant 4 : i32
    %50 = arith.index_cast %c4_i32 : i32 to index
    %c0_26 = arith.constant 0 : index
    %c0_27 = arith.constant 0 : index
    %51 = vector.load %arg2[%50, %c0_26, %c0_27] : memref<8x2x32xf32, #tpu.memory_space<vmem>>, vector<1x2x32xf32>
    %52 = vector.shape_cast %51 : vector<1x2x32xf32> to vector<2x32xf32>
    %53 = arith.truncf %52 : vector<2x32xf32> to vector<2x32xbf16>
    %cst_28 = arith.constant dense<0.000000e+00> : vector<2x128xf32>
    %54 = tpu.matmul %53, %3, %cst_28 {dimension_numbers = #tpu.dot_dimension_numbers<[1], [0], [0], [1], [0, 0, 1, 1], [], []>} : vector<2x32xbf16>, vector<32x128xbf16>, vector<2x128xf32> -> vector<2x128xf32>
    %55 = vector.broadcast %5 : vector<1x128xf32> to vector<2x128xf32>
    %56 = arith.addf %54, %55 : vector<2x128xf32>
    %57 = arith.index_cast %c4_i32 : i32 to index
    %c0_29 = arith.constant 0 : index
    %c0_30 = arith.constant 0 : index
    %58 = vector.load %arg11[%57, %c0_29, %c0_30] : memref<8x2x128xf32, #tpu.memory_space<vmem>>, vector<1x2x128xf32>
    %59 = vector.shape_cast %58 : vector<1x2x128xf32> to vector<2x128xf32>
    %60 = vector.shape_cast %56 : vector<2x128xf32> to vector<1x2x128xf32>
    tpu.vector_store %arg11[%57, %c0_29, %c0_30], %60 {strides = array<i32>} : memref<8x2x128xf32, #tpu.memory_space<vmem>>, vector<1x2x128xf32>,
    %c5_i32 = arith.constant 5 : i32
    %61 = arith.index_cast %c5_i32 : i32 to index
    %c0_31 = arith.constant 0 : index
    %c0_32 = arith.constant 0 : index
    %62 = vector.load %arg2[%61, %c0_31, %c0_32] : memref<8x2x32xf32, #tpu.memory_space<vmem>>, vector<1x2x32xf32>
    %63 = vector.shape_cast %62 : vector<1x2x32xf32> to vector<2x32xf32>
    %64 = arith.truncf %63 : vector<2x32xf32> to vector<2x32xbf16>
    %cst_33 = arith.constant dense<0.000000e+00> : vector<2x128xf32>
    %65 = tpu.matmul %64, %3, %cst_33 {dimension_numbers = #tpu.dot_dimension_numbers<[1], [0], [0], [1], [0, 0, 1, 1], [], []>} : vector<2x32xbf16>, vector<32x128xbf16>, vector<2x128xf32> -> vector<2x128xf32>
    %66 = vector.broadcast %5 : vector<1x128xf32> to vector<2x128xf32>
    %67 = arith.addf %65, %66 : vector<2x128xf32>
    %68 = arith.index_cast %c5_i32 : i32 to index
    %c0_34 = arith.constant 0 : index
    %c0_35 = arith.constant 0 : index
    %69 = vector.load %arg11[%68, %c0_34, %c0_35] : memref<8x2x128xf32, #tpu.memory_space<vmem>>, vector<1x2x128xf32>
    %70 = vector.shape_cast %69 : vector<1x2x128xf32> to vector<2x128xf32>
    %71 = vector.shape_cast %67 : vector<2x128xf32> to vector<1x2x128xf32>
    tpu.vector_store %arg11[%68, %c0_34, %c0_35], %71 {strides = array<i32>} : memref<8x2x128xf32, #tpu.memory_space<vmem>>, vector<1x2x128xf32>,
    %c6_i32 = arith.constant 6 : i32
    %72 = arith.index_cast %c6_i32 : i32 to index
    %c0_36 = arith.constant 0 : index
    %c0_37 = arith.constant 0 : index
    %73 = vector.load %arg2[%72, %c0_36, %c0_37] : memref<8x2x32xf32, #tpu.memory_space<vmem>>, vector<1x2x32xf32>
    %74 = vector.shape_cast %73 : vector<1x2x32xf32> to vector<2x32xf32>
    %75 = arith.truncf %74 : vector<2x32xf32> to vector<2x32xbf16>
    %cst_38 = arith.constant dense<0.000000e+00> : vector<2x128xf32>
    %76 = tpu.matmul %75, %3, %cst_38 {dimension_numbers = #tpu.dot_dimension_numbers<[1], [0], [0], [1], [0, 0, 1, 1], [], []>} : vector<2x32xbf16>, vector<32x128xbf16>, vector<2x128xf32> -> vector<2x128xf32>
    %77 = vector.broadcast %5 : vector<1x128xf32> to vector<2x128xf32>
    %78 = arith.addf %76, %77 : vector<2x128xf32>
    %79 = arith.index_cast %c6_i32 : i32 to index
    %c0_39 = arith.constant 0 : index
    %c0_40 = arith.constant 0 : index
    %80 = vector.load %arg11[%79, %c0_39, %c0_40] : memref<8x2x128xf32, #tpu.memory_space<vmem>>, vector<1x2x128xf32>
    %81 = vector.shape_cast %80 : vector<1x2x128xf32> to vector<2x128xf32>
    %82 = vector.shape_cast %78 : vector<2x128xf32> to vector<1x2x128xf32>
    tpu.vector_store %arg11[%79, %c0_39, %c0_40], %82 {strides = array<i32>} : memref<8x2x128xf32, #tpu.memory_space<vmem>>, vector<1x2x128xf32>,
    %c7_i32 = arith.constant 7 : i32
    %83 = arith.index_cast %c7_i32 : i32 to index
    %c0_41 = arith.constant 0 : index
    %c0_42 = arith.constant 0 : index
    %84 = vector.load %arg2[%83, %c0_41, %c0_42] : memref<8x2x32xf32, #tpu.memory_space<vmem>>, vector<1x2x32xf32>
    %85 = vector.shape_cast %84 : vector<1x2x32xf32> to vector<2x32xf32>
    %86 = arith.truncf %85 : vector<2x32xf32> to vector<2x32xbf16>
    %cst_43 = arith.constant dense<0.000000e+00> : vector<2x128xf32>
    %87 = tpu.matmul %86, %3, %cst_43 {dimension_numbers = #tpu.dot_dimension_numbers<[1], [0], [0], [1], [0, 0, 1, 1], [], []>} : vector<2x32xbf16>, vector<32x128xbf16>, vector<2x128xf32> -> vector<2x128xf32>
    %88 = vector.broadcast %5 : vector<1x128xf32> to vector<2x128xf32>
    %89 = arith.addf %87, %88 : vector<2x128xf32>
    %90 = arith.index_cast %c7_i32 : i32 to index
    %c0_44 = arith.constant 0 : index
    %c0_45 = arith.constant 0 : index
    %91 = vector.load %arg11[%90, %c0_44, %c0_45] : memref<8x2x128xf32, #tpu.memory_space<vmem>>, vector<1x2x128xf32>
    %92 = vector.shape_cast %91 : vector<1x2x128xf32> to vector<2x128xf32>
    %93 = vector.shape_cast %89 : vector<2x128xf32> to vector<1x2x128xf32>
    tpu.vector_store %arg11[%90, %c0_44, %c0_45], %93 {strides = array<i32>} : memref<8x2x128xf32, #tpu.memory_space<vmem>>, vector<1x2x128xf32>,
    %c8_i32 = arith.constant 8 : i32
    %c0_46 = arith.constant 0 : index
    %c0_47 = arith.constant 0 : index
    %94 = vector.load %arg12[%c0_46, %c0_47] : memref<2x32xf32, #tpu.memory_space<vmem>>, vector<2x32xf32>
    %c0_48 = arith.constant 0 : index
    %c0_49 = arith.constant 0 : index
    %95 = vector.load %arg13[%c0_48, %c0_49] : memref<2x32xf32, #tpu.memory_space<vmem>>, vector<2x32xf32>
    %c0_i32_50 = arith.constant 0 : i32
    %96 = arith.index_cast %c0_i32_50 : i32 to index
    %c0_51 = arith.constant 0 : index
    %c0_52 = arith.constant 0 : index
    %97 = vector.load %arg11[%96, %c0_51, %c0_52] : memref<8x2x128xf32, #tpu.memory_space<vmem>>, vector<1x2x128xf32>
    %98 = vector.shape_cast %97 : vector<1x2x128xf32> to vector<2x128xf32>
    %99 = arith.truncf %94 : vector<2x32xf32> to vector<2x32xbf16>
    %cst_53 = arith.constant dense<0.000000e+00> : vector<2x128xf32>
    %100 = tpu.matmul %99, %4, %cst_53 {dimension_numbers = #tpu.dot_dimension_numbers<[1], [0], [0], [1], [0, 0, 1, 1], [], []>} : vector<2x32xbf16>, vector<32x128xbf16>, vector<2x128xf32> -> vector<2x128xf32>
    %101 = arith.addf %98, %100 : vector<2x128xf32>
    %102 = vector.extract_strided_slice %101 {offsets = [0, 0], sizes = [2, 32], strides = [1, 1]} : vector<2x128xf32> to vector<2x32xf32>
    %cst_54 = arith.constant 5.000000e-01 : f32
    %103 = vector.broadcast %cst_54 : f32 to vector<2x32xf32>
    %104 = arith.mulf %103, %102 : vector<2x32xf32>
    %105 = math.tanh %104 : vector<2x32xf32>
    %cst_55 = arith.constant 5.000000e-01 : f32
    %106 = vector.broadcast %cst_55 : f32 to vector<2x32xf32>
    %107 = arith.mulf %106, %105 : vector<2x32xf32>
    %cst_56 = arith.constant 5.000000e-01 : f32
    %108 = vector.broadcast %cst_56 : f32 to vector<2x32xf32>
    %109 = arith.addf %107, %108 : vector<2x32xf32>
    %110 = vector.extract_strided_slice %101 {offsets = [0, 32], sizes = [2, 32], strides = [1, 1]} : vector<2x128xf32> to vector<2x32xf32>
    %cst_57 = arith.constant 5.000000e-01 : f32
    %111 = vector.broadcast %cst_57 : f32 to vector<2x32xf32>
    %112 = arith.mulf %111, %110 : vector<2x32xf32>
    %113 = math.tanh %112 : vector<2x32xf32>
    %cst_58 = arith.constant 5.000000e-01 : f32
    %114 = vector.broadcast %cst_58 : f32 to vector<2x32xf32>
    %115 = arith.mulf %114, %113 : vector<2x32xf32>
    %cst_59 = arith.constant 5.000000e-01 : f32
    %116 = vector.broadcast %cst_59 : f32 to vector<2x32xf32>
    %117 = arith.addf %115, %116 : vector<2x32xf32>
    %118 = vector.extract_strided_slice %101 {offsets = [0, 64], sizes = [2, 32], strides = [1, 1]} : vector<2x128xf32> to vector<2x32xf32>
    %119 = math.tanh %118 : vector<2x32xf32>
    %120 = vector.extract_strided_slice %101 {offsets = [0, 96], sizes = [2, 32], strides = [1, 1]} : vector<2x128xf32> to vector<2x32xf32>
    %cst_60 = arith.constant 5.000000e-01 : f32
    %121 = vector.broadcast %cst_60 : f32 to vector<2x32xf32>
    %122 = arith.mulf %121, %120 : vector<2x32xf32>
    %123 = math.tanh %122 : vector<2x32xf32>
    %cst_61 = arith.constant 5.000000e-01 : f32
    %124 = vector.broadcast %cst_61 : f32 to vector<2x32xf32>
    %125 = arith.mulf %124, %123 : vector<2x32xf32>
    %cst_62 = arith.constant 5.000000e-01 : f32
    %126 = vector.broadcast %cst_62 : f32 to vector<2x32xf32>
    %127 = arith.addf %125, %126 : vector<2x32xf32>
    %128 = arith.mulf %117, %95 : vector<2x32xf32>
    %129 = arith.mulf %109, %119 : vector<2x32xf32>
    %130 = arith.addf %128, %129 : vector<2x32xf32>
    %131 = math.tanh %130 : vector<2x32xf32>
    %132 = arith.mulf %127, %131 : vector<2x32xf32>
    %133 = arith.index_cast %c0_i32_50 : i32 to index
    %c0_63 = arith.constant 0 : index
    %c0_64 = arith.constant 0 : index
    %134 = vector.load %arg8[%133, %c0_63, %c0_64] : memref<8x2x32xf32, #tpu.memory_space<vmem>>, vector<1x2x32xf32>
    %135 = vector.shape_cast %134 : vector<1x2x32xf32> to vector<2x32xf32>
    %136 = vector.shape_cast %132 : vector<2x32xf32> to vector<1x2x32xf32>
    tpu.vector_store %arg8[%133, %c0_63, %c0_64], %136 {strides = array<i32>} : memref<8x2x32xf32, #tpu.memory_space<vmem>>, vector<1x2x32xf32>,
    %c1_i32_65 = arith.constant 1 : i32
    %137 = arith.index_cast %c1_i32_65 : i32 to index
    %c0_66 = arith.constant 0 : index
    %c0_67 = arith.constant 0 : index
    %138 = vector.load %arg11[%137, %c0_66, %c0_67] : memref<8x2x128xf32, #tpu.memory_space<vmem>>, vector<1x2x128xf32>
    %139 = vector.shape_cast %138 : vector<1x2x128xf32> to vector<2x128xf32>
    %140 = arith.truncf %132 : vector<2x32xf32> to vector<2x32xbf16>
    %cst_68 = arith.constant dense<0.000000e+00> : vector<2x128xf32>
    %141 = tpu.matmul %140, %4, %cst_68 {dimension_numbers = #tpu.dot_dimension_numbers<[1], [0], [0], [1], [0, 0, 1, 1], [], []>} : vector<2x32xbf16>, vector<32x128xbf16>, vector<2x128xf32> -> vector<2x128xf32>
    %142 = arith.addf %139, %141 : vector<2x128xf32>
    %143 = vector.extract_strided_slice %142 {offsets = [0, 0], sizes = [2, 32], strides = [1, 1]} : vector<2x128xf32> to vector<2x32xf32>
    %cst_69 = arith.constant 5.000000e-01 : f32
    %144 = vector.broadcast %cst_69 : f32 to vector<2x32xf32>
    %145 = arith.mulf %144, %143 : vector<2x32xf32>
    %146 = math.tanh %145 : vector<2x32xf32>
    %cst_70 = arith.constant 5.000000e-01 : f32
    %147 = vector.broadcast %cst_70 : f32 to vector<2x32xf32>
    %148 = arith.mulf %147, %146 : vector<2x32xf32>
    %cst_71 = arith.constant 5.000000e-01 : f32
    %149 = vector.broadcast %cst_71 : f32 to vector<2x32xf32>
    %150 = arith.addf %148, %149 : vector<2x32xf32>
    %151 = vector.extract_strided_slice %142 {offsets = [0, 32], sizes = [2, 32], strides = [1, 1]} : vector<2x128xf32> to vector<2x32xf32>
    %cst_72 = arith.constant 5.000000e-01 : f32
    %152 = vector.broadcast %cst_72 : f32 to vector<2x32xf32>
    %153 = arith.mulf %152, %151 : vector<2x32xf32>
    %154 = math.tanh %153 : vector<2x32xf32>
    %cst_73 = arith.constant 5.000000e-01 : f32
    %155 = vector.broadcast %cst_73 : f32 to vector<2x32xf32>
    %156 = arith.mulf %155, %154 : vector<2x32xf32>
    %cst_74 = arith.constant 5.000000e-01 : f32
    %157 = vector.broadcast %cst_74 : f32 to vector<2x32xf32>
    %158 = arith.addf %156, %157 : vector<2x32xf32>
    %159 = vector.extract_strided_slice %142 {offsets = [0, 64], sizes = [2, 32], strides = [1, 1]} : vector<2x128xf32> to vector<2x32xf32>
    %160 = math.tanh %159 : vector<2x32xf32>
    %161 = vector.extract_strided_slice %142 {offsets = [0, 96], sizes = [2, 32], strides = [1, 1]} : vector<2x128xf32> to vector<2x32xf32>
    %cst_75 = arith.constant 5.000000e-01 : f32
    %162 = vector.broadcast %cst_75 : f32 to vector<2x32xf32>
    %163 = arith.mulf %162, %161 : vector<2x32xf32>
    %164 = math.tanh %163 : vector<2x32xf32>
    %cst_76 = arith.constant 5.000000e-01 : f32
    %165 = vector.broadcast %cst_76 : f32 to vector<2x32xf32>
    %166 = arith.mulf %165, %164 : vector<2x32xf32>
    %cst_77 = arith.constant 5.000000e-01 : f32
    %167 = vector.broadcast %cst_77 : f32 to vector<2x32xf32>
    %168 = arith.addf %166, %167 : vector<2x32xf32>
    %169 = arith.mulf %158, %130 : vector<2x32xf32>
    %170 = arith.mulf %150, %160 : vector<2x32xf32>
    %171 = arith.addf %169, %170 : vector<2x32xf32>
    %172 = math.tanh %171 : vector<2x32xf32>
    %173 = arith.mulf %168, %172 : vector<2x32xf32>
    %174 = arith.index_cast %c1_i32_65 : i32 to index
    %c0_78 = arith.constant 0 : index
    %c0_79 = arith.constant 0 : index
    %175 = vector.load %arg8[%174, %c0_78, %c0_79] : memref<8x2x32xf32, #tpu.memory_space<vmem>>, vector<1x2x32xf32>
    %176 = vector.shape_cast %175 : vector<1x2x32xf32> to vector<2x32xf32>
    %177 = vector.shape_cast %173 : vector<2x32xf32> to vector<1x2x32xf32>
    tpu.vector_store %arg8[%174, %c0_78, %c0_79], %177 {strides = array<i32>} : memref<8x2x32xf32, #tpu.memory_space<vmem>>, vector<1x2x32xf32>,
    %c2_i32_80 = arith.constant 2 : i32
    %178 = arith.index_cast %c2_i32_80 : i32 to index
    %c0_81 = arith.constant 0 : index
    %c0_82 = arith.constant 0 : index
    %179 = vector.load %arg11[%178, %c0_81, %c0_82] : memref<8x2x128xf32, #tpu.memory_space<vmem>>, vector<1x2x128xf32>
    %180 = vector.shape_cast %179 : vector<1x2x128xf32> to vector<2x128xf32>
    %181 = arith.truncf %173 : vector<2x32xf32> to vector<2x32xbf16>
    %cst_83 = arith.constant dense<0.000000e+00> : vector<2x128xf32>
    %182 = tpu.matmul %181, %4, %cst_83 {dimension_numbers = #tpu.dot_dimension_numbers<[1], [0], [0], [1], [0, 0, 1, 1], [], []>} : vector<2x32xbf16>, vector<32x128xbf16>, vector<2x128xf32> -> vector<2x128xf32>
    %183 = arith.addf %180, %182 : vector<2x128xf32>
    %184 = vector.extract_strided_slice %183 {offsets = [0, 0], sizes = [2, 32], strides = [1, 1]} : vector<2x128xf32> to vector<2x32xf32>
    %cst_84 = arith.constant 5.000000e-01 : f32
    %185 = vector.broadcast %cst_84 : f32 to vector<2x32xf32>
    %186 = arith.mulf %185, %184 : vector<2x32xf32>
    %187 = math.tanh %186 : vector<2x32xf32>
    %cst_85 = arith.constant 5.000000e-01 : f32
    %188 = vector.broadcast %cst_85 : f32 to vector<2x32xf32>
    %189 = arith.mulf %188, %187 : vector<2x32xf32>
    %cst_86 = arith.constant 5.000000e-01 : f32
    %190 = vector.broadcast %cst_86 : f32 to vector<2x32xf32>
    %191 = arith.addf %189, %190 : vector<2x32xf32>
    %192 = vector.extract_strided_slice %183 {offsets = [0, 32], sizes = [2, 32], strides = [1, 1]} : vector<2x128xf32> to vector<2x32xf32>
    %cst_87 = arith.constant 5.000000e-01 : f32
    %193 = vector.broadcast %cst_87 : f32 to vector<2x32xf32>
    %194 = arith.mulf %193, %192 : vector<2x32xf32>
    %195 = math.tanh %194 : vector<2x32xf32>
    %cst_88 = arith.constant 5.000000e-01 : f32
    %196 = vector.broadcast %cst_88 : f32 to vector<2x32xf32>
    %197 = arith.mulf %196, %195 : vector<2x32xf32>
    %cst_89 = arith.constant 5.000000e-01 : f32
    %198 = vector.broadcast %cst_89 : f32 to vector<2x32xf32>
    %199 = arith.addf %197, %198 : vector<2x32xf32>
    %200 = vector.extract_strided_slice %183 {offsets = [0, 64], sizes = [2, 32], strides = [1, 1]} : vector<2x128xf32> to vector<2x32xf32>
    %201 = math.tanh %200 : vector<2x32xf32>
    %202 = vector.extract_strided_slice %183 {offsets = [0, 96], sizes = [2, 32], strides = [1, 1]} : vector<2x128xf32> to vector<2x32xf32>
    %cst_90 = arith.constant 5.000000e-01 : f32
    %203 = vector.broadcast %cst_90 : f32 to vector<2x32xf32>
    %204 = arith.mulf %203, %202 : vector<2x32xf32>
    %205 = math.tanh %204 : vector<2x32xf32>
    %cst_91 = arith.constant 5.000000e-01 : f32
    %206 = vector.broadcast %cst_91 : f32 to vector<2x32xf32>
    %207 = arith.mulf %206, %205 : vector<2x32xf32>
    %cst_92 = arith.constant 5.000000e-01 : f32
    %208 = vector.broadcast %cst_92 : f32 to vector<2x32xf32>
    %209 = arith.addf %207, %208 : vector<2x32xf32>
    %210 = arith.mulf %199, %171 : vector<2x32xf32>
    %211 = arith.mulf %191, %201 : vector<2x32xf32>
    %212 = arith.addf %210, %211 : vector<2x32xf32>
    %213 = math.tanh %212 : vector<2x32xf32>
    %214 = arith.mulf %209, %213 : vector<2x32xf32>
    %215 = arith.index_cast %c2_i32_80 : i32 to index
    %c0_93 = arith.constant 0 : index
    %c0_94 = arith.constant 0 : index
    %216 = vector.load %arg8[%215, %c0_93, %c0_94] : memref<8x2x32xf32, #tpu.memory_space<vmem>>, vector<1x2x32xf32>
    %217 = vector.shape_cast %216 : vector<1x2x32xf32> to vector<2x32xf32>
    %218 = vector.shape_cast %214 : vector<2x32xf32> to vector<1x2x32xf32>
    tpu.vector_store %arg8[%215, %c0_93, %c0_94], %218 {strides = array<i32>} : memref<8x2x32xf32, #tpu.memory_space<vmem>>, vector<1x2x32xf32>,
    %c3_i32_95 = arith.constant 3 : i32
    %219 = arith.index_cast %c3_i32_95 : i32 to index
    %c0_96 = arith.constant 0 : index
    %c0_97 = arith.constant 0 : index
    %220 = vector.load %arg11[%219, %c0_96, %c0_97] : memref<8x2x128xf32, #tpu.memory_space<vmem>>, vector<1x2x128xf32>
    %221 = vector.shape_cast %220 : vector<1x2x128xf32> to vector<2x128xf32>
    %222 = arith.truncf %214 : vector<2x32xf32> to vector<2x32xbf16>
    %cst_98 = arith.constant dense<0.000000e+00> : vector<2x128xf32>
    %223 = tpu.matmul %222, %4, %cst_98 {dimension_numbers = #tpu.dot_dimension_numbers<[1], [0], [0], [1], [0, 0, 1, 1], [], []>} : vector<2x32xbf16>, vector<32x128xbf16>, vector<2x128xf32> -> vector<2x128xf32>
    %224 = arith.addf %221, %223 : vector<2x128xf32>
    %225 = vector.extract_strided_slice %224 {offsets = [0, 0], sizes = [2, 32], strides = [1, 1]} : vector<2x128xf32> to vector<2x32xf32>
    %cst_99 = arith.constant 5.000000e-01 : f32
    %226 = vector.broadcast %cst_99 : f32 to vector<2x32xf32>
    %227 = arith.mulf %226, %225 : vector<2x32xf32>
    %228 = math.tanh %227 : vector<2x32xf32>
    %cst_100 = arith.constant 5.000000e-01 : f32
    %229 = vector.broadcast %cst_100 : f32 to vector<2x32xf32>
    %230 = arith.mulf %229, %228 : vector<2x32xf32>
    %cst_101 = arith.constant 5.000000e-01 : f32
    %231 = vector.broadcast %cst_101 : f32 to vector<2x32xf32>
    %232 = arith.addf %230, %231 : vector<2x32xf32>
    %233 = vector.extract_strided_slice %224 {offsets = [0, 32], sizes = [2, 32], strides = [1, 1]} : vector<2x128xf32> to vector<2x32xf32>
    %cst_102 = arith.constant 5.000000e-01 : f32
    %234 = vector.broadcast %cst_102 : f32 to vector<2x32xf32>
    %235 = arith.mulf %234, %233 : vector<2x32xf32>
    %236 = math.tanh %235 : vector<2x32xf32>
    %cst_103 = arith.constant 5.000000e-01 : f32
    %237 = vector.broadcast %cst_103 : f32 to vector<2x32xf32>
    %238 = arith.mulf %237, %236 : vector<2x32xf32>
    %cst_104 = arith.constant 5.000000e-01 : f32
    %239 = vector.broadcast %cst_104 : f32 to vector<2x32xf32>
    %240 = arith.addf %238, %239 : vector<2x32xf32>
    %241 = vector.extract_strided_slice %224 {offsets = [0, 64], sizes = [2, 32], strides = [1, 1]} : vector<2x128xf32> to vector<2x32xf32>
    %242 = math.tanh %241 : vector<2x32xf32>
    %243 = vector.extract_strided_slice %224 {offsets = [0, 96], sizes = [2, 32], strides = [1, 1]} : vector<2x128xf32> to vector<2x32xf32>
    %cst_105 = arith.constant 5.000000e-01 : f32
    %244 = vector.broadcast %cst_105 : f32 to vector<2x32xf32>
    %245 = arith.mulf %244, %243 : vector<2x32xf32>
    %246 = math.tanh %245 : vector<2x32xf32>
    %cst_106 = arith.constant 5.000000e-01 : f32
    %247 = vector.broadcast %cst_106 : f32 to vector<2x32xf32>
    %248 = arith.mulf %247, %246 : vector<2x32xf32>
    %cst_107 = arith.constant 5.000000e-01 : f32
    %249 = vector.broadcast %cst_107 : f32 to vector<2x32xf32>
    %250 = arith.addf %248, %249 : vector<2x32xf32>
    %251 = arith.mulf %240, %212 : vector<2x32xf32>
    %252 = arith.mulf %232, %242 : vector<2x32xf32>
    %253 = arith.addf %251, %252 : vector<2x32xf32>
    %254 = math.tanh %253 : vector<2x32xf32>
    %255 = arith.mulf %250, %254 : vector<2x32xf32>
    %256 = arith.index_cast %c3_i32_95 : i32 to index
    %c0_108 = arith.constant 0 : index
    %c0_109 = arith.constant 0 : index
    %257 = vector.load %arg8[%256, %c0_108, %c0_109] : memref<8x2x32xf32, #tpu.memory_space<vmem>>, vector<1x2x32xf32>
    %258 = vector.shape_cast %257 : vector<1x2x32xf32> to vector<2x32xf32>
    %259 = vector.shape_cast %255 : vector<2x32xf32> to vector<1x2x32xf32>
    tpu.vector_store %arg8[%256, %c0_108, %c0_109], %259 {strides = array<i32>} : memref<8x2x32xf32, #tpu.memory_space<vmem>>, vector<1x2x32xf32>,
    %c4_i32_110 = arith.constant 4 : i32
    %260 = arith.index_cast %c4_i32_110 : i32 to index
    %c0_111 = arith.constant 0 : index
    %c0_112 = arith.constant 0 : index
    %261 = vector.load %arg11[%260, %c0_111, %c0_112] : memref<8x2x128xf32, #tpu.memory_space<vmem>>, vector<1x2x128xf32>
    %262 = vector.shape_cast %261 : vector<1x2x128xf32> to vector<2x128xf32>
    %263 = arith.truncf %255 : vector<2x32xf32> to vector<2x32xbf16>
    %cst_113 = arith.constant dense<0.000000e+00> : vector<2x128xf32>
    %264 = tpu.matmul %263, %4, %cst_113 {dimension_numbers = #tpu.dot_dimension_numbers<[1], [0], [0], [1], [0, 0, 1, 1], [], []>} : vector<2x32xbf16>, vector<32x128xbf16>, vector<2x128xf32> -> vector<2x128xf32>
    %265 = arith.addf %262, %264 : vector<2x128xf32>
    %266 = vector.extract_strided_slice %265 {offsets = [0, 0], sizes = [2, 32], strides = [1, 1]} : vector<2x128xf32> to vector<2x32xf32>
    %cst_114 = arith.constant 5.000000e-01 : f32
    %267 = vector.broadcast %cst_114 : f32 to vector<2x32xf32>
    %268 = arith.mulf %267, %266 : vector<2x32xf32>
    %269 = math.tanh %268 : vector<2x32xf32>
    %cst_115 = arith.constant 5.000000e-01 : f32
    %270 = vector.broadcast %cst_115 : f32 to vector<2x32xf32>
    %271 = arith.mulf %270, %269 : vector<2x32xf32>
    %cst_116 = arith.constant 5.000000e-01 : f32
    %272 = vector.broadcast %cst_116 : f32 to vector<2x32xf32>
    %273 = arith.addf %271, %272 : vector<2x32xf32>
    %274 = vector.extract_strided_slice %265 {offsets = [0, 32], sizes = [2, 32], strides = [1, 1]} : vector<2x128xf32> to vector<2x32xf32>
    %cst_117 = arith.constant 5.000000e-01 : f32
    %275 = vector.broadcast %cst_117 : f32 to vector<2x32xf32>
    %276 = arith.mulf %275, %274 : vector<2x32xf32>
    %277 = math.tanh %276 : vector<2x32xf32>
    %cst_118 = arith.constant 5.000000e-01 : f32
    %278 = vector.broadcast %cst_118 : f32 to vector<2x32xf32>
    %279 = arith.mulf %278, %277 : vector<2x32xf32>
    %cst_119 = arith.constant 5.000000e-01 : f32
    %280 = vector.broadcast %cst_119 : f32 to vector<2x32xf32>
    %281 = arith.addf %279, %280 : vector<2x32xf32>
    %282 = vector.extract_strided_slice %265 {offsets = [0, 64], sizes = [2, 32], strides = [1, 1]} : vector<2x128xf32> to vector<2x32xf32>
    %283 = math.tanh %282 : vector<2x32xf32>
    %284 = vector.extract_strided_slice %265 {offsets = [0, 96], sizes = [2, 32], strides = [1, 1]} : vector<2x128xf32> to vector<2x32xf32>
    %cst_120 = arith.constant 5.000000e-01 : f32
    %285 = vector.broadcast %cst_120 : f32 to vector<2x32xf32>
    %286 = arith.mulf %285, %284 : vector<2x32xf32>
    %287 = math.tanh %286 : vector<2x32xf32>
    %cst_121 = arith.constant 5.000000e-01 : f32
    %288 = vector.broadcast %cst_121 : f32 to vector<2x32xf32>
    %289 = arith.mulf %288, %287 : vector<2x32xf32>
    %cst_122 = arith.constant 5.000000e-01 : f32
    %290 = vector.broadcast %cst_122 : f32 to vector<2x32xf32>
    %291 = arith.addf %289, %290 : vector<2x32xf32>
    %292 = arith.mulf %281, %253 : vector<2x32xf32>
    %293 = arith.mulf %273, %283 : vector<2x32xf32>
    %294 = arith.addf %292, %293 : vector<2x32xf32>
    %295 = math.tanh %294 : vector<2x32xf32>
    %296 = arith.mulf %291, %295 : vector<2x32xf32>
    %297 = arith.index_cast %c4_i32_110 : i32 to index
    %c0_123 = arith.constant 0 : index
    %c0_124 = arith.constant 0 : index
    %298 = vector.load %arg8[%297, %c0_123, %c0_124] : memref<8x2x32xf32, #tpu.memory_space<vmem>>, vector<1x2x32xf32>
    %299 = vector.shape_cast %298 : vector<1x2x32xf32> to vector<2x32xf32>
    %300 = vector.shape_cast %296 : vector<2x32xf32> to vector<1x2x32xf32>
    tpu.vector_store %arg8[%297, %c0_123, %c0_124], %300 {strides = array<i32>} : memref<8x2x32xf32, #tpu.memory_space<vmem>>, vector<1x2x32xf32>,
    %c5_i32_125 = arith.constant 5 : i32
    %301 = arith.index_cast %c5_i32_125 : i32 to index
    %c0_126 = arith.constant 0 : index
    %c0_127 = arith.constant 0 : index
    %302 = vector.load %arg11[%301, %c0_126, %c0_127] : memref<8x2x128xf32, #tpu.memory_space<vmem>>, vector<1x2x128xf32>
    %303 = vector.shape_cast %302 : vector<1x2x128xf32> to vector<2x128xf32>
    %304 = arith.truncf %296 : vector<2x32xf32> to vector<2x32xbf16>
    %cst_128 = arith.constant dense<0.000000e+00> : vector<2x128xf32>
    %305 = tpu.matmul %304, %4, %cst_128 {dimension_numbers = #tpu.dot_dimension_numbers<[1], [0], [0], [1], [0, 0, 1, 1], [], []>} : vector<2x32xbf16>, vector<32x128xbf16>, vector<2x128xf32> -> vector<2x128xf32>
    %306 = arith.addf %303, %305 : vector<2x128xf32>
    %307 = vector.extract_strided_slice %306 {offsets = [0, 0], sizes = [2, 32], strides = [1, 1]} : vector<2x128xf32> to vector<2x32xf32>
    %cst_129 = arith.constant 5.000000e-01 : f32
    %308 = vector.broadcast %cst_129 : f32 to vector<2x32xf32>
    %309 = arith.mulf %308, %307 : vector<2x32xf32>
    %310 = math.tanh %309 : vector<2x32xf32>
    %cst_130 = arith.constant 5.000000e-01 : f32
    %311 = vector.broadcast %cst_130 : f32 to vector<2x32xf32>
    %312 = arith.mulf %311, %310 : vector<2x32xf32>
    %cst_131 = arith.constant 5.000000e-01 : f32
    %313 = vector.broadcast %cst_131 : f32 to vector<2x32xf32>
    %314 = arith.addf %312, %313 : vector<2x32xf32>
    %315 = vector.extract_strided_slice %306 {offsets = [0, 32], sizes = [2, 32], strides = [1, 1]} : vector<2x128xf32> to vector<2x32xf32>
    %cst_132 = arith.constant 5.000000e-01 : f32
    %316 = vector.broadcast %cst_132 : f32 to vector<2x32xf32>
    %317 = arith.mulf %316, %315 : vector<2x32xf32>
    %318 = math.tanh %317 : vector<2x32xf32>
    %cst_133 = arith.constant 5.000000e-01 : f32
    %319 = vector.broadcast %cst_133 : f32 to vector<2x32xf32>
    %320 = arith.mulf %319, %318 : vector<2x32xf32>
    %cst_134 = arith.constant 5.000000e-01 : f32
    %321 = vector.broadcast %cst_134 : f32 to vector<2x32xf32>
    %322 = arith.addf %320, %321 : vector<2x32xf32>
    %323 = vector.extract_strided_slice %306 {offsets = [0, 64], sizes = [2, 32], strides = [1, 1]} : vector<2x128xf32> to vector<2x32xf32>
    %324 = math.tanh %323 : vector<2x32xf32>
    %325 = vector.extract_strided_slice %306 {offsets = [0, 96], sizes = [2, 32], strides = [1, 1]} : vector<2x128xf32> to vector<2x32xf32>
    %cst_135 = arith.constant 5.000000e-01 : f32
    %326 = vector.broadcast %cst_135 : f32 to vector<2x32xf32>
    %327 = arith.mulf %326, %325 : vector<2x32xf32>
    %328 = math.tanh %327 : vector<2x32xf32>
    %cst_136 = arith.constant 5.000000e-01 : f32
    %329 = vector.broadcast %cst_136 : f32 to vector<2x32xf32>
    %330 = arith.mulf %329, %328 : vector<2x32xf32>
    %cst_137 = arith.constant 5.000000e-01 : f32
    %331 = vector.broadcast %cst_137 : f32 to vector<2x32xf32>
    %332 = arith.addf %330, %331 : vector<2x32xf32>
    %333 = arith.mulf %322, %294 : vector<2x32xf32>
    %334 = arith.mulf %314, %324 : vector<2x32xf32>
    %335 = arith.addf %333, %334 : vector<2x32xf32>
    %336 = math.tanh %335 : vector<2x32xf32>
    %337 = arith.mulf %332, %336 : vector<2x32xf32>
    %338 = arith.index_cast %c5_i32_125 : i32 to index
    %c0_138 = arith.constant 0 : index
    %c0_139 = arith.constant 0 : index
    %339 = vector.load %arg8[%338, %c0_138, %c0_139] : memref<8x2x32xf32, #tpu.memory_space<vmem>>, vector<1x2x32xf32>
    %340 = vector.shape_cast %339 : vector<1x2x32xf32> to vector<2x32xf32>
    %341 = vector.shape_cast %337 : vector<2x32xf32> to vector<1x2x32xf32>
    tpu.vector_store %arg8[%338, %c0_138, %c0_139], %341 {strides = array<i32>} : memref<8x2x32xf32, #tpu.memory_space<vmem>>, vector<1x2x32xf32>,
    %c6_i32_140 = arith.constant 6 : i32
    %342 = arith.index_cast %c6_i32_140 : i32 to index
    %c0_141 = arith.constant 0 : index
    %c0_142 = arith.constant 0 : index
    %343 = vector.load %arg11[%342, %c0_141, %c0_142] : memref<8x2x128xf32, #tpu.memory_space<vmem>>, vector<1x2x128xf32>
    %344 = vector.shape_cast %343 : vector<1x2x128xf32> to vector<2x128xf32>
    %345 = arith.truncf %337 : vector<2x32xf32> to vector<2x32xbf16>
    %cst_143 = arith.constant dense<0.000000e+00> : vector<2x128xf32>
    %346 = tpu.matmul %345, %4, %cst_143 {dimension_numbers = #tpu.dot_dimension_numbers<[1], [0], [0], [1], [0, 0, 1, 1], [], []>} : vector<2x32xbf16>, vector<32x128xbf16>, vector<2x128xf32> -> vector<2x128xf32>
    %347 = arith.addf %344, %346 : vector<2x128xf32>
    %348 = vector.extract_strided_slice %347 {offsets = [0, 0], sizes = [2, 32], strides = [1, 1]} : vector<2x128xf32> to vector<2x32xf32>
    %cst_144 = arith.constant 5.000000e-01 : f32
    %349 = vector.broadcast %cst_144 : f32 to vector<2x32xf32>
    %350 = arith.mulf %349, %348 : vector<2x32xf32>
    %351 = math.tanh %350 : vector<2x32xf32>
    %cst_145 = arith.constant 5.000000e-01 : f32
    %352 = vector.broadcast %cst_145 : f32 to vector<2x32xf32>
    %353 = arith.mulf %352, %351 : vector<2x32xf32>
    %cst_146 = arith.constant 5.000000e-01 : f32
    %354 = vector.broadcast %cst_146 : f32 to vector<2x32xf32>
    %355 = arith.addf %353, %354 : vector<2x32xf32>
    %356 = vector.extract_strided_slice %347 {offsets = [0, 32], sizes = [2, 32], strides = [1, 1]} : vector<2x128xf32> to vector<2x32xf32>
    %cst_147 = arith.constant 5.000000e-01 : f32
    %357 = vector.broadcast %cst_147 : f32 to vector<2x32xf32>
    %358 = arith.mulf %357, %356 : vector<2x32xf32>
    %359 = math.tanh %358 : vector<2x32xf32>
    %cst_148 = arith.constant 5.000000e-01 : f32
    %360 = vector.broadcast %cst_148 : f32 to vector<2x32xf32>
    %361 = arith.mulf %360, %359 : vector<2x32xf32>
    %cst_149 = arith.constant 5.000000e-01 : f32
    %362 = vector.broadcast %cst_149 : f32 to vector<2x32xf32>
    %363 = arith.addf %361, %362 : vector<2x32xf32>
    %364 = vector.extract_strided_slice %347 {offsets = [0, 64], sizes = [2, 32], strides = [1, 1]} : vector<2x128xf32> to vector<2x32xf32>
    %365 = math.tanh %364 : vector<2x32xf32>
    %366 = vector.extract_strided_slice %347 {offsets = [0, 96], sizes = [2, 32], strides = [1, 1]} : vector<2x128xf32> to vector<2x32xf32>
    %cst_150 = arith.constant 5.000000e-01 : f32
    %367 = vector.broadcast %cst_150 : f32 to vector<2x32xf32>
    %368 = arith.mulf %367, %366 : vector<2x32xf32>
    %369 = math.tanh %368 : vector<2x32xf32>
    %cst_151 = arith.constant 5.000000e-01 : f32
    %370 = vector.broadcast %cst_151 : f32 to vector<2x32xf32>
    %371 = arith.mulf %370, %369 : vector<2x32xf32>
    %cst_152 = arith.constant 5.000000e-01 : f32
    %372 = vector.broadcast %cst_152 : f32 to vector<2x32xf32>
    %373 = arith.addf %371, %372 : vector<2x32xf32>
    %374 = arith.mulf %363, %335 : vector<2x32xf32>
    %375 = arith.mulf %355, %365 : vector<2x32xf32>
    %376 = arith.addf %374, %375 : vector<2x32xf32>
    %377 = math.tanh %376 : vector<2x32xf32>
    %378 = arith.mulf %373, %377 : vector<2x32xf32>
    %379 = arith.index_cast %c6_i32_140 : i32 to index
    %c0_153 = arith.constant 0 : index
    %c0_154 = arith.constant 0 : index
    %380 = vector.load %arg8[%379, %c0_153, %c0_154] : memref<8x2x32xf32, #tpu.memory_space<vmem>>, vector<1x2x32xf32>
    %381 = vector.shape_cast %380 : vector<1x2x32xf32> to vector<2x32xf32>
    %382 = vector.shape_cast %378 : vector<2x32xf32> to vector<1x2x32xf32>
    tpu.vector_store %arg8[%379, %c0_153, %c0_154], %382 {strides = array<i32>} : memref<8x2x32xf32, #tpu.memory_space<vmem>>, vector<1x2x32xf32>,
    %c7_i32_155 = arith.constant 7 : i32
    %383 = arith.index_cast %c7_i32_155 : i32 to index
    %c0_156 = arith.constant 0 : index
    %c0_157 = arith.constant 0 : index
    %384 = vector.load %arg11[%383, %c0_156, %c0_157] : memref<8x2x128xf32, #tpu.memory_space<vmem>>, vector<1x2x128xf32>
    %385 = vector.shape_cast %384 : vector<1x2x128xf32> to vector<2x128xf32>
    %386 = arith.truncf %378 : vector<2x32xf32> to vector<2x32xbf16>
    %cst_158 = arith.constant dense<0.000000e+00> : vector<2x128xf32>
    %387 = tpu.matmul %386, %4, %cst_158 {dimension_numbers = #tpu.dot_dimension_numbers<[1], [0], [0], [1], [0, 0, 1, 1], [], []>} : vector<2x32xbf16>, vector<32x128xbf16>, vector<2x128xf32> -> vector<2x128xf32>
    %388 = arith.addf %385, %387 : vector<2x128xf32>
    %389 = vector.extract_strided_slice %388 {offsets = [0, 0], sizes = [2, 32], strides = [1, 1]} : vector<2x128xf32> to vector<2x32xf32>
    %cst_159 = arith.constant 5.000000e-01 : f32
    %390 = vector.broadcast %cst_159 : f32 to vector<2x32xf32>
    %391 = arith.mulf %390, %389 : vector<2x32xf32>
    %392 = math.tanh %391 : vector<2x32xf32>
    %cst_160 = arith.constant 5.000000e-01 : f32
    %393 = vector.broadcast %cst_160 : f32 to vector<2x32xf32>
    %394 = arith.mulf %393, %392 : vector<2x32xf32>
    %cst_161 = arith.constant 5.000000e-01 : f32
    %395 = vector.broadcast %cst_161 : f32 to vector<2x32xf32>
    %396 = arith.addf %394, %395 : vector<2x32xf32>
    %397 = vector.extract_strided_slice %388 {offsets = [0, 32], sizes = [2, 32], strides = [1, 1]} : vector<2x128xf32> to vector<2x32xf32>
    %cst_162 = arith.constant 5.000000e-01 : f32
    %398 = vector.broadcast %cst_162 : f32 to vector<2x32xf32>
    %399 = arith.mulf %398, %397 : vector<2x32xf32>
    %400 = math.tanh %399 : vector<2x32xf32>
    %cst_163 = arith.constant 5.000000e-01 : f32
    %401 = vector.broadcast %cst_163 : f32 to vector<2x32xf32>
    %402 = arith.mulf %401, %400 : vector<2x32xf32>
    %cst_164 = arith.constant 5.000000e-01 : f32
    %403 = vector.broadcast %cst_164 : f32 to vector<2x32xf32>
    %404 = arith.addf %402, %403 : vector<2x32xf32>
    %405 = vector.extract_strided_slice %388 {offsets = [0, 64], sizes = [2, 32], strides = [1, 1]} : vector<2x128xf32> to vector<2x32xf32>
    %406 = math.tanh %405 : vector<2x32xf32>
    %407 = vector.extract_strided_slice %388 {offsets = [0, 96], sizes = [2, 32], strides = [1, 1]} : vector<2x128xf32> to vector<2x32xf32>
    %cst_165 = arith.constant 5.000000e-01 : f32
    %408 = vector.broadcast %cst_165 : f32 to vector<2x32xf32>
    %409 = arith.mulf %408, %407 : vector<2x32xf32>
    %410 = math.tanh %409 : vector<2x32xf32>
    %cst_166 = arith.constant 5.000000e-01 : f32
    %411 = vector.broadcast %cst_166 : f32 to vector<2x32xf32>
    %412 = arith.mulf %411, %410 : vector<2x32xf32>
    %cst_167 = arith.constant 5.000000e-01 : f32
    %413 = vector.broadcast %cst_167 : f32 to vector<2x32xf32>
    %414 = arith.addf %412, %413 : vector<2x32xf32>
    %415 = arith.mulf %404, %376 : vector<2x32xf32>
    %416 = arith.mulf %396, %406 : vector<2x32xf32>
    %417 = arith.addf %415, %416 : vector<2x32xf32>
    %418 = math.tanh %417 : vector<2x32xf32>
    %419 = arith.mulf %414, %418 : vector<2x32xf32>
    %420 = arith.index_cast %c7_i32_155 : i32 to index
    %c0_168 = arith.constant 0 : index
    %c0_169 = arith.constant 0 : index
    %421 = vector.load %arg8[%420, %c0_168, %c0_169] : memref<8x2x32xf32, #tpu.memory_space<vmem>>, vector<1x2x32xf32>
    %422 = vector.shape_cast %421 : vector<1x2x32xf32> to vector<2x32xf32>
    %423 = vector.shape_cast %419 : vector<2x32xf32> to vector<1x2x32xf32>
    tpu.vector_store %arg8[%420, %c0_168, %c0_169], %423 {strides = array<i32>} : memref<8x2x32xf32, #tpu.memory_space<vmem>>, vector<1x2x32xf32>,
    %c8_i32_170 = arith.constant 8 : i32
    %c0_171 = arith.constant 0 : index
    %c0_172 = arith.constant 0 : index
    %424 = vector.load %arg12[%c0_171, %c0_172] : memref<2x32xf32, #tpu.memory_space<vmem>>, vector<2x32xf32>
    tpu.vector_store %arg12[%c0_171, %c0_172], %419 {strides = array<i32>} : memref<2x32xf32, #tpu.memory_space<vmem>>, vector<2x32xf32>,
    %c0_173 = arith.constant 0 : index
    %c0_174 = arith.constant 0 : index
    %425 = vector.load %arg13[%c0_173, %c0_174] : memref<2x32xf32, #tpu.memory_space<vmem>>, vector<2x32xf32>
    tpu.vector_store %arg13[%c0_173, %c0_174], %417 {strides = array<i32>} : memref<2x32xf32, #tpu.memory_space<vmem>>, vector<2x32xf32>,
    %c0_175 = arith.constant 0 : index
    %c0_176 = arith.constant 0 : index
    %426 = vector.load %arg9[%c0_175, %c0_176] : memref<2x32xf32, #tpu.memory_space<vmem>>, vector<2x32xf32>
    tpu.vector_store %arg9[%c0_175, %c0_176], %419 {strides = array<i32>} : memref<2x32xf32, #tpu.memory_space<vmem>>, vector<2x32xf32>,
    %c0_177 = arith.constant 0 : index
    %c0_178 = arith.constant 0 : index
    %427 = vector.load %arg10[%c0_177, %c0_178] : memref<2x32xf32, #tpu.memory_space<vmem>>, vector<2x32xf32>
    tpu.vector_store %arg10[%c0_177, %c0_178], %417 {strides = array<i32>} : memref<2x32xf32, #tpu.memory_space<vmem>>, vector<2x32xf32>,
    return
  }
  func.func @transform_0(%arg0: i32, %arg1: i32) -> (i32, i32, i32) {
    %c0_i32 = arith.constant 0 : i32
    %c0_i32_0 = arith.constant 0 : i32
    return %arg1, %arg0, %c0_i32 : i32, i32, i32
  }
  func.func @transform_1(%arg0: i32, %arg1: i32) -> (i32, i32) {
    %c0_i32 = arith.constant 0 : i32
    %c0_i32_0 = arith.constant 0 : i32
    %c0_i32_1 = arith.constant 0 : i32
    return %c0_i32, %c0_i32_0 : i32, i32
  }
  func.func @transform_2(%arg0: i32, %arg1: i32) -> (i32, i32) {
    %c0_i32 = arith.constant 0 : i32
    %c0_i32_0 = arith.constant 0 : i32
    %c0_i32_1 = arith.constant 0 : i32
    return %c0_i32, %c0_i32_0 : i32, i32
  }
  func.func @transform_3(%arg0: i32, %arg1: i32) -> (i32, i32) {
    %c0_i32 = arith.constant 0 : i32
    %c0_i32_0 = arith.constant 0 : i32
    %c0_i32_1 = arith.constant 0 : i32
    return %c0_i32, %c0_i32_0 : i32, i32
  }
  func.func @transform_4(%arg0: i32, %arg1: i32) -> (i32, i32) {
    %c0_i32 = arith.constant 0 : i32
    %c0_i32_0 = arith.constant 0 : i32
    return %arg0, %c0_i32 : i32, i32
  }
  func.func @transform_5(%arg0: i32, %arg1: i32) -> (i32, i32) {
    %c0_i32 = arith.constant 0 : i32
    %c0_i32_0 = arith.constant 0 : i32
    return %arg0, %c0_i32 : i32, i32
  }
  func.func @transform_6(%arg0: i32, %arg1: i32) -> (i32, i32, i32) {
    %c0_i32 = arith.constant 0 : i32
    %c0_i32_0 = arith.constant 0 : i32
    return %arg1, %arg0, %c0_i32 : i32, i32, i32
  }
  func.func @transform_7(%arg0: i32, %arg1: i32) -> (i32, i32) {
    %c0_i32 = arith.constant 0 : i32
    %c0_i32_0 = arith.constant 0 : i32
    return %arg0, %c0_i32 : i32, i32
  }
  func.func @transform_8(%arg0: i32, %arg1: i32) -> (i32, i32) {
    %c0_i32 = arith.constant 0 : i32
    %c0_i32_0 = arith.constant 0 : i32
    return %arg0, %c0_i32 : i32, i32
  }
}

module attributes {stable_mosaic.version = 11 : i64} {
  func.func @_lstm_recurrent_kernel(%arg0: i32, %arg1: i32, %arg2: memref<8x2x16xf32, #tpu.memory_space<vmem>>, %arg3: memref<16x128xbf16, #tpu.memory_space<vmem>>, %arg4: memref<32x128xbf16, #tpu.memory_space<vmem>>, %arg5: memref<1x128xf32, #tpu.memory_space<vmem>>, %arg6: memref<2x32xf32, #tpu.memory_space<vmem>>, %arg7: memref<2x32xf32, #tpu.memory_space<vmem>>, %arg8: memref<8x2x32xf32, #tpu.memory_space<vmem>>, %arg9: memref<2x32xf32, #tpu.memory_space<vmem>>, %arg10: memref<2x32xf32, #tpu.memory_space<vmem>>, %arg11: memref<8x2x128xf32, #tpu.memory_space<vmem>>, %arg12: memref<2x32xf32, #tpu.memory_space<vmem>>, %arg13: memref<2x32xf32, #tpu.memory_space<vmem>>) attributes {dimension_semantics = [#tpu.dimension_semantics<parallel>, #tpu.dimension_semantics<arbitrary>], iteration_bounds = array<i64: 1, 1>, scalar_prefetch = 0 : i64, scratch_operands = 3 : i64, tpu.core_type = #tpu.core_type<tc>, window_params = [{transform_indices = @transform_0, window_bounds = array<i64: 8, 2, 16>}, {pipeline_mode = #tpu.pipeline_mode<synchronous>, transform_indices = @transform_1, window_bounds = array<i64: 16, 128>}, {pipeline_mode = #tpu.pipeline_mode<synchronous>, transform_indices = @transform_2, window_bounds = array<i64: 32, 128>}, {pipeline_mode = #tpu.pipeline_mode<synchronous>, transform_indices = @transform_3, window_bounds = array<i64: 1, 128>}, {transform_indices = @transform_4, window_bounds = array<i64: 2, 32>}, {transform_indices = @transform_5, window_bounds = array<i64: 2, 32>}, {transform_indices = @transform_6, window_bounds = array<i64: 8, 2, 32>}, {transform_indices = @transform_7, window_bounds = array<i64: 2, 32>}, {transform_indices = @transform_8, window_bounds = array<i64: 2, 32>}]} {
    %c0_i32 = arith.constant 0 : i32
    %0 = arith.cmpi eq, %arg1, %c0_i32 : i32
    %1 = arith.extui %0 : i1 to i32
    %c0_i32_0 = arith.constant 0 : i32
    %2 = arith.cmpi ne, %1, %c0_i32_0 : i32
    scf.if %2 {
      %c0_179 = arith.constant 0 : index
      %c0_180 = arith.constant 0 : index
      %428 = vector.load %arg6[%c0_179, %c0_180] : memref<2x32xf32, #tpu.memory_space<vmem>>, vector<2x32xf32>
      %c0_181 = arith.constant 0 : index
      %c0_182 = arith.constant 0 : index
      %429 = vector.load %arg12[%c0_181, %c0_182] : memref<2x32xf32, #tpu.memory_space<vmem>>, vector<2x32xf32>
      tpu.vector_store %arg12[%c0_181, %c0_182], %428 {strides = array<i32>} : memref<2x32xf32, #tpu.memory_space<vmem>>, vector<2x32xf32>,
      %c0_183 = arith.constant 0 : index
      %c0_184 = arith.constant 0 : index
      %430 = vector.load %arg7[%c0_183, %c0_184] : memref<2x32xf32, #tpu.memory_space<vmem>>, vector<2x32xf32>
      %c0_185 = arith.constant 0 : index
      %c0_186 = arith.constant 0 : index
      %431 = vector.load %arg13[%c0_185, %c0_186] : memref<2x32xf32, #tpu.memory_space<vmem>>, vector<2x32xf32>
      tpu.vector_store %arg13[%c0_185, %c0_186], %430 {strides = array<i32>} : memref<2x32xf32, #tpu.memory_space<vmem>>, vector<2x32xf32>,
    } else {
    }
    %c0 = arith.constant 0 : index
    %c0_1 = arith.constant 0 : index
    %3 = vector.load %arg3[%c0, %c0_1] : memref<16x128xbf16, #tpu.memory_space<vmem>>, vector<16x128xbf16>
    %c0_2 = arith.constant 0 : index
    %c0_3 = arith.constant 0 : index
    %4 = vector.load %arg4[%c0_2, %c0_3] : memref<32x128xbf16, #tpu.memory_space<vmem>>, vector<32x128xbf16>
    %c0_4 = arith.constant 0 : index
    %c0_5 = arith.constant 0 : index
    %5 = vector.load %arg5[%c0_4, %c0_5] : memref<1x128xf32, #tpu.memory_space<vmem>>, vector<1x128xf32>
    %c0_i32_6 = arith.constant 0 : i32
    %6 = arith.index_cast %c0_i32_6 : i32 to index
    %c0_7 = arith.constant 0 : index
    %c0_8 = arith.constant 0 : index
    %7 = vector.load %arg2[%6, %c0_7, %c0_8] : memref<8x2x16xf32, #tpu.memory_space<vmem>>, vector<1x2x16xf32>
    %8 = vector.shape_cast %7 : vector<1x2x16xf32> to vector<2x16xf32>
    %9 = arith.truncf %8 : vector<2x16xf32> to vector<2x16xbf16>
    %cst = arith.constant dense<0.000000e+00> : vector<2x128xf32>
    %10 = tpu.matmul %9, %3, %cst {dimension_numbers = #tpu.dot_dimension_numbers<[1], [0], [0], [1], [0, 0, 1, 1], [], []>} : vector<2x16xbf16>, vector<16x128xbf16>, vector<2x128xf32> -> vector<2x128xf32>
    %11 = vector.broadcast %5 : vector<1x128xf32> to vector<2x128xf32>
    %12 = arith.addf %10, %11 : vector<2x128xf32>
    %13 = arith.index_cast %c0_i32_6 : i32 to index
    %c0_9 = arith.constant 0 : index
    %c0_10 = arith.constant 0 : index
    %14 = vector.load %arg11[%13, %c0_9, %c0_10] : memref<8x2x128xf32, #tpu.memory_space<vmem>>, vector<1x2x128xf32>
    %15 = vector.shape_cast %14 : vector<1x2x128xf32> to vector<2x128xf32>
    %16 = vector.shape_cast %12 : vector<2x128xf32> to vector<1x2x128xf32>
    tpu.vector_store %arg11[%13, %c0_9, %c0_10], %16 {strides = array<i32>} : memref<8x2x128xf32, #tpu.memory_space<vmem>>, vector<1x2x128xf32>,
    %c1_i32 = arith.constant 1 : i32
    %17 = arith.index_cast %c1_i32 : i32 to index
    %c0_11 = arith.constant 0 : index
    %c0_12 = arith.constant 0 : index
    %18 = vector.load %arg2[%17, %c0_11, %c0_12] : memref<8x2x16xf32, #tpu.memory_space<vmem>>, vector<1x2x16xf32>
    %19 = vector.shape_cast %18 : vector<1x2x16xf32> to vector<2x16xf32>
    %20 = arith.truncf %19 : vector<2x16xf32> to vector<2x16xbf16>
    %cst_13 = arith.constant dense<0.000000e+00> : vector<2x128xf32>
    %21 = tpu.matmul %20, %3, %cst_13 {dimension_numbers = #tpu.dot_dimension_numbers<[1], [0], [0], [1], [0, 0, 1, 1], [], []>} : vector<2x16xbf16>, vector<16x128xbf16>, vector<2x128xf32> -> vector<2x128xf32>
    %22 = vector.broadcast %5 : vector<1x128xf32> to vector<2x128xf32>
    %23 = arith.addf %21, %22 : vector<2x128xf32>
    %24 = arith.index_cast %c1_i32 : i32 to index
    %c0_14 = arith.constant 0 : index
    %c0_15 = arith.constant 0 : index
    %25 = vector.load %arg11[%24, %c0_14, %c0_15] : memref<8x2x128xf32, #tpu.memory_space<vmem>>, vector<1x2x128xf32>
    %26 = vector.shape_cast %25 : vector<1x2x128xf32> to vector<2x128xf32>
    %27 = vector.shape_cast %23 : vector<2x128xf32> to vector<1x2x128xf32>
    tpu.vector_store %arg11[%24, %c0_14, %c0_15], %27 {strides = array<i32>} : memref<8x2x128xf32, #tpu.memory_space<vmem>>, vector<1x2x128xf32>,
    %c2_i32 = arith.constant 2 : i32
    %28 = arith.index_cast %c2_i32 : i32 to index
    %c0_16 = arith.constant 0 : index
    %c0_17 = arith.constant 0 : index
    %29 = vector.load %arg2[%28, %c0_16, %c0_17] : memref<8x2x16xf32, #tpu.memory_space<vmem>>, vector<1x2x16xf32>
    %30 = vector.shape_cast %29 : vector<1x2x16xf32> to vector<2x16xf32>
    %31 = arith.truncf %30 : vector<2x16xf32> to vector<2x16xbf16>
    %cst_18 = arith.constant dense<0.000000e+00> : vector<2x128xf32>
    %32 = tpu.matmul %31, %3, %cst_18 {dimension_numbers = #tpu.dot_dimension_numbers<[1], [0], [0], [1], [0, 0, 1, 1], [], []>} : vector<2x16xbf16>, vector<16x128xbf16>, vector<2x128xf32> -> vector<2x128xf32>
    %33 = vector.broadcast %5 : vector<1x128xf32> to vector<2x128xf32>
    %34 = arith.addf %32, %33 : vector<2x128xf32>
    %35 = arith.index_cast %c2_i32 : i32 to index
    %c0_19 = arith.constant 0 : index
    %c0_20 = arith.constant 0 : index
    %36 = vector.load %arg11[%35, %c0_19, %c0_20] : memref<8x2x128xf32, #tpu.memory_space<vmem>>, vector<1x2x128xf32>
    %37 = vector.shape_cast %36 : vector<1x2x128xf32> to vector<2x128xf32>
    %38 = vector.shape_cast %34 : vector<2x128xf32> to vector<1x2x128xf32>
    tpu.vector_store %arg11[%35, %c0_19, %c0_20], %38 {strides = array<i32>} : memref<8x2x128xf32, #tpu.memory_space<vmem>>, vector<1x2x128xf32>,
    %c3_i32 = arith.constant 3 : i32
    %39 = arith.index_cast %c3_i32 : i32 to index
    %c0_21 = arith.constant 0 : index
    %c0_22 = arith.constant 0 : index
    %40 = vector.load %arg2[%39, %c0_21, %c0_22] : memref<8x2x16xf32, #tpu.memory_space<vmem>>, vector<1x2x16xf32>
    %41 = vector.shape_cast %40 : vector<1x2x16xf32> to vector<2x16xf32>
    %42 = arith.truncf %41 : vector<2x16xf32> to vector<2x16xbf16>
    %cst_23 = arith.constant dense<0.000000e+00> : vector<2x128xf32>
    %43 = tpu.matmul %42, %3, %cst_23 {dimension_numbers = #tpu.dot_dimension_numbers<[1], [0], [0], [1], [0, 0, 1, 1], [], []>} : vector<2x16xbf16>, vector<16x128xbf16>, vector<2x128xf32> -> vector<2x128xf32>
    %44 = vector.broadcast %5 : vector<1x128xf32> to vector<2x128xf32>
    %45 = arith.addf %43, %44 : vector<2x128xf32>
    %46 = arith.index_cast %c3_i32 : i32 to index
    %c0_24 = arith.constant 0 : index
    %c0_25 = arith.constant 0 : index
    %47 = vector.load %arg11[%46, %c0_24, %c0_25] : memref<8x2x128xf32, #tpu.memory_space<vmem>>, vector<1x2x128xf32>
    %48 = vector.shape_cast %47 : vector<1x2x128xf32> to vector<2x128xf32>
    %49 = vector.shape_cast %45 : vector<2x128xf32> to vector<1x2x128xf32>
    tpu.vector_store %arg11[%46, %c0_24, %c0_25], %49 {strides = array<i32>} : memref<8x2x128xf32, #tpu.memory_space<vmem>>, vector<1x2x128xf32>,
    %c4_i32 = arith.constant 4 : i32
    %50 = arith.index_cast %c4_i32 : i32 to index
    %c0_26 = arith.constant 0 : index
    %c0_27 = arith.constant 0 : index
    %51 = vector.load %arg2[%50, %c0_26, %c0_27] : memref<8x2x16xf32, #tpu.memory_space<vmem>>, vector<1x2x16xf32>
    %52 = vector.shape_cast %51 : vector<1x2x16xf32> to vector<2x16xf32>
    %53 = arith.truncf %52 : vector<2x16xf32> to vector<2x16xbf16>
    %cst_28 = arith.constant dense<0.000000e+00> : vector<2x128xf32>
    %54 = tpu.matmul %53, %3, %cst_28 {dimension_numbers = #tpu.dot_dimension_numbers<[1], [0], [0], [1], [0, 0, 1, 1], [], []>} : vector<2x16xbf16>, vector<16x128xbf16>, vector<2x128xf32> -> vector<2x128xf32>
    %55 = vector.broadcast %5 : vector<1x128xf32> to vector<2x128xf32>
    %56 = arith.addf %54, %55 : vector<2x128xf32>
    %57 = arith.index_cast %c4_i32 : i32 to index
    %c0_29 = arith.constant 0 : index
    %c0_30 = arith.constant 0 : index
    %58 = vector.load %arg11[%57, %c0_29, %c0_30] : memref<8x2x128xf32, #tpu.memory_space<vmem>>, vector<1x2x128xf32>
    %59 = vector.shape_cast %58 : vector<1x2x128xf32> to vector<2x128xf32>
    %60 = vector.shape_cast %56 : vector<2x128xf32> to vector<1x2x128xf32>
    tpu.vector_store %arg11[%57, %c0_29, %c0_30], %60 {strides = array<i32>} : memref<8x2x128xf32, #tpu.memory_space<vmem>>, vector<1x2x128xf32>,
    %c5_i32 = arith.constant 5 : i32
    %61 = arith.index_cast %c5_i32 : i32 to index
    %c0_31 = arith.constant 0 : index
    %c0_32 = arith.constant 0 : index
    %62 = vector.load %arg2[%61, %c0_31, %c0_32] : memref<8x2x16xf32, #tpu.memory_space<vmem>>, vector<1x2x16xf32>
    %63 = vector.shape_cast %62 : vector<1x2x16xf32> to vector<2x16xf32>
    %64 = arith.truncf %63 : vector<2x16xf32> to vector<2x16xbf16>
    %cst_33 = arith.constant dense<0.000000e+00> : vector<2x128xf32>
    %65 = tpu.matmul %64, %3, %cst_33 {dimension_numbers = #tpu.dot_dimension_numbers<[1], [0], [0], [1], [0, 0, 1, 1], [], []>} : vector<2x16xbf16>, vector<16x128xbf16>, vector<2x128xf32> -> vector<2x128xf32>
    %66 = vector.broadcast %5 : vector<1x128xf32> to vector<2x128xf32>
    %67 = arith.addf %65, %66 : vector<2x128xf32>
    %68 = arith.index_cast %c5_i32 : i32 to index
    %c0_34 = arith.constant 0 : index
    %c0_35 = arith.constant 0 : index
    %69 = vector.load %arg11[%68, %c0_34, %c0_35] : memref<8x2x128xf32, #tpu.memory_space<vmem>>, vector<1x2x128xf32>
    %70 = vector.shape_cast %69 : vector<1x2x128xf32> to vector<2x128xf32>
    %71 = vector.shape_cast %67 : vector<2x128xf32> to vector<1x2x128xf32>
    tpu.vector_store %arg11[%68, %c0_34, %c0_35], %71 {strides = array<i32>} : memref<8x2x128xf32, #tpu.memory_space<vmem>>, vector<1x2x128xf32>,
    %c6_i32 = arith.constant 6 : i32
    %72 = arith.index_cast %c6_i32 : i32 to index
    %c0_36 = arith.constant 0 : index
    %c0_37 = arith.constant 0 : index
    %73 = vector.load %arg2[%72, %c0_36, %c0_37] : memref<8x2x16xf32, #tpu.memory_space<vmem>>, vector<1x2x16xf32>
    %74 = vector.shape_cast %73 : vector<1x2x16xf32> to vector<2x16xf32>
    %75 = arith.truncf %74 : vector<2x16xf32> to vector<2x16xbf16>
    %cst_38 = arith.constant dense<0.000000e+00> : vector<2x128xf32>
    %76 = tpu.matmul %75, %3, %cst_38 {dimension_numbers = #tpu.dot_dimension_numbers<[1], [0], [0], [1], [0, 0, 1, 1], [], []>} : vector<2x16xbf16>, vector<16x128xbf16>, vector<2x128xf32> -> vector<2x128xf32>
    %77 = vector.broadcast %5 : vector<1x128xf32> to vector<2x128xf32>
    %78 = arith.addf %76, %77 : vector<2x128xf32>
    %79 = arith.index_cast %c6_i32 : i32 to index
    %c0_39 = arith.constant 0 : index
    %c0_40 = arith.constant 0 : index
    %80 = vector.load %arg11[%79, %c0_39, %c0_40] : memref<8x2x128xf32, #tpu.memory_space<vmem>>, vector<1x2x128xf32>
    %81 = vector.shape_cast %80 : vector<1x2x128xf32> to vector<2x128xf32>
    %82 = vector.shape_cast %78 : vector<2x128xf32> to vector<1x2x128xf32>
    tpu.vector_store %arg11[%79, %c0_39, %c0_40], %82 {strides = array<i32>} : memref<8x2x128xf32, #tpu.memory_space<vmem>>, vector<1x2x128xf32>,
    %c7_i32 = arith.constant 7 : i32
    %83 = arith.index_cast %c7_i32 : i32 to index
    %c0_41 = arith.constant 0 : index
    %c0_42 = arith.constant 0 : index
    %84 = vector.load %arg2[%83, %c0_41, %c0_42] : memref<8x2x16xf32, #tpu.memory_space<vmem>>, vector<1x2x16xf32>
    %85 = vector.shape_cast %84 : vector<1x2x16xf32> to vector<2x16xf32>
    %86 = arith.truncf %85 : vector<2x16xf32> to vector<2x16xbf16>
    %cst_43 = arith.constant dense<0.000000e+00> : vector<2x128xf32>
    %87 = tpu.matmul %86, %3, %cst_43 {dimension_numbers = #tpu.dot_dimension_numbers<[1], [0], [0], [1], [0, 0, 1, 1], [], []>} : vector<2x16xbf16>, vector<16x128xbf16>, vector<2x128xf32> -> vector<2x128xf32>
    %88 = vector.broadcast %5 : vector<1x128xf32> to vector<2x128xf32>
    %89 = arith.addf %87, %88 : vector<2x128xf32>
    %90 = arith.index_cast %c7_i32 : i32 to index
    %c0_44 = arith.constant 0 : index
    %c0_45 = arith.constant 0 : index
    %91 = vector.load %arg11[%90, %c0_44, %c0_45] : memref<8x2x128xf32, #tpu.memory_space<vmem>>, vector<1x2x128xf32>
    %92 = vector.shape_cast %91 : vector<1x2x128xf32> to vector<2x128xf32>
    %93 = vector.shape_cast %89 : vector<2x128xf32> to vector<1x2x128xf32>
    tpu.vector_store %arg11[%90, %c0_44, %c0_45], %93 {strides = array<i32>} : memref<8x2x128xf32, #tpu.memory_space<vmem>>, vector<1x2x128xf32>,
    %c8_i32 = arith.constant 8 : i32
    %c0_46 = arith.constant 0 : index
    %c0_47 = arith.constant 0 : index
    %94 = vector.load %arg12[%c0_46, %c0_47] : memref<2x32xf32, #tpu.memory_space<vmem>>, vector<2x32xf32>
    %c0_48 = arith.constant 0 : index
    %c0_49 = arith.constant 0 : index
    %95 = vector.load %arg13[%c0_48, %c0_49] : memref<2x32xf32, #tpu.memory_space<vmem>>, vector<2x32xf32>
    %c0_i32_50 = arith.constant 0 : i32
    %96 = arith.index_cast %c0_i32_50 : i32 to index
    %c0_51 = arith.constant 0 : index
    %c0_52 = arith.constant 0 : index
    %97 = vector.load %arg11[%96, %c0_51, %c0_52] : memref<8x2x128xf32, #tpu.memory_space<vmem>>, vector<1x2x128xf32>
    %98 = vector.shape_cast %97 : vector<1x2x128xf32> to vector<2x128xf32>
    %99 = arith.truncf %94 : vector<2x32xf32> to vector<2x32xbf16>
    %cst_53 = arith.constant dense<0.000000e+00> : vector<2x128xf32>
    %100 = tpu.matmul %99, %4, %cst_53 {dimension_numbers = #tpu.dot_dimension_numbers<[1], [0], [0], [1], [0, 0, 1, 1], [], []>} : vector<2x32xbf16>, vector<32x128xbf16>, vector<2x128xf32> -> vector<2x128xf32>
    %101 = arith.addf %98, %100 : vector<2x128xf32>
    %102 = vector.extract_strided_slice %101 {offsets = [0, 0], sizes = [2, 32], strides = [1, 1]} : vector<2x128xf32> to vector<2x32xf32>
    %cst_54 = arith.constant 5.000000e-01 : f32
    %103 = vector.broadcast %cst_54 : f32 to vector<2x32xf32>
    %104 = arith.mulf %103, %102 : vector<2x32xf32>
    %105 = math.tanh %104 : vector<2x32xf32>
    %cst_55 = arith.constant 5.000000e-01 : f32
    %106 = vector.broadcast %cst_55 : f32 to vector<2x32xf32>
    %107 = arith.mulf %106, %105 : vector<2x32xf32>
    %cst_56 = arith.constant 5.000000e-01 : f32
    %108 = vector.broadcast %cst_56 : f32 to vector<2x32xf32>
    %109 = arith.addf %107, %108 : vector<2x32xf32>
    %110 = vector.extract_strided_slice %101 {offsets = [0, 32], sizes = [2, 32], strides = [1, 1]} : vector<2x128xf32> to vector<2x32xf32>
    %cst_57 = arith.constant 5.000000e-01 : f32
    %111 = vector.broadcast %cst_57 : f32 to vector<2x32xf32>
    %112 = arith.mulf %111, %110 : vector<2x32xf32>
    %113 = math.tanh %112 : vector<2x32xf32>
    %cst_58 = arith.constant 5.000000e-01 : f32
    %114 = vector.broadcast %cst_58 : f32 to vector<2x32xf32>
    %115 = arith.mulf %114, %113 : vector<2x32xf32>
    %cst_59 = arith.constant 5.000000e-01 : f32
    %116 = vector.broadcast %cst_59 : f32 to vector<2x32xf32>
    %117 = arith.addf %115, %116 : vector<2x32xf32>
    %118 = vector.extract_strided_slice %101 {offsets = [0, 64], sizes = [2, 32], strides = [1, 1]} : vector<2x128xf32> to vector<2x32xf32>
    %119 = math.tanh %118 : vector<2x32xf32>
    %120 = vector.extract_strided_slice %101 {offsets = [0, 96], sizes = [2, 32], strides = [1, 1]} : vector<2x128xf32> to vector<2x32xf32>
    %cst_60 = arith.constant 5.000000e-01 : f32
    %121 = vector.broadcast %cst_60 : f32 to vector<2x32xf32>
    %122 = arith.mulf %121, %120 : vector<2x32xf32>
    %123 = math.tanh %122 : vector<2x32xf32>
    %cst_61 = arith.constant 5.000000e-01 : f32
    %124 = vector.broadcast %cst_61 : f32 to vector<2x32xf32>
    %125 = arith.mulf %124, %123 : vector<2x32xf32>
    %cst_62 = arith.constant 5.000000e-01 : f32
    %126 = vector.broadcast %cst_62 : f32 to vector<2x32xf32>
    %127 = arith.addf %125, %126 : vector<2x32xf32>
    %128 = arith.mulf %117, %95 : vector<2x32xf32>
    %129 = arith.mulf %109, %119 : vector<2x32xf32>
    %130 = arith.addf %128, %129 : vector<2x32xf32>
    %131 = math.tanh %130 : vector<2x32xf32>
    %132 = arith.mulf %127, %131 : vector<2x32xf32>
    %133 = arith.index_cast %c0_i32_50 : i32 to index
    %c0_63 = arith.constant 0 : index
    %c0_64 = arith.constant 0 : index
    %134 = vector.load %arg8[%133, %c0_63, %c0_64] : memref<8x2x32xf32, #tpu.memory_space<vmem>>, vector<1x2x32xf32>
    %135 = vector.shape_cast %134 : vector<1x2x32xf32> to vector<2x32xf32>
    %136 = vector.shape_cast %132 : vector<2x32xf32> to vector<1x2x32xf32>
    tpu.vector_store %arg8[%133, %c0_63, %c0_64], %136 {strides = array<i32>} : memref<8x2x32xf32, #tpu.memory_space<vmem>>, vector<1x2x32xf32>,
    %c1_i32_65 = arith.constant 1 : i32
    %137 = arith.index_cast %c1_i32_65 : i32 to index
    %c0_66 = arith.constant 0 : index
    %c0_67 = arith.constant 0 : index
    %138 = vector.load %arg11[%137, %c0_66, %c0_67] : memref<8x2x128xf32, #tpu.memory_space<vmem>>, vector<1x2x128xf32>
    %139 = vector.shape_cast %138 : vector<1x2x128xf32> to vector<2x128xf32>
    %140 = arith.truncf %132 : vector<2x32xf32> to vector<2x32xbf16>
    %cst_68 = arith.constant dense<0.000000e+00> : vector<2x128xf32>
    %141 = tpu.matmul %140, %4, %cst_68 {dimension_numbers = #tpu.dot_dimension_numbers<[1], [0], [0], [1], [0, 0, 1, 1], [], []>} : vector<2x32xbf16>, vector<32x128xbf16>, vector<2x128xf32> -> vector<2x128xf32>
    %142 = arith.addf %139, %141 : vector<2x128xf32>
    %143 = vector.extract_strided_slice %142 {offsets = [0, 0], sizes = [2, 32], strides = [1, 1]} : vector<2x128xf32> to vector<2x32xf32>
    %cst_69 = arith.constant 5.000000e-01 : f32
    %144 = vector.broadcast %cst_69 : f32 to vector<2x32xf32>
    %145 = arith.mulf %144, %143 : vector<2x32xf32>
    %146 = math.tanh %145 : vector<2x32xf32>
    %cst_70 = arith.constant 5.000000e-01 : f32
    %147 = vector.broadcast %cst_70 : f32 to vector<2x32xf32>
    %148 = arith.mulf %147, %146 : vector<2x32xf32>
    %cst_71 = arith.constant 5.000000e-01 : f32
    %149 = vector.broadcast %cst_71 : f32 to vector<2x32xf32>
    %150 = arith.addf %148, %149 : vector<2x32xf32>
    %151 = vector.extract_strided_slice %142 {offsets = [0, 32], sizes = [2, 32], strides = [1, 1]} : vector<2x128xf32> to vector<2x32xf32>
    %cst_72 = arith.constant 5.000000e-01 : f32
    %152 = vector.broadcast %cst_72 : f32 to vector<2x32xf32>
    %153 = arith.mulf %152, %151 : vector<2x32xf32>
    %154 = math.tanh %153 : vector<2x32xf32>
    %cst_73 = arith.constant 5.000000e-01 : f32
    %155 = vector.broadcast %cst_73 : f32 to vector<2x32xf32>
    %156 = arith.mulf %155, %154 : vector<2x32xf32>
    %cst_74 = arith.constant 5.000000e-01 : f32
    %157 = vector.broadcast %cst_74 : f32 to vector<2x32xf32>
    %158 = arith.addf %156, %157 : vector<2x32xf32>
    %159 = vector.extract_strided_slice %142 {offsets = [0, 64], sizes = [2, 32], strides = [1, 1]} : vector<2x128xf32> to vector<2x32xf32>
    %160 = math.tanh %159 : vector<2x32xf32>
    %161 = vector.extract_strided_slice %142 {offsets = [0, 96], sizes = [2, 32], strides = [1, 1]} : vector<2x128xf32> to vector<2x32xf32>
    %cst_75 = arith.constant 5.000000e-01 : f32
    %162 = vector.broadcast %cst_75 : f32 to vector<2x32xf32>
    %163 = arith.mulf %162, %161 : vector<2x32xf32>
    %164 = math.tanh %163 : vector<2x32xf32>
    %cst_76 = arith.constant 5.000000e-01 : f32
    %165 = vector.broadcast %cst_76 : f32 to vector<2x32xf32>
    %166 = arith.mulf %165, %164 : vector<2x32xf32>
    %cst_77 = arith.constant 5.000000e-01 : f32
    %167 = vector.broadcast %cst_77 : f32 to vector<2x32xf32>
    %168 = arith.addf %166, %167 : vector<2x32xf32>
    %169 = arith.mulf %158, %130 : vector<2x32xf32>
    %170 = arith.mulf %150, %160 : vector<2x32xf32>
    %171 = arith.addf %169, %170 : vector<2x32xf32>
    %172 = math.tanh %171 : vector<2x32xf32>
    %173 = arith.mulf %168, %172 : vector<2x32xf32>
    %174 = arith.index_cast %c1_i32_65 : i32 to index
    %c0_78 = arith.constant 0 : index
    %c0_79 = arith.constant 0 : index
    %175 = vector.load %arg8[%174, %c0_78, %c0_79] : memref<8x2x32xf32, #tpu.memory_space<vmem>>, vector<1x2x32xf32>
    %176 = vector.shape_cast %175 : vector<1x2x32xf32> to vector<2x32xf32>
    %177 = vector.shape_cast %173 : vector<2x32xf32> to vector<1x2x32xf32>
    tpu.vector_store %arg8[%174, %c0_78, %c0_79], %177 {strides = array<i32>} : memref<8x2x32xf32, #tpu.memory_space<vmem>>, vector<1x2x32xf32>,
    %c2_i32_80 = arith.constant 2 : i32
    %178 = arith.index_cast %c2_i32_80 : i32 to index
    %c0_81 = arith.constant 0 : index
    %c0_82 = arith.constant 0 : index
    %179 = vector.load %arg11[%178, %c0_81, %c0_82] : memref<8x2x128xf32, #tpu.memory_space<vmem>>, vector<1x2x128xf32>
    %180 = vector.shape_cast %179 : vector<1x2x128xf32> to vector<2x128xf32>
    %181 = arith.truncf %173 : vector<2x32xf32> to vector<2x32xbf16>
    %cst_83 = arith.constant dense<0.000000e+00> : vector<2x128xf32>
    %182 = tpu.matmul %181, %4, %cst_83 {dimension_numbers = #tpu.dot_dimension_numbers<[1], [0], [0], [1], [0, 0, 1, 1], [], []>} : vector<2x32xbf16>, vector<32x128xbf16>, vector<2x128xf32> -> vector<2x128xf32>
    %183 = arith.addf %180, %182 : vector<2x128xf32>
    %184 = vector.extract_strided_slice %183 {offsets = [0, 0], sizes = [2, 32], strides = [1, 1]} : vector<2x128xf32> to vector<2x32xf32>
    %cst_84 = arith.constant 5.000000e-01 : f32
    %185 = vector.broadcast %cst_84 : f32 to vector<2x32xf32>
    %186 = arith.mulf %185, %184 : vector<2x32xf32>
    %187 = math.tanh %186 : vector<2x32xf32>
    %cst_85 = arith.constant 5.000000e-01 : f32
    %188 = vector.broadcast %cst_85 : f32 to vector<2x32xf32>
    %189 = arith.mulf %188, %187 : vector<2x32xf32>
    %cst_86 = arith.constant 5.000000e-01 : f32
    %190 = vector.broadcast %cst_86 : f32 to vector<2x32xf32>
    %191 = arith.addf %189, %190 : vector<2x32xf32>
    %192 = vector.extract_strided_slice %183 {offsets = [0, 32], sizes = [2, 32], strides = [1, 1]} : vector<2x128xf32> to vector<2x32xf32>
    %cst_87 = arith.constant 5.000000e-01 : f32
    %193 = vector.broadcast %cst_87 : f32 to vector<2x32xf32>
    %194 = arith.mulf %193, %192 : vector<2x32xf32>
    %195 = math.tanh %194 : vector<2x32xf32>
    %cst_88 = arith.constant 5.000000e-01 : f32
    %196 = vector.broadcast %cst_88 : f32 to vector<2x32xf32>
    %197 = arith.mulf %196, %195 : vector<2x32xf32>
    %cst_89 = arith.constant 5.000000e-01 : f32
    %198 = vector.broadcast %cst_89 : f32 to vector<2x32xf32>
    %199 = arith.addf %197, %198 : vector<2x32xf32>
    %200 = vector.extract_strided_slice %183 {offsets = [0, 64], sizes = [2, 32], strides = [1, 1]} : vector<2x128xf32> to vector<2x32xf32>
    %201 = math.tanh %200 : vector<2x32xf32>
    %202 = vector.extract_strided_slice %183 {offsets = [0, 96], sizes = [2, 32], strides = [1, 1]} : vector<2x128xf32> to vector<2x32xf32>
    %cst_90 = arith.constant 5.000000e-01 : f32
    %203 = vector.broadcast %cst_90 : f32 to vector<2x32xf32>
    %204 = arith.mulf %203, %202 : vector<2x32xf32>
    %205 = math.tanh %204 : vector<2x32xf32>
    %cst_91 = arith.constant 5.000000e-01 : f32
    %206 = vector.broadcast %cst_91 : f32 to vector<2x32xf32>
    %207 = arith.mulf %206, %205 : vector<2x32xf32>
    %cst_92 = arith.constant 5.000000e-01 : f32
    %208 = vector.broadcast %cst_92 : f32 to vector<2x32xf32>
    %209 = arith.addf %207, %208 : vector<2x32xf32>
    %210 = arith.mulf %199, %171 : vector<2x32xf32>
    %211 = arith.mulf %191, %201 : vector<2x32xf32>
    %212 = arith.addf %210, %211 : vector<2x32xf32>
    %213 = math.tanh %212 : vector<2x32xf32>
    %214 = arith.mulf %209, %213 : vector<2x32xf32>
    %215 = arith.index_cast %c2_i32_80 : i32 to index
    %c0_93 = arith.constant 0 : index
    %c0_94 = arith.constant 0 : index
    %216 = vector.load %arg8[%215, %c0_93, %c0_94] : memref<8x2x32xf32, #tpu.memory_space<vmem>>, vector<1x2x32xf32>
    %217 = vector.shape_cast %216 : vector<1x2x32xf32> to vector<2x32xf32>
    %218 = vector.shape_cast %214 : vector<2x32xf32> to vector<1x2x32xf32>
    tpu.vector_store %arg8[%215, %c0_93, %c0_94], %218 {strides = array<i32>} : memref<8x2x32xf32, #tpu.memory_space<vmem>>, vector<1x2x32xf32>,
    %c3_i32_95 = arith.constant 3 : i32
    %219 = arith.index_cast %c3_i32_95 : i32 to index
    %c0_96 = arith.constant 0 : index
    %c0_97 = arith.constant 0 : index
    %220 = vector.load %arg11[%219, %c0_96, %c0_97] : memref<8x2x128xf32, #tpu.memory_space<vmem>>, vector<1x2x128xf32>
    %221 = vector.shape_cast %220 : vector<1x2x128xf32> to vector<2x128xf32>
    %222 = arith.truncf %214 : vector<2x32xf32> to vector<2x32xbf16>
    %cst_98 = arith.constant dense<0.000000e+00> : vector<2x128xf32>
    %223 = tpu.matmul %222, %4, %cst_98 {dimension_numbers = #tpu.dot_dimension_numbers<[1], [0], [0], [1], [0, 0, 1, 1], [], []>} : vector<2x32xbf16>, vector<32x128xbf16>, vector<2x128xf32> -> vector<2x128xf32>
    %224 = arith.addf %221, %223 : vector<2x128xf32>
    %225 = vector.extract_strided_slice %224 {offsets = [0, 0], sizes = [2, 32], strides = [1, 1]} : vector<2x128xf32> to vector<2x32xf32>
    %cst_99 = arith.constant 5.000000e-01 : f32
    %226 = vector.broadcast %cst_99 : f32 to vector<2x32xf32>
    %227 = arith.mulf %226, %225 : vector<2x32xf32>
    %228 = math.tanh %227 : vector<2x32xf32>
    %cst_100 = arith.constant 5.000000e-01 : f32
    %229 = vector.broadcast %cst_100 : f32 to vector<2x32xf32>
    %230 = arith.mulf %229, %228 : vector<2x32xf32>
    %cst_101 = arith.constant 5.000000e-01 : f32
    %231 = vector.broadcast %cst_101 : f32 to vector<2x32xf32>
    %232 = arith.addf %230, %231 : vector<2x32xf32>
    %233 = vector.extract_strided_slice %224 {offsets = [0, 32], sizes = [2, 32], strides = [1, 1]} : vector<2x128xf32> to vector<2x32xf32>
    %cst_102 = arith.constant 5.000000e-01 : f32
    %234 = vector.broadcast %cst_102 : f32 to vector<2x32xf32>
    %235 = arith.mulf %234, %233 : vector<2x32xf32>
    %236 = math.tanh %235 : vector<2x32xf32>
    %cst_103 = arith.constant 5.000000e-01 : f32
    %237 = vector.broadcast %cst_103 : f32 to vector<2x32xf32>
    %238 = arith.mulf %237, %236 : vector<2x32xf32>
    %cst_104 = arith.constant 5.000000e-01 : f32
    %239 = vector.broadcast %cst_104 : f32 to vector<2x32xf32>
    %240 = arith.addf %238, %239 : vector<2x32xf32>
    %241 = vector.extract_strided_slice %224 {offsets = [0, 64], sizes = [2, 32], strides = [1, 1]} : vector<2x128xf32> to vector<2x32xf32>
    %242 = math.tanh %241 : vector<2x32xf32>
    %243 = vector.extract_strided_slice %224 {offsets = [0, 96], sizes = [2, 32], strides = [1, 1]} : vector<2x128xf32> to vector<2x32xf32>
    %cst_105 = arith.constant 5.000000e-01 : f32
    %244 = vector.broadcast %cst_105 : f32 to vector<2x32xf32>
    %245 = arith.mulf %244, %243 : vector<2x32xf32>
    %246 = math.tanh %245 : vector<2x32xf32>
    %cst_106 = arith.constant 5.000000e-01 : f32
    %247 = vector.broadcast %cst_106 : f32 to vector<2x32xf32>
    %248 = arith.mulf %247, %246 : vector<2x32xf32>
    %cst_107 = arith.constant 5.000000e-01 : f32
    %249 = vector.broadcast %cst_107 : f32 to vector<2x32xf32>
    %250 = arith.addf %248, %249 : vector<2x32xf32>
    %251 = arith.mulf %240, %212 : vector<2x32xf32>
    %252 = arith.mulf %232, %242 : vector<2x32xf32>
    %253 = arith.addf %251, %252 : vector<2x32xf32>
    %254 = math.tanh %253 : vector<2x32xf32>
    %255 = arith.mulf %250, %254 : vector<2x32xf32>
    %256 = arith.index_cast %c3_i32_95 : i32 to index
    %c0_108 = arith.constant 0 : index
    %c0_109 = arith.constant 0 : index
    %257 = vector.load %arg8[%256, %c0_108, %c0_109] : memref<8x2x32xf32, #tpu.memory_space<vmem>>, vector<1x2x32xf32>
    %258 = vector.shape_cast %257 : vector<1x2x32xf32> to vector<2x32xf32>
    %259 = vector.shape_cast %255 : vector<2x32xf32> to vector<1x2x32xf32>
    tpu.vector_store %arg8[%256, %c0_108, %c0_109], %259 {strides = array<i32>} : memref<8x2x32xf32, #tpu.memory_space<vmem>>, vector<1x2x32xf32>,
    %c4_i32_110 = arith.constant 4 : i32
    %260 = arith.index_cast %c4_i32_110 : i32 to index
    %c0_111 = arith.constant 0 : index
    %c0_112 = arith.constant 0 : index
    %261 = vector.load %arg11[%260, %c0_111, %c0_112] : memref<8x2x128xf32, #tpu.memory_space<vmem>>, vector<1x2x128xf32>
    %262 = vector.shape_cast %261 : vector<1x2x128xf32> to vector<2x128xf32>
    %263 = arith.truncf %255 : vector<2x32xf32> to vector<2x32xbf16>
    %cst_113 = arith.constant dense<0.000000e+00> : vector<2x128xf32>
    %264 = tpu.matmul %263, %4, %cst_113 {dimension_numbers = #tpu.dot_dimension_numbers<[1], [0], [0], [1], [0, 0, 1, 1], [], []>} : vector<2x32xbf16>, vector<32x128xbf16>, vector<2x128xf32> -> vector<2x128xf32>
    %265 = arith.addf %262, %264 : vector<2x128xf32>
    %266 = vector.extract_strided_slice %265 {offsets = [0, 0], sizes = [2, 32], strides = [1, 1]} : vector<2x128xf32> to vector<2x32xf32>
    %cst_114 = arith.constant 5.000000e-01 : f32
    %267 = vector.broadcast %cst_114 : f32 to vector<2x32xf32>
    %268 = arith.mulf %267, %266 : vector<2x32xf32>
    %269 = math.tanh %268 : vector<2x32xf32>
    %cst_115 = arith.constant 5.000000e-01 : f32
    %270 = vector.broadcast %cst_115 : f32 to vector<2x32xf32>
    %271 = arith.mulf %270, %269 : vector<2x32xf32>
    %cst_116 = arith.constant 5.000000e-01 : f32
    %272 = vector.broadcast %cst_116 : f32 to vector<2x32xf32>
    %273 = arith.addf %271, %272 : vector<2x32xf32>
    %274 = vector.extract_strided_slice %265 {offsets = [0, 32], sizes = [2, 32], strides = [1, 1]} : vector<2x128xf32> to vector<2x32xf32>
    %cst_117 = arith.constant 5.000000e-01 : f32
    %275 = vector.broadcast %cst_117 : f32 to vector<2x32xf32>
    %276 = arith.mulf %275, %274 : vector<2x32xf32>
    %277 = math.tanh %276 : vector<2x32xf32>
    %cst_118 = arith.constant 5.000000e-01 : f32
    %278 = vector.broadcast %cst_118 : f32 to vector<2x32xf32>
    %279 = arith.mulf %278, %277 : vector<2x32xf32>
    %cst_119 = arith.constant 5.000000e-01 : f32
    %280 = vector.broadcast %cst_119 : f32 to vector<2x32xf32>
    %281 = arith.addf %279, %280 : vector<2x32xf32>
    %282 = vector.extract_strided_slice %265 {offsets = [0, 64], sizes = [2, 32], strides = [1, 1]} : vector<2x128xf32> to vector<2x32xf32>
    %283 = math.tanh %282 : vector<2x32xf32>
    %284 = vector.extract_strided_slice %265 {offsets = [0, 96], sizes = [2, 32], strides = [1, 1]} : vector<2x128xf32> to vector<2x32xf32>
    %cst_120 = arith.constant 5.000000e-01 : f32
    %285 = vector.broadcast %cst_120 : f32 to vector<2x32xf32>
    %286 = arith.mulf %285, %284 : vector<2x32xf32>
    %287 = math.tanh %286 : vector<2x32xf32>
    %cst_121 = arith.constant 5.000000e-01 : f32
    %288 = vector.broadcast %cst_121 : f32 to vector<2x32xf32>
    %289 = arith.mulf %288, %287 : vector<2x32xf32>
    %cst_122 = arith.constant 5.000000e-01 : f32
    %290 = vector.broadcast %cst_122 : f32 to vector<2x32xf32>
    %291 = arith.addf %289, %290 : vector<2x32xf32>
    %292 = arith.mulf %281, %253 : vector<2x32xf32>
    %293 = arith.mulf %273, %283 : vector<2x32xf32>
    %294 = arith.addf %292, %293 : vector<2x32xf32>
    %295 = math.tanh %294 : vector<2x32xf32>
    %296 = arith.mulf %291, %295 : vector<2x32xf32>
    %297 = arith.index_cast %c4_i32_110 : i32 to index
    %c0_123 = arith.constant 0 : index
    %c0_124 = arith.constant 0 : index
    %298 = vector.load %arg8[%297, %c0_123, %c0_124] : memref<8x2x32xf32, #tpu.memory_space<vmem>>, vector<1x2x32xf32>
    %299 = vector.shape_cast %298 : vector<1x2x32xf32> to vector<2x32xf32>
    %300 = vector.shape_cast %296 : vector<2x32xf32> to vector<1x2x32xf32>
    tpu.vector_store %arg8[%297, %c0_123, %c0_124], %300 {strides = array<i32>} : memref<8x2x32xf32, #tpu.memory_space<vmem>>, vector<1x2x32xf32>,
    %c5_i32_125 = arith.constant 5 : i32
    %301 = arith.index_cast %c5_i32_125 : i32 to index
    %c0_126 = arith.constant 0 : index
    %c0_127 = arith.constant 0 : index
    %302 = vector.load %arg11[%301, %c0_126, %c0_127] : memref<8x2x128xf32, #tpu.memory_space<vmem>>, vector<1x2x128xf32>
    %303 = vector.shape_cast %302 : vector<1x2x128xf32> to vector<2x128xf32>
    %304 = arith.truncf %296 : vector<2x32xf32> to vector<2x32xbf16>
    %cst_128 = arith.constant dense<0.000000e+00> : vector<2x128xf32>
    %305 = tpu.matmul %304, %4, %cst_128 {dimension_numbers = #tpu.dot_dimension_numbers<[1], [0], [0], [1], [0, 0, 1, 1], [], []>} : vector<2x32xbf16>, vector<32x128xbf16>, vector<2x128xf32> -> vector<2x128xf32>
    %306 = arith.addf %303, %305 : vector<2x128xf32>
    %307 = vector.extract_strided_slice %306 {offsets = [0, 0], sizes = [2, 32], strides = [1, 1]} : vector<2x128xf32> to vector<2x32xf32>
    %cst_129 = arith.constant 5.000000e-01 : f32
    %308 = vector.broadcast %cst_129 : f32 to vector<2x32xf32>
    %309 = arith.mulf %308, %307 : vector<2x32xf32>
    %310 = math.tanh %309 : vector<2x32xf32>
    %cst_130 = arith.constant 5.000000e-01 : f32
    %311 = vector.broadcast %cst_130 : f32 to vector<2x32xf32>
    %312 = arith.mulf %311, %310 : vector<2x32xf32>
    %cst_131 = arith.constant 5.000000e-01 : f32
    %313 = vector.broadcast %cst_131 : f32 to vector<2x32xf32>
    %314 = arith.addf %312, %313 : vector<2x32xf32>
    %315 = vector.extract_strided_slice %306 {offsets = [0, 32], sizes = [2, 32], strides = [1, 1]} : vector<2x128xf32> to vector<2x32xf32>
    %cst_132 = arith.constant 5.000000e-01 : f32
    %316 = vector.broadcast %cst_132 : f32 to vector<2x32xf32>
    %317 = arith.mulf %316, %315 : vector<2x32xf32>
    %318 = math.tanh %317 : vector<2x32xf32>
    %cst_133 = arith.constant 5.000000e-01 : f32
    %319 = vector.broadcast %cst_133 : f32 to vector<2x32xf32>
    %320 = arith.mulf %319, %318 : vector<2x32xf32>
    %cst_134 = arith.constant 5.000000e-01 : f32
    %321 = vector.broadcast %cst_134 : f32 to vector<2x32xf32>
    %322 = arith.addf %320, %321 : vector<2x32xf32>
    %323 = vector.extract_strided_slice %306 {offsets = [0, 64], sizes = [2, 32], strides = [1, 1]} : vector<2x128xf32> to vector<2x32xf32>
    %324 = math.tanh %323 : vector<2x32xf32>
    %325 = vector.extract_strided_slice %306 {offsets = [0, 96], sizes = [2, 32], strides = [1, 1]} : vector<2x128xf32> to vector<2x32xf32>
    %cst_135 = arith.constant 5.000000e-01 : f32
    %326 = vector.broadcast %cst_135 : f32 to vector<2x32xf32>
    %327 = arith.mulf %326, %325 : vector<2x32xf32>
    %328 = math.tanh %327 : vector<2x32xf32>
    %cst_136 = arith.constant 5.000000e-01 : f32
    %329 = vector.broadcast %cst_136 : f32 to vector<2x32xf32>
    %330 = arith.mulf %329, %328 : vector<2x32xf32>
    %cst_137 = arith.constant 5.000000e-01 : f32
    %331 = vector.broadcast %cst_137 : f32 to vector<2x32xf32>
    %332 = arith.addf %330, %331 : vector<2x32xf32>
    %333 = arith.mulf %322, %294 : vector<2x32xf32>
    %334 = arith.mulf %314, %324 : vector<2x32xf32>
    %335 = arith.addf %333, %334 : vector<2x32xf32>
    %336 = math.tanh %335 : vector<2x32xf32>
    %337 = arith.mulf %332, %336 : vector<2x32xf32>
    %338 = arith.index_cast %c5_i32_125 : i32 to index
    %c0_138 = arith.constant 0 : index
    %c0_139 = arith.constant 0 : index
    %339 = vector.load %arg8[%338, %c0_138, %c0_139] : memref<8x2x32xf32, #tpu.memory_space<vmem>>, vector<1x2x32xf32>
    %340 = vector.shape_cast %339 : vector<1x2x32xf32> to vector<2x32xf32>
    %341 = vector.shape_cast %337 : vector<2x32xf32> to vector<1x2x32xf32>
    tpu.vector_store %arg8[%338, %c0_138, %c0_139], %341 {strides = array<i32>} : memref<8x2x32xf32, #tpu.memory_space<vmem>>, vector<1x2x32xf32>,
    %c6_i32_140 = arith.constant 6 : i32
    %342 = arith.index_cast %c6_i32_140 : i32 to index
    %c0_141 = arith.constant 0 : index
    %c0_142 = arith.constant 0 : index
    %343 = vector.load %arg11[%342, %c0_141, %c0_142] : memref<8x2x128xf32, #tpu.memory_space<vmem>>, vector<1x2x128xf32>
    %344 = vector.shape_cast %343 : vector<1x2x128xf32> to vector<2x128xf32>
    %345 = arith.truncf %337 : vector<2x32xf32> to vector<2x32xbf16>
    %cst_143 = arith.constant dense<0.000000e+00> : vector<2x128xf32>
    %346 = tpu.matmul %345, %4, %cst_143 {dimension_numbers = #tpu.dot_dimension_numbers<[1], [0], [0], [1], [0, 0, 1, 1], [], []>} : vector<2x32xbf16>, vector<32x128xbf16>, vector<2x128xf32> -> vector<2x128xf32>
    %347 = arith.addf %344, %346 : vector<2x128xf32>
    %348 = vector.extract_strided_slice %347 {offsets = [0, 0], sizes = [2, 32], strides = [1, 1]} : vector<2x128xf32> to vector<2x32xf32>
    %cst_144 = arith.constant 5.000000e-01 : f32
    %349 = vector.broadcast %cst_144 : f32 to vector<2x32xf32>
    %350 = arith.mulf %349, %348 : vector<2x32xf32>
    %351 = math.tanh %350 : vector<2x32xf32>
    %cst_145 = arith.constant 5.000000e-01 : f32
    %352 = vector.broadcast %cst_145 : f32 to vector<2x32xf32>
    %353 = arith.mulf %352, %351 : vector<2x32xf32>
    %cst_146 = arith.constant 5.000000e-01 : f32
    %354 = vector.broadcast %cst_146 : f32 to vector<2x32xf32>
    %355 = arith.addf %353, %354 : vector<2x32xf32>
    %356 = vector.extract_strided_slice %347 {offsets = [0, 32], sizes = [2, 32], strides = [1, 1]} : vector<2x128xf32> to vector<2x32xf32>
    %cst_147 = arith.constant 5.000000e-01 : f32
    %357 = vector.broadcast %cst_147 : f32 to vector<2x32xf32>
    %358 = arith.mulf %357, %356 : vector<2x32xf32>
    %359 = math.tanh %358 : vector<2x32xf32>
    %cst_148 = arith.constant 5.000000e-01 : f32
    %360 = vector.broadcast %cst_148 : f32 to vector<2x32xf32>
    %361 = arith.mulf %360, %359 : vector<2x32xf32>
    %cst_149 = arith.constant 5.000000e-01 : f32
    %362 = vector.broadcast %cst_149 : f32 to vector<2x32xf32>
    %363 = arith.addf %361, %362 : vector<2x32xf32>
    %364 = vector.extract_strided_slice %347 {offsets = [0, 64], sizes = [2, 32], strides = [1, 1]} : vector<2x128xf32> to vector<2x32xf32>
    %365 = math.tanh %364 : vector<2x32xf32>
    %366 = vector.extract_strided_slice %347 {offsets = [0, 96], sizes = [2, 32], strides = [1, 1]} : vector<2x128xf32> to vector<2x32xf32>
    %cst_150 = arith.constant 5.000000e-01 : f32
    %367 = vector.broadcast %cst_150 : f32 to vector<2x32xf32>
    %368 = arith.mulf %367, %366 : vector<2x32xf32>
    %369 = math.tanh %368 : vector<2x32xf32>
    %cst_151 = arith.constant 5.000000e-01 : f32
    %370 = vector.broadcast %cst_151 : f32 to vector<2x32xf32>
    %371 = arith.mulf %370, %369 : vector<2x32xf32>
    %cst_152 = arith.constant 5.000000e-01 : f32
    %372 = vector.broadcast %cst_152 : f32 to vector<2x32xf32>
    %373 = arith.addf %371, %372 : vector<2x32xf32>
    %374 = arith.mulf %363, %335 : vector<2x32xf32>
    %375 = arith.mulf %355, %365 : vector<2x32xf32>
    %376 = arith.addf %374, %375 : vector<2x32xf32>
    %377 = math.tanh %376 : vector<2x32xf32>
    %378 = arith.mulf %373, %377 : vector<2x32xf32>
    %379 = arith.index_cast %c6_i32_140 : i32 to index
    %c0_153 = arith.constant 0 : index
    %c0_154 = arith.constant 0 : index
    %380 = vector.load %arg8[%379, %c0_153, %c0_154] : memref<8x2x32xf32, #tpu.memory_space<vmem>>, vector<1x2x32xf32>
    %381 = vector.shape_cast %380 : vector<1x2x32xf32> to vector<2x32xf32>
    %382 = vector.shape_cast %378 : vector<2x32xf32> to vector<1x2x32xf32>
    tpu.vector_store %arg8[%379, %c0_153, %c0_154], %382 {strides = array<i32>} : memref<8x2x32xf32, #tpu.memory_space<vmem>>, vector<1x2x32xf32>,
    %c7_i32_155 = arith.constant 7 : i32
    %383 = arith.index_cast %c7_i32_155 : i32 to index
    %c0_156 = arith.constant 0 : index
    %c0_157 = arith.constant 0 : index
    %384 = vector.load %arg11[%383, %c0_156, %c0_157] : memref<8x2x128xf32, #tpu.memory_space<vmem>>, vector<1x2x128xf32>
    %385 = vector.shape_cast %384 : vector<1x2x128xf32> to vector<2x128xf32>
    %386 = arith.truncf %378 : vector<2x32xf32> to vector<2x32xbf16>
    %cst_158 = arith.constant dense<0.000000e+00> : vector<2x128xf32>
    %387 = tpu.matmul %386, %4, %cst_158 {dimension_numbers = #tpu.dot_dimension_numbers<[1], [0], [0], [1], [0, 0, 1, 1], [], []>} : vector<2x32xbf16>, vector<32x128xbf16>, vector<2x128xf32> -> vector<2x128xf32>
    %388 = arith.addf %385, %387 : vector<2x128xf32>
    %389 = vector.extract_strided_slice %388 {offsets = [0, 0], sizes = [2, 32], strides = [1, 1]} : vector<2x128xf32> to vector<2x32xf32>
    %cst_159 = arith.constant 5.000000e-01 : f32
    %390 = vector.broadcast %cst_159 : f32 to vector<2x32xf32>
    %391 = arith.mulf %390, %389 : vector<2x32xf32>
    %392 = math.tanh %391 : vector<2x32xf32>
    %cst_160 = arith.constant 5.000000e-01 : f32
    %393 = vector.broadcast %cst_160 : f32 to vector<2x32xf32>
    %394 = arith.mulf %393, %392 : vector<2x32xf32>
    %cst_161 = arith.constant 5.000000e-01 : f32
    %395 = vector.broadcast %cst_161 : f32 to vector<2x32xf32>
    %396 = arith.addf %394, %395 : vector<2x32xf32>
    %397 = vector.extract_strided_slice %388 {offsets = [0, 32], sizes = [2, 32], strides = [1, 1]} : vector<2x128xf32> to vector<2x32xf32>
    %cst_162 = arith.constant 5.000000e-01 : f32
    %398 = vector.broadcast %cst_162 : f32 to vector<2x32xf32>
    %399 = arith.mulf %398, %397 : vector<2x32xf32>
    %400 = math.tanh %399 : vector<2x32xf32>
    %cst_163 = arith.constant 5.000000e-01 : f32
    %401 = vector.broadcast %cst_163 : f32 to vector<2x32xf32>
    %402 = arith.mulf %401, %400 : vector<2x32xf32>
    %cst_164 = arith.constant 5.000000e-01 : f32
    %403 = vector.broadcast %cst_164 : f32 to vector<2x32xf32>
    %404 = arith.addf %402, %403 : vector<2x32xf32>
    %405 = vector.extract_strided_slice %388 {offsets = [0, 64], sizes = [2, 32], strides = [1, 1]} : vector<2x128xf32> to vector<2x32xf32>
    %406 = math.tanh %405 : vector<2x32xf32>
    %407 = vector.extract_strided_slice %388 {offsets = [0, 96], sizes = [2, 32], strides = [1, 1]} : vector<2x128xf32> to vector<2x32xf32>
    %cst_165 = arith.constant 5.000000e-01 : f32
    %408 = vector.broadcast %cst_165 : f32 to vector<2x32xf32>
    %409 = arith.mulf %408, %407 : vector<2x32xf32>
    %410 = math.tanh %409 : vector<2x32xf32>
    %cst_166 = arith.constant 5.000000e-01 : f32
    %411 = vector.broadcast %cst_166 : f32 to vector<2x32xf32>
    %412 = arith.mulf %411, %410 : vector<2x32xf32>
    %cst_167 = arith.constant 5.000000e-01 : f32
    %413 = vector.broadcast %cst_167 : f32 to vector<2x32xf32>
    %414 = arith.addf %412, %413 : vector<2x32xf32>
    %415 = arith.mulf %404, %376 : vector<2x32xf32>
    %416 = arith.mulf %396, %406 : vector<2x32xf32>
    %417 = arith.addf %415, %416 : vector<2x32xf32>
    %418 = math.tanh %417 : vector<2x32xf32>
    %419 = arith.mulf %414, %418 : vector<2x32xf32>
    %420 = arith.index_cast %c7_i32_155 : i32 to index
    %c0_168 = arith.constant 0 : index
    %c0_169 = arith.constant 0 : index
    %421 = vector.load %arg8[%420, %c0_168, %c0_169] : memref<8x2x32xf32, #tpu.memory_space<vmem>>, vector<1x2x32xf32>
    %422 = vector.shape_cast %421 : vector<1x2x32xf32> to vector<2x32xf32>
    %423 = vector.shape_cast %419 : vector<2x32xf32> to vector<1x2x32xf32>
    tpu.vector_store %arg8[%420, %c0_168, %c0_169], %423 {strides = array<i32>} : memref<8x2x32xf32, #tpu.memory_space<vmem>>, vector<1x2x32xf32>,
    %c8_i32_170 = arith.constant 8 : i32
    %c0_171 = arith.constant 0 : index
    %c0_172 = arith.constant 0 : index
    %424 = vector.load %arg12[%c0_171, %c0_172] : memref<2x32xf32, #tpu.memory_space<vmem>>, vector<2x32xf32>
    tpu.vector_store %arg12[%c0_171, %c0_172], %419 {strides = array<i32>} : memref<2x32xf32, #tpu.memory_space<vmem>>, vector<2x32xf32>,
    %c0_173 = arith.constant 0 : index
    %c0_174 = arith.constant 0 : index
    %425 = vector.load %arg13[%c0_173, %c0_174] : memref<2x32xf32, #tpu.memory_space<vmem>>, vector<2x32xf32>
    tpu.vector_store %arg13[%c0_173, %c0_174], %417 {strides = array<i32>} : memref<2x32xf32, #tpu.memory_space<vmem>>, vector<2x32xf32>,
    %c0_175 = arith.constant 0 : index
    %c0_176 = arith.constant 0 : index
    %426 = vector.load %arg9[%c0_175, %c0_176] : memref<2x32xf32, #tpu.memory_space<vmem>>, vector<2x32xf32>
    tpu.vector_store %arg9[%c0_175, %c0_176], %419 {strides = array<i32>} : memref<2x32xf32, #tpu.memory_space<vmem>>, vector<2x32xf32>,
    %c0_177 = arith.constant 0 : index
    %c0_178 = arith.constant 0 : index
    %427 = vector.load %arg10[%c0_177, %c0_178] : memref<2x32xf32, #tpu.memory_space<vmem>>, vector<2x32xf32>
    tpu.vector_store %arg10[%c0_177, %c0_178], %417 {strides = array<i32>} : memref<2x32xf32, #tpu.memory_space<vmem>>, vector<2x32xf32>,
    return
  }
  func.func @transform_0(%arg0: i32, %arg1: i32) -> (i32, i32, i32) {
    %c0_i32 = arith.constant 0 : i32
    %c0_i32_0 = arith.constant 0 : i32
    return %arg1, %arg0, %c0_i32 : i32, i32, i32
  }
  func.func @transform_1(%arg0: i32, %arg1: i32) -> (i32, i32) {
    %c0_i32 = arith.constant 0 : i32
    %c0_i32_0 = arith.constant 0 : i32
    %c0_i32_1 = arith.constant 0 : i32
    return %c0_i32, %c0_i32_0 : i32, i32
  }
  func.func @transform_2(%arg0: i32, %arg1: i32) -> (i32, i32) {
    %c0_i32 = arith.constant 0 : i32
    %c0_i32_0 = arith.constant 0 : i32
    %c0_i32_1 = arith.constant 0 : i32
    return %c0_i32, %c0_i32_0 : i32, i32
  }
  func.func @transform_3(%arg0: i32, %arg1: i32) -> (i32, i32) {
    %c0_i32 = arith.constant 0 : i32
    %c0_i32_0 = arith.constant 0 : i32
    %c0_i32_1 = arith.constant 0 : i32
    return %c0_i32, %c0_i32_0 : i32, i32
  }
  func.func @transform_4(%arg0: i32, %arg1: i32) -> (i32, i32) {
    %c0_i32 = arith.constant 0 : i32
    %c0_i32_0 = arith.constant 0 : i32
    return %arg0, %c0_i32 : i32, i32
  }
  func.func @transform_5(%arg0: i32, %arg1: i32) -> (i32, i32) {
    %c0_i32 = arith.constant 0 : i32
    %c0_i32_0 = arith.constant 0 : i32
    return %arg0, %c0_i32 : i32, i32
  }
  func.func @transform_6(%arg0: i32, %arg1: i32) -> (i32, i32, i32) {
    %c0_i32 = arith.constant 0 : i32
    %c0_i32_0 = arith.constant 0 : i32
    return %arg1, %arg0, %c0_i32 : i32, i32, i32
  }
  func.func @transform_7(%arg0: i32, %arg1: i32) -> (i32, i32) {
    %c0_i32 = arith.constant 0 : i32
    %c0_i32_0 = arith.constant 0 : i32
    return %arg0, %c0_i32 : i32, i32
  }
  func.func @transform_8(%arg0: i32, %arg1: i32) -> (i32, i32) {
    %c0_i32 = arith.constant 0 : i32
    %c0_i32_0 = arith.constant 0 : i32
    return %arg0, %c0_i32 : i32, i32
  }
}

</mosaic_0001>

<bundles_post_ra>
// kernel: lstm_layer_forward.3
= control target key start
LH: loop header
LB: loop body
LE: loop exit
PB: predicated region body
PF: predicated region fallthrough
CT: control target
= control target key end

     0   :  { %v1365_v0 = vmov 0.0   ;;  %vm1366_vm0 = vmmov 0   ;;  %vm32_vm1 = vcmask 254976   ;;  %vm65_vm2 = vcmask 261120   ;;  %s1708_s1 = inlined_call_operand.vmem [shape: bf16[32,128], index: 1, kind: input, shape index: {}]   ;;  %s1709_s0 = inlined_call_operand.vmem [shape: f32[8,2,32], index: 0, kind: input, shape index: {}]   ;;  %s1710_s2 = inlined_call_operand.vmem [shape: bf16[32,128], index: 2, kind: input, shape index: {}]   ;;  %s1711_s4 = inlined_call_operand.vmem [shape: f32[2,32], index: 4, kind: input, shape index: {}]   ;;  %s1712_s5 = inlined_call_operand.vmem [shape: f32[2,32], index: 5, kind: input, shape index: {}]   ;;  %s1713_s3 = inlined_call_operand.vmem [shape: f32[1,128], index: 3, kind: input, shape index: {}]   ;;  %s1714_s6 = inlined_call_operand.vmem [shape: f32[8,2,32], index: 6, kind: output, shape index: {0}]   ;;  %s1715_s8 = inlined_call_operand.vmem [shape: f32[2,32], index: 8, kind: output, shape index: {2}]   ;;  %s1716_s7 = inlined_call_operand.vmem [shape: f32[2,32], index: 7, kind: output, shape index: {1}]  }
   0x1   :  { %1180 = vmatprep.subr.bf16.mxu0 %v1365_v0  ;;  %v1419_v1 = vld [vmem:[%s1708_s1 + $0x8] sm:$0xff]   ;;  %1184 = vmatprep.mubr.msk.bf16.mxu0 %vm1366_vm0, %v1365_v0  ;;  %v1430_v2 = vld [vmem:[%s1708_s1] sm:$0xff]  }
   0x2   :  { %1188 = vmatprep.subr.bf16.mxu1 %v1365_v0  ;;  %1192 = vmatprep.mubr.msk.bf16.mxu1 %vm1366_vm0, %v1365_v0  ;;  %v45_v3 = vld [vmem:[%s1709_s0] sm:$0x3]  ;;  %v1103_v6 = vld [vmem:[%s1709_s0 + $0x4] sm:$0x3]  ;;  %v1107_v8 = vld [vmem:[%s1709_s0 + $0x8] sm:$0x3] }
   0x3   :  { %1181 = vmatpush3.bf16.msra.mxu0 %v1419_v1  ;;  %1189 = vmatpush3.bf16.msra.mxu1 %v1419_v1  ;;  %v46_v4 = vpack.c.bf16 %v45_v3, %v45_v3  ;;  %v31_v5 = vld [vmem:[%s1711_s4] sm:$0x3]  ;;  %v160_v7 = vpack.c.bf16 %v1103_v6, %v1103_v6  ;;  %v256_v9 = vpack.c.bf16 %v1107_v8, %v1107_v8  ;;  %v1111_v10 = vld [vmem:[%s1709_s0 + $0xc] sm:$0x3]  ;;  %v1101_v56 = vld [vmem:[%s1709_s0 + $0x2] sm:$0x3] }
   0x4   :  { %1182 = vmatprep.subr.bf16.mxu0 %v1365_v0  ;;  %1190 = vmatprep.subr.bf16.mxu1 %v1365_v0  ;;  %33 = vst.msk [vmem:[#allocation3] sm:$0x3] %vm32_vm1, %v31_v5  ;;  %v352_v11 = vpack.c.bf16 %v1111_v10, %v1111_v10  ;;  %v1478_v12 = vld [vmem:[%s1710_s2 + $0x8] sm:$0xff]   ;;  %v1486_v13 = vld [vmem:[%s1710_s2] sm:$0xff]   ;;  %v112_v57 = vpack.c.bf16 %v1101_v56, %v1101_v56 }
   0x5   :  { %v34_v16 = vld [vmem:[%s1712_s5] sm:$0x3]  ;;  %s1368_s5 = smov 32   ;;  %v1105_v58 = vld [vmem:[%s1709_s0 + $0x6] sm:$0x3] }
   0x6   :  { %35 = vst.msk [vmem:[#allocation4] sm:$0x3] %vm32_vm1, %v34_v16  ;;  %v1507_v17 = vld [vmem:[%s1713_s3] ss:$0 sm:$0xff]  ;;  %s1367_s3 = smov 64   ;;  %v208_v59 = vpack.c.bf16 %v1105_v58, %v1105_v58 }
   0x7   :  { %1183 = vmatpush3.bf16.msra.mxu0 %v1430_v2  ;;  %1191 = vmatpush3.bf16.msra.mxu1 %v1430_v2  ;;  %v1109_v61 = vld [vmem:[%s1709_s0 + $0xa] sm:$0x3]  ;;  %v1113_v63 = vld [vmem:[%s1709_s0 + $0xe] sm:$0x3]  ;;  %s1369_s0 = smov 96  }
   0x8   :  { %1196 = vmatprep.subr.bf16.mxu0 %v1365_v0  ;;  %1204 = vmatprep.subr.bf16.mxu1 %v1365_v0  ;;  %v304_v62 = vpack.c.bf16 %v1109_v61, %v1109_v61  ;;  %v400_v3 = vpack.c.bf16 %v1113_v63, %v1113_v63 }
   0xa   :  { %1185 = vmatmul.mubr.msk.bf16.vlgmr.msra.gmra.mxu0 %vm65_vm2, %v46_v4  ;;  %1193 = vmatmul.mubr.msk.bf16.vlgmr.msra.gmra.mxu1 %vm65_vm2, %v112_v57 }
   0xb   :  { %1197 = vmatpush3.bf16.msra.mxu0 %v1419_v1  ;;  %1200 = vmatprep.mubr.msk.bf16.mxu0 %vm1366_vm0, %v1365_v0  ;;  %v446_v14 = vld [vmem:[#allocation3] sm:$0x3] }
   0xc   :  { %1198 = vmatprep.subr.bf16.mxu0 %v1365_v0  ;;  %v449_v15 = vpack.c.bf16 %v446_v14, %v446_v14  ;;  %1205 = vmatpush3.bf16.msra.mxu1 %v1419_v1 }
   0xd   :  { %v447_v45 = vld [vmem:[#allocation4] sm:$0x3]  ;;  %1208 = vmatprep.mubr.msk.bf16.mxu1 %vm1366_vm0, %v1365_v0  ;;  %1206 = vmatprep.subr.bf16.mxu1 %v1365_v0 }
   0xf   :  { %1199 = vmatpush3.bf16.msra.mxu0 %v1430_v2 }
  0x10   :  { %1212 = vmatprep.subr.bf16.mxu0 %v1365_v0  ;;  %1207 = vmatpush3.bf16.msra.mxu1 %v1430_v2 }
  0x11   :  { %1220 = vmatprep.subr.bf16.mxu1 %v1365_v0 }
  0x12   :  { %1201 = vmatmul.mubr.msk.bf16.vlgmr.msra.gmra.mxu0 %vm65_vm2, %v160_v7 }
  0x13   :  { %1213 = vmatpush3.bf16.msra.mxu0 %v1419_v1  ;;  %1216 = vmatprep.mubr.msk.bf16.mxu0 %vm1366_vm0, %v1365_v0 }
  0x14   :  { %1214 = vmatprep.subr.bf16.mxu0 %v1365_v0  ;;  %1209 = vmatmul.mubr.msk.bf16.vlgmr.msra.gmra.mxu1 %vm65_vm2, %v208_v59 }
  0x15   :  { %1221 = vmatpush3.bf16.msra.mxu1 %v1419_v1  ;;  %1224 = vmatprep.mubr.msk.bf16.mxu1 %vm1366_vm0, %v1365_v0 }
  0x16   :  { %1222 = vmatprep.subr.bf16.mxu1 %v1365_v0 }
  0x17   :  { %1215 = vmatpush3.bf16.msra.mxu0 %v1430_v2 }
  0x18   :  { %1228 = vmatprep.subr.bf16.mxu0 %v1365_v0 }
  0x19   :  { %1223 = vmatpush3.bf16.msra.mxu1 %v1430_v2 }
  0x1a   :  { %1217 = vmatmul.mubr.msk.bf16.vlgmr.msra.gmra.mxu0 %vm65_vm2, %v256_v9  ;;  %1236 = vmatprep.subr.bf16.mxu1 %v1365_v0 }
  0x1b   :  { %1229 = vmatpush3.bf16.msra.mxu0 %v1419_v1  ;;  %1232 = vmatprep.mubr.msk.bf16.mxu0 %vm1366_vm0, %v1365_v0 }
  0x1c   :  { %1230 = vmatprep.subr.bf16.mxu0 %v1365_v0  ;;  %1225 = vmatmul.mubr.msk.bf16.vlgmr.msra.gmra.mxu1 %vm65_vm2, %v304_v62 }
  0x1d   :  { %1237 = vmatpush3.bf16.msra.mxu1 %v1419_v1  ;;  %1240 = vmatprep.mubr.msk.bf16.mxu1 %vm1366_vm0, %v1365_v0 }
  0x1e   :  { %1238 = vmatprep.subr.bf16.mxu1 %v1365_v0 }
  0x1f   :  { %1231 = vmatpush3.bf16.msra.mxu0 %v1430_v2 }
  0x20   :  { %1244 = vmatprep.subr.bf16.mxu0 %v1365_v0 }
  0x21   :  { %1239 = vmatpush3.bf16.msra.mxu1 %v1430_v2 }
  0x22   :  { %1233 = vmatmul.mubr.msk.bf16.vlgmr.msra.gmra.mxu0 %vm65_vm2, %v352_v11  ;;  %1252 = vmatprep.subr.bf16.mxu1 %v1365_v0 }
  0x23   :  { %1245 = vmatpush3.bf16.msra.mxu0 %v1478_v12  ;;  %1248 = vmatprep.mubr.msk.bf16.mxu0 %vm1366_vm0, %v1365_v0 }
  0x24   :  { %1246 = vmatprep.subr.bf16.mxu0 %v1365_v0  ;;  %1241 = vmatmul.mubr.msk.bf16.vlgmr.msra.gmra.mxu1 %vm65_vm2, %v400_v3 }
  0x25   :  { %1253 = vmatpush3.bf16.msra.mxu1 %v1478_v12  ;;  %1256 = vmatprep.mubr.msk.bf16.mxu1 %vm1366_vm0, %v1365_v0 }
  0x26   :  { %1254 = vmatprep.subr.bf16.mxu1 %v1365_v0 }
  0x27   :  { %1247 = vmatpush3.bf16.msra.mxu0 %v1486_v13 }
  0x28   :  { %1260 = vmatprep.subr.bf16.mxu0 %v1365_v0 }
  0x29   :  { %1255 = vmatpush3.bf16.msra.mxu1 %v1486_v13 }
  0x2a   :  { %1249 = vmatmul.mubr.msk.bf16.vlgmr.msra.gmra.mxu0 %vm65_vm2, %v449_v15  ;;  %1268 = vmatprep.subr.bf16.mxu1 %v1365_v0 }
  0x2b   :  { %1261 = vmatpush3.bf16.msra.mxu0 %v1478_v12  ;;  %1264 = vmatprep.mubr.msk.bf16.mxu0 %vm1366_vm0, %v1365_v0 }
  0x2c   :  { %1262 = vmatprep.subr.bf16.mxu0 %v1365_v0 }
  0x2f   :  { %1263 = vmatpush3.bf16.msra.mxu0 %v1486_v13 }
  0x30   :  { %1276 = vmatprep.subr.bf16.mxu0 %v1365_v0 }
  0xca   :  { %v103_v18 = vpop.f32.mrf.mxu0  ;;  %v150_v5 = vpop.f32.mrf.mxu1 }
  0xcb   :  { %v104_v19 = vadd.f32 %v1507_v17, %v103_v18  ;;  %v151_v6 = vadd.f32 %v1507_v17, %v150_v5 }
  0xcc   :  { %v1186_v20 = vpop.f32.mrf.mxu0  ;;  %v1194_v7 = vpop.f32.mrf.mxu1 }
  0xcd   :  { %109 = vst [vmem:[#allocation2] sm:$0x3] %v104_v19  ;;  %157 = vst [vmem:[#allocation2 + $0x2] sm:$0x3] %v151_v6 }
  0xce   :  { %v106_v21 = vpop.f32.mrf.mxu0  ;;  %v153_v8 = vpop.f32.mrf.mxu1 }
  0xd0   :  { %v1187_v22 = vpop.f32.mrf.mxu0  ;;  %v1195_v9 = vpop.f32.mrf.mxu1 }
  0xd2   :  { %v198_v23 = vpop.f32.mrf.mxu0 }
  0xd3   :  { %v199_v24 = vadd.f32 %v1507_v17, %v198_v23 }
  0xd4   :  { %v1202_v25 = vpop.f32.mrf.mxu0  ;;  %v448_v38 = vld [vmem:[#allocation2] sm:$0x3]  ;;  %v246_v10 = vpop.f32.mrf.mxu1 }
  0xd5   :  { %205 = vst [vmem:[#allocation2 + $0x4] sm:$0x3] %v199_v24  ;;  %v247_v11 = vadd.f32 %v1507_v17, %v246_v10 }
  0xd6   :  { %v201_v26 = vpop.f32.mrf.mxu0  ;;  %v1210_v14 = vpop.f32.mrf.mxu1 }
  0xd7   :  { %253 = vst [vmem:[#allocation2 + $0x6] sm:$0x3] %v247_v11 }
  0xd8   :  { %v1203_v27 = vpop.f32.mrf.mxu0  ;;  %v249_v15 = vpop.f32.mrf.mxu1 }
  0xda   :  { %v294_v28 = vpop.f32.mrf.mxu0  ;;  %v1211_v16 = vpop.f32.mrf.mxu1 }
  0xdb   :  { %v295_v29 = vadd.f32 %v1507_v17, %v294_v28 }
  0xdc   :  { %v1218_v30 = vpop.f32.mrf.mxu0  ;;  %v342_v18 = vpop.f32.mrf.mxu1 }
  0xdd   :  { %301 = vst [vmem:[#allocation2 + $0x8] sm:$0x3] %v295_v29  ;;  %v343_v19 = vadd.f32 %v1507_v17, %v342_v18  ;;  %v538_v29 = vld [vmem:[#allocation2 + $0x2] sm:$0x3] }
  0xde   :  { %v297_v31 = vpop.f32.mrf.mxu0  ;;  %v1226_v20 = vpop.f32.mrf.mxu1  ;;  %v692_v8 = vld [vmem:[#allocation2 + $0x6] sm:$0x3] }
  0xdf   :  { %349 = vst [vmem:[#allocation2 + $0xa] sm:$0x3] %v343_v19 }
  0xe0   :  { %v1219_v32 = vpop.f32.mrf.mxu0  ;;  %v345_v21 = vpop.f32.mrf.mxu1 }
  0xe2   :  { %v390_v33 = vpop.f32.mrf.mxu0  ;;  %v1227_v22 = vpop.f32.mrf.mxu1 }
  0xe3   :  { %v391_v34 = vadd.f32 %v1507_v17, %v390_v33 }
  0xe4   :  { %v1234_v35 = vpop.f32.mrf.mxu0  ;;  %v438_v23 = vpop.f32.mrf.mxu1 }
  0xe5   :  { %397 = vst [vmem:[#allocation2 + $0xc] sm:$0x3] %v391_v34  ;;  %v439_v24 = vadd.f32 %v1507_v17, %v438_v23 }
  0xe6   :  { %v393_v36 = vpop.f32.mrf.mxu0  ;;  %v1242_v25 = vpop.f32.mrf.mxu1 }
  0xe7   :  { %445 = vst [vmem:[#allocation2 + $0xe] sm:$0x3] %v439_v24 }
  0xe8   :  { %v1235_v37 = vpop.f32.mrf.mxu0  ;;  %v441_v26 = vpop.f32.mrf.mxu1 }
  0xea   :  { %v499_v39 = vpop.f32.mrf.mxu0  ;;  %v1243_v27 = vpop.f32.mrf.mxu1 }
  0xeb   :  { %v505_v40 = vadd.f32 %v499_v39, %v448_v38 }
  0xec   :  { %v1250_v41 = vpop.f32.mrf.mxu0 }
  0xed   :  { %1317 = vtanh.f32 %v505_v40  ;;  %v506_v46 = vmul.f32 0.5, %v505_v40 }
  0xee   :  { %v502_v42 = vpop.f32.mrf.mxu0 }
  0xef   :  { %1319 = vtanh.f32 %v506_v46 }
  0xf0   :  { %v1251_v43 = vpop.f32.mrf.mxu0 }
  0xfa   :  { %v1318_v44 = vpop.eup %1317 }
  0xfb   :  { %517 = vrot.lane.b32.xlu0 %v1318_v44, %s1367_s3 }
  0xfc   :  { %v1320_v47 = vpop.eup %1319 }
  0xfd   :  { %v508_v48 = vmul.f32 0.5, %v1320_v47 }
  0xff   :  { %512 = vrot.lane.b32.xlu0 %v447_v45, %s1368_s5  ;;  %v509_v49 = vadd.f32 0.5, %v508_v48 }
 0x16d   :  { %v518_v50 = vpop.permute.xlu0 %517 }
 0x16e   :  { %v520_v51 = vmul.f32 %v518_v50, %v509_v49 }
 0x170   :  { %522 = vrot.lane.b32.xlu1 %v520_v51, %s1368_s5 }
 0x171   :  { %v513_v52 = vpop.permute.xlu0 %512 }
 0x172   :  { %v515_v53 = vmul.f32 %v513_v52, %v509_v49 }
 0x1e2   :  { %v523_v54 = vpop.permute.xlu1 %522 }
 0x1e3   :  { %v1516_v55 = vadd.f32 %v523_v54, %v515_v53 }
 0x1e5   :  { %1321 = vtanh.f32 %v1516_v55 }
 0x1f2   :  { %v1322_v60 = vpop.eup %1321 }
 0x1f3   :  { %528 = vrot.lane.b32.xlu1 %v1322_v60, %s1367_s3 }
 0x265   :  { %v529_v1 = vpop.permute.xlu1 %528 }
 0x266   :  { %v1560_v4 = vmul.f32 %v529_v1, %v509_v49  ;;  %v615_v49 = vld [vmem:[#allocation2 + $0x4] sm:$0x3] }
 0x268   :  { %v539_v2 = vpack.c.bf16 %v1560_v4, %v1560_v4 }
 0x26a   :  { %541 = vrot.lane.b32.xlu0 %v539_v2, %s1368_s5 }
 0x2dc   :  { %v542_v28 = vpop.permute.xlu0 %541 }
 0x2dd   :  { %1257 = vmatmul.mubr.msk.bf16.vlgmr.msra.gmra.mxu1 %vm65_vm2, %v542_v28 }
 0x2de   :  { %1269 = vmatpush3.bf16.msra.mxu1 %v1478_v12  ;;  %1272 = vmatprep.mubr.msk.bf16.mxu1 %vm1366_vm0, %v1365_v0 }
 0x2df   :  { %1270 = vmatprep.subr.bf16.mxu1 %v1365_v0 }
 0x2e2   :  { %1271 = vmatpush3.bf16.msra.mxu1 %v1486_v13 }
 0x2e3   :  { %1284 = vmatprep.subr.bf16.mxu1 %v1365_v0 }
 0x39d   :  { %v580_v17 = vpop.f32.mrf.mxu1 }
 0x39e   :  { %v586_v30 = vadd.f32 %v580_v17, %v538_v29 }
 0x39f   :  { %v1258_v31 = vpop.f32.mrf.mxu1 }
 0x3a0   :  { %1323 = vtanh.f32 %v586_v30  ;;  %v587_v35 = vmul.f32 0.5, %v586_v30  ;;  %v769_v31 = vld [vmem:[#allocation2 + $0x8] sm:$0x3] }
 0x3a1   :  { %v583_v32 = vpop.f32.mrf.mxu1 }
 0x3a2   :  { %1325 = vtanh.f32 %v587_v35 }
 0x3a3   :  { %v1259_v33 = vpop.f32.mrf.mxu1 }
 0x3ad   :  { %v1324_v34 = vpop.eup %1323 }
 0x3ae   :  { %594 = vrot.lane.b32.xlu1 %v1324_v34, %s1367_s3 }
 0x3af   :  { %v1326_v36 = vpop.eup %1325 }
 0x3b0   :  { %v589_v37 = vmul.f32 0.5, %v1326_v36 }
 0x3b2   :  { %v590_v38 = vadd.f32 0.5, %v589_v37 }
 0x3b4   :  { %v592_v41 = vmul.f32 %v590_v38, %v1516_v55 }
 0x420   :  { %v595_v39 = vpop.permute.xlu1 %594 }
 0x421   :  { %v597_v40 = vmul.f32 %v595_v39, %v590_v38 }
 0x423   :  { %599 = vrot.lane.b32.xlu0 %v597_v40, %s1368_s5 }
 0x495   :  { %v600_v42 = vpop.permute.xlu0 %599 }
 0x496   :  { %v602_v43 = vadd.f32 %v600_v42, %v592_v41 }
 0x498   :  { %1327 = vtanh.f32 %v602_v43 }
 0x4a5   :  { %v1328_v44 = vpop.eup %1327 }
 0x4a6   :  { %605 = vrot.lane.b32.xlu1 %v1328_v44, %s1367_s3 }
 0x518   :  { %v606_v45 = vpop.permute.xlu1 %605 }
 0x519   :  { %v1580_v46 = vmul.f32 %v606_v45, %v590_v38 }
 0x51b   :  { %v616_v47 = vpack.c.bf16 %v1580_v46, %v1580_v46 }
 0x51d   :  { %618 = vrot.lane.b32.xlu0 %v616_v47, %s1368_s5 }
 0x58f   :  { %v619_v48 = vpop.permute.xlu0 %618 }
 0x590   :  { %1265 = vmatmul.mubr.msk.bf16.vlgmr.msra.gmra.mxu0 %vm65_vm2, %v619_v48 }
 0x591   :  { %1277 = vmatpush3.bf16.msra.mxu0 %v1478_v12  ;;  %1280 = vmatprep.mubr.msk.bf16.mxu0 %vm1366_vm0, %v1365_v0 }
 0x592   :  { %1278 = vmatprep.subr.bf16.mxu0 %v1365_v0 }
 0x595   :  { %1279 = vmatpush3.bf16.msra.mxu0 %v1486_v13 }
 0x596   :  { %1292 = vmatprep.subr.bf16.mxu0 %v1365_v0 }
 0x650   :  { %v657_v50 = vpop.f32.mrf.mxu0 }
 0x651   :  { %v663_v51 = vadd.f32 %v657_v50, %v615_v49 }
 0x652   :  { %v1266_v52 = vpop.f32.mrf.mxu0 }
 0x653   :  { %1329 = vtanh.f32 %v663_v51  ;;  %v664_v56 = vmul.f32 0.5, %v663_v51 }
 0x654   :  { %v660_v53 = vpop.f32.mrf.mxu0 }
 0x655   :  { %1331 = vtanh.f32 %v664_v56  ;;  %v846_v53 = vld [vmem:[#allocation2 + $0xa] sm:$0x3] }
 0x656   :  { %v1267_v54 = vpop.f32.mrf.mxu0 }
 0x660   :  { %v1330_v55 = vpop.eup %1329 }
 0x661   :  { %671 = vrot.lane.b32.xlu1 %v1330_v55, %s1367_s3 }
 0x662   :  { %v1332_v57 = vpop.eup %1331 }
 0x663   :  { %v666_v58 = vmul.f32 0.5, %v1332_v57 }
 0x665   :  { %v667_v59 = vadd.f32 0.5, %v666_v58 }
 0x667   :  { %v669_v62 = vmul.f32 %v667_v59, %v602_v43 }
 0x6d3   :  { %v672_v60 = vpop.permute.xlu1 %671 }
 0x6d4   :  { %v674_v61 = vmul.f32 %v672_v60, %v667_v59 }
 0x6d6   :  { %676 = vrot.lane.b32.xlu0 %v674_v61, %s1368_s5 }
 0x748   :  { %v677_v63 = vpop.permute.xlu0 %676 }
 0x749   :  { %v679_v3 = vadd.f32 %v677_v63, %v669_v62 }
 0x74b   :  { %1333 = vtanh.f32 %v679_v3 }
 0x758   :  { %v1334_v1 = vpop.eup %1333 }
 0x759   :  { %682 = vrot.lane.b32.xlu1 %v1334_v1, %s1367_s3 }
 0x7cb   :  { %v683_v2 = vpop.permute.xlu1 %682 }
 0x7cc   :  { %v1595_v5 = vmul.f32 %v683_v2, %v667_v59 }
 0x7ce   :  { %v693_v6 = vpack.c.bf16 %v1595_v5, %v1595_v5 }
 0x7d0   :  { %695 = vrot.lane.b32.xlu0 %v693_v6, %s1368_s5 }
 0x842   :  { %v696_v7 = vpop.permute.xlu0 %695 }
 0x843   :  { %1273 = vmatmul.mubr.msk.bf16.vlgmr.msra.gmra.mxu1 %vm65_vm2, %v696_v7 }
 0x844   :  { %1285 = vmatpush3.bf16.msra.mxu1 %v1478_v12  ;;  %1288 = vmatprep.mubr.msk.bf16.mxu1 %vm1366_vm0, %v1365_v0 }
 0x845   :  { %1286 = vmatprep.subr.bf16.mxu1 %v1365_v0 }
 0x848   :  { %1287 = vmatpush3.bf16.msra.mxu1 %v1486_v13 }
 0x849   :  { %1300 = vmatprep.subr.bf16.mxu1 %v1365_v0 }
 0x903   :  { %v734_v9 = vpop.f32.mrf.mxu1 }
 0x904   :  { %v740_v10 = vadd.f32 %v734_v9, %v692_v8 }
 0x905   :  { %v1274_v11 = vpop.f32.mrf.mxu1 }
 0x906   :  { %1335 = vtanh.f32 %v740_v10  ;;  %v741_v18 = vmul.f32 0.5, %v740_v10  ;;  %v923_v10 = vld [vmem:[#allocation2 + $0xc] sm:$0x3] }
 0x907   :  { %v737_v14 = vpop.f32.mrf.mxu1 }
 0x908   :  { %1337 = vtanh.f32 %v741_v18 }
 0x909   :  { %v1275_v15 = vpop.f32.mrf.mxu1 }
 0x913   :  { %v1336_v16 = vpop.eup %1335 }
 0x914   :  { %748 = vrot.lane.b32.xlu1 %v1336_v16, %s1367_s3 }
 0x915   :  { %v1338_v19 = vpop.eup %1337 }
 0x916   :  { %v743_v20 = vmul.f32 0.5, %v1338_v19 }
 0x918   :  { %v744_v21 = vadd.f32 0.5, %v743_v20 }
 0x91a   :  { %v746_v24 = vmul.f32 %v744_v21, %v679_v3 }
 0x986   :  { %v749_v22 = vpop.permute.xlu1 %748 }
 0x987   :  { %v751_v23 = vmul.f32 %v749_v22, %v744_v21 }
 0x989   :  { %753 = vrot.lane.b32.xlu0 %v751_v23, %s1368_s5 }
 0x9fb   :  { %v754_v25 = vpop.permute.xlu0 %753 }
 0x9fc   :  { %v756_v26 = vadd.f32 %v754_v25, %v746_v24 }
 0x9fe   :  { %1339 = vtanh.f32 %v756_v26 }
 0xa0b   :  { %v1340_v27 = vpop.eup %1339 }
 0xa0c   :  { %759 = vrot.lane.b32.xlu1 %v1340_v27, %s1367_s3 }
 0xa7e   :  { %v760_v28 = vpop.permute.xlu1 %759 }
 0xa7f   :  { %v1610_v29 = vmul.f32 %v760_v28, %v744_v21 }
 0xa81   :  { %v770_v17 = vpack.c.bf16 %v1610_v29, %v1610_v29 }
 0xa83   :  { %772 = vrot.lane.b32.xlu0 %v770_v17, %s1368_s5 }
 0xaf5   :  { %v773_v30 = vpop.permute.xlu0 %772 }
 0xaf6   :  { %1281 = vmatmul.mubr.msk.bf16.vlgmr.msra.gmra.mxu0 %vm65_vm2, %v773_v30 }
 0xaf7   :  { %1293 = vmatpush3.bf16.msra.mxu0 %v1478_v12  ;;  %1296 = vmatprep.mubr.msk.bf16.mxu0 %vm1366_vm0, %v1365_v0 }
 0xaf8   :  { %1294 = vmatprep.subr.bf16.mxu0 %v1365_v0 }
 0xafb   :  { %1295 = vmatpush3.bf16.msra.mxu0 %v1486_v13 }
 0xbb6   :  { %v811_v32 = vpop.f32.mrf.mxu0 }
 0xbb7   :  { %v817_v33 = vadd.f32 %v811_v32, %v769_v31 }
 0xbb8   :  { %v1282_v34 = vpop.f32.mrf.mxu0 }
 0xbb9   :  { %1341 = vtanh.f32 %v817_v33  ;;  %v818_v38 = vmul.f32 0.5, %v817_v33  ;;  %v1000_v34 = vld [vmem:[#allocation2 + $0xe] sm:$0x3] }
 0xbba   :  { %v814_v35 = vpop.f32.mrf.mxu0 }
 0xbbb   :  { %1343 = vtanh.f32 %v818_v38 }
 0xbbc   :  { %v1283_v36 = vpop.f32.mrf.mxu0 }
 0xbc6   :  { %v1342_v37 = vpop.eup %1341 }
 0xbc7   :  { %825 = vrot.lane.b32.xlu1 %v1342_v37, %s1367_s3 }
 0xbc8   :  { %v1344_v39 = vpop.eup %1343 }
 0xbc9   :  { %v820_v40 = vmul.f32 0.5, %v1344_v39 }
 0xbcb   :  { %v821_v41 = vadd.f32 0.5, %v820_v40 }
 0xbcd   :  { %v823_v44 = vmul.f32 %v821_v41, %v756_v26 }
 0xc39   :  { %v826_v42 = vpop.permute.xlu1 %825 }
 0xc3a   :  { %v828_v43 = vmul.f32 %v826_v42, %v821_v41 }
 0xc3c   :  { %830 = vrot.lane.b32.xlu0 %v828_v43, %s1368_s5 }
 0xcae   :  { %v831_v45 = vpop.permute.xlu0 %830 }
 0xcaf   :  { %v833_v47 = vadd.f32 %v831_v45, %v823_v44 }
 0xcb1   :  { %1345 = vtanh.f32 %v833_v47 }
 0xcbe   :  { %v1346_v48 = vpop.eup %1345 }
 0xcbf   :  { %836 = vrot.lane.b32.xlu1 %v1346_v48, %s1367_s3 }
 0xd31   :  { %v837_v49 = vpop.permute.xlu1 %836 }
 0xd32   :  { %v1624_v50 = vmul.f32 %v837_v49, %v821_v41 }
 0xd34   :  { %v847_v51 = vpack.c.bf16 %v1624_v50, %v1624_v50 }
 0xd36   :  { %849 = vrot.lane.b32.xlu0 %v847_v51, %s1368_s5 }
 0xda8   :  { %v850_v52 = vpop.permute.xlu0 %849 }
 0xda9   :  { %1289 = vmatmul.mubr.msk.bf16.vlgmr.msra.gmra.mxu1 %vm65_vm2, %v850_v52 }
 0xdaa   :  { %1301 = vmatpush3.bf16.msra.mxu1 %v1478_v12  ;;  %1304 = vmatprep.mubr.msk.bf16.mxu1 %vm1366_vm0, %v1365_v0 }
 0xdab   :  { %1302 = vmatprep.subr.bf16.mxu1 %v1365_v0 }
 0xdae   :  { %1303 = vmatpush3.bf16.msra.mxu1 %v1486_v13 }
 0xe69   :  { %v888_v54 = vpop.f32.mrf.mxu1 }
 0xe6a   :  { %v894_v55 = vadd.f32 %v888_v54, %v846_v53 }
 0xe6b   :  { %v1290_v56 = vpop.f32.mrf.mxu1 }
 0xe6c   :  { %1347 = vtanh.f32 %v894_v55  ;;  %v895_v60 = vmul.f32 0.5, %v894_v55 }
 0xe6d   :  { %v891_v57 = vpop.f32.mrf.mxu1 }
 0xe6e   :  { %1349 = vtanh.f32 %v895_v60 }
 0xe6f   :  { %v1291_v58 = vpop.f32.mrf.mxu1 }
 0xe79   :  { %v1348_v59 = vpop.eup %1347 }
 0xe7a   :  { %902 = vrot.lane.b32.xlu1 %v1348_v59, %s1367_s3 }
 0xe7b   :  { %v1350_v12 = vpop.eup %1349 }
 0xe7c   :  { %v897_v61 = vmul.f32 0.5, %v1350_v12 }
 0xe7e   :  { %v898_v62 = vadd.f32 0.5, %v897_v61 }
 0xe80   :  { %v900_v0 = vmul.f32 %v898_v62, %v833_v47 }
 0xeec   :  { %v903_v63 = vpop.permute.xlu1 %902 }
 0xeed   :  { %v905_v3 = vmul.f32 %v903_v63, %v898_v62 }
 0xeef   :  { %907 = vrot.lane.b32.xlu0 %v905_v3, %s1368_s5 }
 0xf61   :  { %v908_v13 = vpop.permute.xlu0 %907 }
 0xf62   :  { %v910_v1 = vadd.f32 %v908_v13, %v900_v0 }
 0xf64   :  { %1351 = vtanh.f32 %v910_v1 }
 0xf71   :  { %v1352_v2 = vpop.eup %1351 }
 0xf72   :  { %913 = vrot.lane.b32.xlu1 %v1352_v2, %s1367_s3 }
 0xfe4   :  { %v914_v6 = vpop.permute.xlu1 %913 }
 0xfe5   :  { %v1638_v7 = vmul.f32 %v914_v6, %v898_v62 }
 0xfe7   :  { %v924_v8 = vpack.c.bf16 %v1638_v7, %v1638_v7 }
 0xfe9   :  { %926 = vrot.lane.b32.xlu0 %v924_v8, %s1368_s5 }
0x105b   :  { %v927_v9 = vpop.permute.xlu0 %926 }
0x105c   :  { %1297 = vmatmul.mubr.msk.bf16.vlgmr.msra.gmra.mxu0 %vm65_vm2, %v927_v9 }
0x111c   :  { %v965_v11 = vpop.f32.mrf.mxu0 }
0x111d   :  { %v971_v14 = vadd.f32 %v965_v11, %v923_v10 }
0x111e   :  { %v1298_v15 = vpop.f32.mrf.mxu0 }
0x111f   :  { %1353 = vtanh.f32 %v971_v14  ;;  %v972_v20 = vmul.f32 0.5, %v971_v14 }
0x1120   :  { %v968_v16 = vpop.f32.mrf.mxu0 }
0x1121   :  { %1355 = vtanh.f32 %v972_v20 }
0x1122   :  { %v1299_v18 = vpop.f32.mrf.mxu0 }
0x112c   :  { %v1354_v19 = vpop.eup %1353 }
0x112d   :  { %979 = vrot.lane.b32.xlu1 %v1354_v19, %s1367_s3 }
0x112e   :  { %v1356_v21 = vpop.eup %1355 }
0x112f   :  { %v974_v22 = vmul.f32 0.5, %v1356_v21 }
0x1131   :  { %v975_v23 = vadd.f32 0.5, %v974_v22 }
0x1133   :  { %v977_v26 = vmul.f32 %v975_v23, %v910_v1 }
0x119f   :  { %v980_v24 = vpop.permute.xlu1 %979 }
0x11a0   :  { %v982_v25 = vmul.f32 %v980_v24, %v975_v23 }
0x11a2   :  { %984 = vrot.lane.b32.xlu0 %v982_v25, %s1368_s5 }
0x1214   :  { %v985_v27 = vpop.permute.xlu0 %984 }
0x1215   :  { %v987_v28 = vadd.f32 %v985_v27, %v977_v26 }
0x1217   :  { %1357 = vtanh.f32 %v987_v28 }
0x1224   :  { %v1358_v17 = vpop.eup %1357 }
0x1225   :  { %990 = vrot.lane.b32.xlu1 %v1358_v17, %s1367_s3 }
0x1297   :  { %v991_v30 = vpop.permute.xlu1 %990 }
0x1298   :  { %v993_v31 = vmul.f32 %v991_v30, %v975_v23 }
0x129a   :  { %v1001_v32 = vpack.c.bf16 %v993_v31, %v993_v31 }
0x129c   :  { %1003 = vrot.lane.b32.xlu0 %v1001_v32, %s1368_s5 }
0x130e   :  { %v1004_v33 = vpop.permute.xlu0 %1003 }
0x130f   :  { %1305 = vmatmul.mubr.msk.bf16.vlgmr.msra.gmra.mxu1 %vm65_vm2, %v1004_v33 }
0x13cf   :  { %v1042_v35 = vpop.f32.mrf.mxu1 }
0x13d0   :  { %v1048_v36 = vadd.f32 %v1042_v35, %v1000_v34 }
0x13d1   :  { %v1306_v37 = vpop.f32.mrf.mxu1 }
0x13d2   :  { %1359 = vtanh.f32 %v1048_v36  ;;  %v1049_v41 = vmul.f32 0.5, %v1048_v36 }
0x13d3   :  { %v1045_v38 = vpop.f32.mrf.mxu1 }
0x13d4   :  { %1361 = vtanh.f32 %v1049_v41 }
0x13d5   :  { %v1307_v39 = vpop.f32.mrf.mxu1 }
0x13df   :  { %v1360_v40 = vpop.eup %1359 }
0x13e0   :  { %1056 = vrot.lane.b32.xlu1 %v1360_v40, %s1367_s3 }
0x13e1   :  { %v1362_v42 = vpop.eup %1361 }
0x13e2   :  { %v1051_v43 = vmul.f32 0.5, %v1362_v42 }
0x13e4   :  { %v1052_v44 = vadd.f32 0.5, %v1051_v43 }
0x13e6   :  { %v1054_v48 = vmul.f32 %v1052_v44, %v987_v28 }
0x1452   :  { %v1057_v45 = vpop.permute.xlu1 %1056 }
0x1453   :  { %v1059_v47 = vmul.f32 %v1057_v45, %v1052_v44 }
0x1455   :  { %1061 = vrot.lane.b32.xlu0 %v1059_v47, %s1368_s5 }
0x1459   :  { %533 = vrot.lane.b32.xlu0 %v1560_v4, %s1368_s5 }
0x145d   :  { %687 = vrot.lane.b32.xlu0 %v1595_v5, %s1368_s5 }
0x1461   :  { %841 = vrot.lane.b32.xlu0 %v1624_v50, %s1368_s5 }
0x1465   :  { %995 = vrot.lane.b32.xlu0 %v993_v31, %s1368_s5 }
0x14c7   :  { %v1062_v49 = vpop.permute.xlu0 %1061 }
0x14c8   :  { %v1064_v51 = vadd.f32 %v1062_v49, %v1054_v48 }
0x14ca   :  { %1363 = vtanh.f32 %v1064_v51  ;;  %1079 = vrot.lane.b32.xlu0 %v1064_v51, %s1369_s0 }
0x14cb   :  { %v534_v52 = vpop.permute.xlu0 %533 }
0x14cc   :  { %537 = vst.msk [vmem:[%s1714_s6] sm:$0x3] %vm32_vm1, %v534_v52 }
0x14cf   :  { %v688_v4 = vpop.permute.xlu0 %687 }
0x14d0   :  { %1121 = vst.msk [vmem:[%s1714_s6 + $0x4] sm:$0x3] %vm32_vm1, %v688_v4 }
0x14d3   :  { %v842_v5 = vpop.permute.xlu0 %841 }
0x14d4   :  { %1125 = vst.msk [vmem:[%s1714_s6 + $0x8] sm:$0x3] %vm32_vm1, %v842_v5 }
0x14d7   :  { %v1364_v50 = vpop.eup %1363  ;;  %v996_v53 = vpop.permute.xlu0 %995 }
0x14d8   :  { %1129 = vst.msk [vmem:[%s1714_s6 + $0xc] sm:$0x3] %vm32_vm1, %v996_v53  ;;  %1067 = vrot.lane.b32.xlu1 %v1364_v50, %s1367_s3 }
0x14dc   :  { %610 = vrot.lane.b32.xlu1 %v1580_v46, %s1368_s5 }
0x14e0   :  { %764 = vrot.lane.b32.xlu1 %v1610_v29, %s1368_s5 }
0x14e4   :  { %918 = vrot.lane.b32.xlu1 %v1638_v7, %s1368_s5 }
0x153c   :  { %v1080_v54 = vpop.permute.xlu0 %1079 }
0x153d   :  { %1082 = vst.msk [vmem:[#allocation4] sm:$0x3] %vm32_vm1, %v1080_v54  ;;  %1084 = vst.msk [vmem:[%s1715_s8] sm:$0x3] %vm32_vm1, %v1080_v54 }
0x154a   :  { %v1068_v55 = vpop.permute.xlu1 %1067 }
0x154b   :  { %v1070_v56 = vmul.f32 %v1068_v55, %v1052_v44 }
0x154d   :  { %1072 = vrot.lane.b32.xlu1 %v1070_v56, %s1368_s5 }
0x154e   :  { %v611_v57 = vpop.permute.xlu1 %610 }
0x154f   :  { %1119 = vst.msk [vmem:[%s1714_s6 + $0x2] sm:$0x3] %vm32_vm1, %v611_v57 }
0x1552   :  { %v765_v46 = vpop.permute.xlu1 %764 }
0x1553   :  { %1123 = vst.msk [vmem:[%s1714_s6 + $0x6] sm:$0x3] %vm32_vm1, %v765_v46 }
0x1556   :  { %v919_v29 = vpop.permute.xlu1 %918 }
0x1557   :  { %1127 = vst.msk [vmem:[%s1714_s6 + $0xa] sm:$0x3] %vm32_vm1, %v919_v29 }
0x15bf   :  { %v1073_v58 = vpop.permute.xlu1 %1072 }
0x15c0   :  { %1131 = vst.msk [vmem:[%s1714_s6 + $0xe] sm:$0x3] %vm32_vm1, %v1073_v58  ;;  %1077 = vst.msk [vmem:[#allocation3] sm:$0x3] %vm32_vm1, %v1073_v58 }
0x15c1   :  { %1083 = vst.msk [vmem:[%s1716_s7] sm:$0x3] %vm32_vm1, %v1073_v58 }

// kernel: lstm_layer_forward.2
= control target key start
LH: loop header
LB: loop body
LE: loop exit
PB: predicated region body
PF: predicated region fallthrough
CT: control target
= control target key end

     0   :  { %v1332_v0 = vmov 0.0   ;;  %vm1333_vm0 = vmmov 0   ;;  %vm57_vm1 = vcmask 130048   ;;  %vm32_vm2 = vcmask 254976   ;;  %s1654_s1 = inlined_call_operand.vmem [shape: bf16[16,128], index: 1, kind: input, shape index: {}]   ;;  %s1655_s0 = inlined_call_operand.vmem [shape: f32[8,2,16], index: 0, kind: input, shape index: {}]   ;;  %s1656_s2 = inlined_call_operand.vmem [shape: bf16[32,128], index: 2, kind: input, shape index: {}]   ;;  %s1657_s4 = inlined_call_operand.vmem [shape: f32[2,32], index: 4, kind: input, shape index: {}]   ;;  %s1658_s5 = inlined_call_operand.vmem [shape: f32[2,32], index: 5, kind: input, shape index: {}]   ;;  %s1659_s3 = inlined_call_operand.vmem [shape: f32[1,128], index: 3, kind: input, shape index: {}]   ;;  %s1660_s6 = inlined_call_operand.vmem [shape: f32[8,2,32], index: 6, kind: output, shape index: {0}]   ;;  %s1661_s8 = inlined_call_operand.vmem [shape: f32[2,32], index: 8, kind: output, shape index: {2}]   ;;  %s1662_s7 = inlined_call_operand.vmem [shape: f32[2,32], index: 7, kind: output, shape index: {1}]  }
   0x1   :  { %1164 = vmatprep.subr.bf16.mxu0 %v1332_v0  ;;  %v1386_v1 = vld [vmem:[%s1654_s1] sm:$0xff]   ;;  %1166 = vmatprep.mubr.msk.bf16.mxu0 %vm1333_vm0, %v1332_v0  ;;  %v1099_v7 = vld [vmem:[%s1655_s0 + $0x8] sm:$0x3]  ;;  %v1103_v9 = vld [vmem:[%s1655_s0 + $0xc] sm:$0x3]  ;;  %vm454_vm3 = vcmask 261120  }
   0x2   :  { %v43_v2 = vld [vmem:[%s1655_s0] sm:$0x3]  ;;  %1170 = vmatprep.subr.bf16.mxu1 %v1332_v0  ;;  %1172 = vmatprep.mubr.msk.bf16.mxu1 %vm1333_vm0, %v1332_v0  ;;  %v1095_v5 = vld [vmem:[%s1655_s0 + $0x4] sm:$0x3]  ;;  %v248_v8 = vpack.c.bf16 %v1099_v7, %v1099_v7  ;;  %v344_v10 = vpack.c.bf16 %v1103_v9, %v1103_v9  ;;  %v1431_v11 = vld [vmem:[%s1656_s2 + $0x8] sm:$0xff]  }
   0x3   :  { %1165 = vmatpush3.bf16.msra.mxu0 %v1386_v1  ;;  %v44_v3 = vpack.c.bf16 %v43_v2, %v43_v2  ;;  %1171 = vmatpush3.bf16.msra.mxu1 %v1386_v1  ;;  %v31_v4 = vld [vmem:[%s1657_s4] sm:$0x3]  ;;  %v152_v6 = vpack.c.bf16 %v1095_v5, %v1095_v5  ;;  %v1093_v55 = vld [vmem:[%s1655_s0 + $0x2] sm:$0x3]  ;;  %v1097_v57 = vld [vmem:[%s1655_s0 + $0x6] sm:$0x3] }
   0x4   :  { %1176 = vmatprep.subr.bf16.mxu0 %v1332_v0  ;;  %1182 = vmatprep.subr.bf16.mxu1 %v1332_v0  ;;  %33 = vst.msk [vmem:[#allocation3] sm:$0x3] %vm32_vm2, %v31_v4  ;;  %v1438_v12 = vld [vmem:[%s1656_s2] sm:$0xff]   ;;  %v104_v56 = vpack.c.bf16 %v1093_v55, %v1093_v55  ;;  %v200_v58 = vpack.c.bf16 %v1097_v57, %v1097_v57  ;;  %v1101_v60 = vld [vmem:[%s1655_s0 + $0xa] sm:$0x3] }
   0x5   :  { %v34_v15 = vld [vmem:[%s1658_s5] sm:$0x3]  ;;  %s1335_s5 = smov 32   ;;  %v296_v61 = vpack.c.bf16 %v1101_v60, %v1101_v60  ;;  %v1105_v62 = vld [vmem:[%s1655_s0 + $0xe] sm:$0x3]  ;;  %s1336_s0 = smov 96  }
   0x6   :  { %1167 = vmatmul.mubr.msk.bf16.vlgmr.msra.gmra.mxu0 %vm57_vm1, %v44_v3  ;;  %35 = vst.msk [vmem:[#allocation4] sm:$0x3] %vm32_vm2, %v34_v15  ;;  %v1459_v16 = vld [vmem:[%s1659_s3] ss:$0 sm:$0xff]  ;;  %s1334_s3 = smov 64   ;;  %1173 = vmatmul.mubr.msk.bf16.vlgmr.msra.gmra.mxu1 %vm57_vm1, %v104_v56  ;;  %v392_v63 = vpack.c.bf16 %v1105_v62, %v1105_v62 }
   0x7   :  { %1177 = vmatpush3.bf16.msra.mxu0 %v1386_v1  ;;  %1178 = vmatprep.mubr.msk.bf16.mxu0 %vm1333_vm0, %v1332_v0 }
   0x8   :  { %1188 = vmatprep.subr.bf16.mxu0 %v1332_v0  ;;  %1183 = vmatpush3.bf16.msra.mxu1 %v1386_v1 }
   0x9   :  { %1184 = vmatprep.mubr.msk.bf16.mxu1 %vm1333_vm0, %v1332_v0  ;;  %1194 = vmatprep.subr.bf16.mxu1 %v1332_v0 }
   0xb   :  { %v438_v13 = vld [vmem:[#allocation3] sm:$0x3] }
   0xc   :  { %v441_v14 = vpack.c.bf16 %v438_v13, %v438_v13 }
   0xd   :  { %v439_v44 = vld [vmem:[#allocation4] sm:$0x3] }
   0xe   :  { %1179 = vmatmul.mubr.msk.bf16.vlgmr.msra.gmra.mxu0 %vm57_vm1, %v152_v6  ;;  %1185 = vmatmul.mubr.msk.bf16.vlgmr.msra.gmra.mxu1 %vm57_vm1, %v200_v58 }
   0xf   :  { %1189 = vmatpush3.bf16.msra.mxu0 %v1386_v1  ;;  %1190 = vmatprep.mubr.msk.bf16.mxu0 %vm1333_vm0, %v1332_v0 }
  0x10   :  { %1200 = vmatprep.subr.bf16.mxu0 %v1332_v0  ;;  %1195 = vmatpush3.bf16.msra.mxu1 %v1386_v1 }
  0x11   :  { %1196 = vmatprep.mubr.msk.bf16.mxu1 %vm1333_vm0, %v1332_v0  ;;  %1206 = vmatprep.subr.bf16.mxu1 %v1332_v0 }
  0x16   :  { %1191 = vmatmul.mubr.msk.bf16.vlgmr.msra.gmra.mxu0 %vm57_vm1, %v248_v8  ;;  %1197 = vmatmul.mubr.msk.bf16.vlgmr.msra.gmra.mxu1 %vm57_vm1, %v296_v61 }
  0x17   :  { %1201 = vmatpush3.bf16.msra.mxu0 %v1386_v1  ;;  %1202 = vmatprep.mubr.msk.bf16.mxu0 %vm1333_vm0, %v1332_v0 }
  0x18   :  { %1212 = vmatprep.subr.bf16.mxu0 %v1332_v0  ;;  %1207 = vmatpush3.bf16.msra.mxu1 %v1386_v1 }
  0x19   :  { %1208 = vmatprep.mubr.msk.bf16.mxu1 %vm1333_vm0, %v1332_v0  ;;  %1220 = vmatprep.subr.bf16.mxu1 %v1332_v0 }
  0x1e   :  { %1203 = vmatmul.mubr.msk.bf16.vlgmr.msra.gmra.mxu0 %vm57_vm1, %v344_v10  ;;  %1209 = vmatmul.mubr.msk.bf16.vlgmr.msra.gmra.mxu1 %vm57_vm1, %v392_v63 }
  0x1f   :  { %1213 = vmatpush3.bf16.msra.mxu0 %v1431_v11  ;;  %1216 = vmatprep.mubr.msk.bf16.mxu0 %vm1333_vm0, %v1332_v0 }
  0x20   :  { %1214 = vmatprep.subr.bf16.mxu0 %v1332_v0  ;;  %1221 = vmatpush3.bf16.msra.mxu1 %v1431_v11 }
  0x21   :  { %1224 = vmatprep.mubr.msk.bf16.mxu1 %vm1333_vm0, %v1332_v0  ;;  %1222 = vmatprep.subr.bf16.mxu1 %v1332_v0 }
  0x23   :  { %1215 = vmatpush3.bf16.msra.mxu0 %v1438_v12 }
  0x24   :  { %1228 = vmatprep.subr.bf16.mxu0 %v1332_v0  ;;  %1223 = vmatpush3.bf16.msra.mxu1 %v1438_v12 }
  0x25   :  { %1236 = vmatprep.subr.bf16.mxu1 %v1332_v0 }
  0x26   :  { %1217 = vmatmul.mubr.msk.bf16.vlgmr.msra.gmra.mxu0 %vm454_vm3, %v441_v14 }
  0x27   :  { %1229 = vmatpush3.bf16.msra.mxu0 %v1431_v11  ;;  %1232 = vmatprep.mubr.msk.bf16.mxu0 %vm1333_vm0, %v1332_v0 }
  0x28   :  { %1230 = vmatprep.subr.bf16.mxu0 %v1332_v0 }
  0x2b   :  { %1231 = vmatpush3.bf16.msra.mxu0 %v1438_v12 }
  0x2c   :  { %1244 = vmatprep.subr.bf16.mxu0 %v1332_v0 }
  0xc6   :  { %v95_v17 = vpop.f32.mrf.mxu0  ;;  %v142_v4 = vpop.f32.mrf.mxu1 }
  0xc7   :  { %v96_v18 = vadd.f32 %v1459_v16, %v95_v17  ;;  %v143_v5 = vadd.f32 %v1459_v16, %v142_v4 }
  0xc8   :  { %v1168_v19 = vpop.f32.mrf.mxu0  ;;  %v1174_v6 = vpop.f32.mrf.mxu1 }
  0xc9   :  { %101 = vst [vmem:[#allocation2] sm:$0x3] %v96_v18  ;;  %149 = vst [vmem:[#allocation2 + $0x2] sm:$0x3] %v143_v5 }
  0xca   :  { %v98_v20 = vpop.f32.mrf.mxu0  ;;  %v145_v7 = vpop.f32.mrf.mxu1 }
  0xcc   :  { %v1169_v21 = vpop.f32.mrf.mxu0  ;;  %v1175_v8 = vpop.f32.mrf.mxu1 }
  0xce   :  { %v190_v22 = vpop.f32.mrf.mxu0  ;;  %v238_v9 = vpop.f32.mrf.mxu1 }
  0xcf   :  { %v191_v23 = vadd.f32 %v1459_v16, %v190_v22  ;;  %v239_v10 = vadd.f32 %v1459_v16, %v238_v9 }
  0xd0   :  { %v1180_v24 = vpop.f32.mrf.mxu0  ;;  %v440_v37 = vld [vmem:[#allocation2] sm:$0x3]  ;;  %v1186_v13 = vpop.f32.mrf.mxu1 }
  0xd1   :  { %197 = vst [vmem:[#allocation2 + $0x4] sm:$0x3] %v191_v23  ;;  %245 = vst [vmem:[#allocation2 + $0x6] sm:$0x3] %v239_v10 }
  0xd2   :  { %v193_v25 = vpop.f32.mrf.mxu0  ;;  %v241_v14 = vpop.f32.mrf.mxu1 }
  0xd4   :  { %v1181_v26 = vpop.f32.mrf.mxu0  ;;  %v1187_v15 = vpop.f32.mrf.mxu1 }
  0xd6   :  { %v286_v27 = vpop.f32.mrf.mxu0  ;;  %v334_v17 = vpop.f32.mrf.mxu1 }
  0xd7   :  { %v287_v28 = vadd.f32 %v1459_v16, %v286_v27  ;;  %v335_v18 = vadd.f32 %v1459_v16, %v334_v17 }
  0xd8   :  { %v1192_v29 = vpop.f32.mrf.mxu0  ;;  %v1198_v19 = vpop.f32.mrf.mxu1  ;;  %v685_v7 = vld [vmem:[#allocation2 + $0x6] sm:$0x3] }
  0xd9   :  { %293 = vst [vmem:[#allocation2 + $0x8] sm:$0x3] %v287_v28  ;;  %341 = vst [vmem:[#allocation2 + $0xa] sm:$0x3] %v335_v18  ;;  %v531_v28 = vld [vmem:[#allocation2 + $0x2] sm:$0x3] }
  0xda   :  { %v289_v30 = vpop.f32.mrf.mxu0  ;;  %v337_v20 = vpop.f32.mrf.mxu1 }
  0xdc   :  { %v1193_v31 = vpop.f32.mrf.mxu0  ;;  %v1199_v21 = vpop.f32.mrf.mxu1 }
  0xde   :  { %v382_v32 = vpop.f32.mrf.mxu0  ;;  %v430_v22 = vpop.f32.mrf.mxu1 }
  0xdf   :  { %v383_v33 = vadd.f32 %v1459_v16, %v382_v32  ;;  %v431_v23 = vadd.f32 %v1459_v16, %v430_v22 }
  0xe0   :  { %v1204_v34 = vpop.f32.mrf.mxu0  ;;  %v1210_v24 = vpop.f32.mrf.mxu1 }
  0xe1   :  { %389 = vst [vmem:[#allocation2 + $0xc] sm:$0x3] %v383_v33  ;;  %437 = vst [vmem:[#allocation2 + $0xe] sm:$0x3] %v431_v23 }
  0xe2   :  { %v385_v35 = vpop.f32.mrf.mxu0  ;;  %v433_v25 = vpop.f32.mrf.mxu1 }
  0xe4   :  { %v1205_v36 = vpop.f32.mrf.mxu0  ;;  %v1211_v26 = vpop.f32.mrf.mxu1 }
  0xe6   :  { %v492_v38 = vpop.f32.mrf.mxu0 }
  0xe7   :  { %v498_v39 = vadd.f32 %v492_v38, %v440_v37 }
  0xe8   :  { %v1218_v40 = vpop.f32.mrf.mxu0 }
  0xe9   :  { %1284 = vtanh.f32 %v498_v39  ;;  %v499_v45 = vmul.f32 0.5, %v498_v39 }
  0xea   :  { %v495_v41 = vpop.f32.mrf.mxu0 }
  0xeb   :  { %1286 = vtanh.f32 %v499_v45 }
  0xec   :  { %v1219_v42 = vpop.f32.mrf.mxu0 }
  0xf6   :  { %v1285_v43 = vpop.eup %1284 }
  0xf7   :  { %510 = vrot.lane.b32.xlu0 %v1285_v43, %s1334_s3 }
  0xf8   :  { %v1287_v46 = vpop.eup %1286 }
  0xf9   :  { %v501_v47 = vmul.f32 0.5, %v1287_v46 }
  0xfb   :  { %505 = vrot.lane.b32.xlu0 %v439_v44, %s1335_s5  ;;  %v502_v48 = vadd.f32 0.5, %v501_v47 }
 0x169   :  { %v511_v49 = vpop.permute.xlu0 %510 }
 0x16a   :  { %v513_v50 = vmul.f32 %v511_v49, %v502_v48 }
 0x16c   :  { %515 = vrot.lane.b32.xlu1 %v513_v50, %s1335_s5 }
 0x16d   :  { %v506_v51 = vpop.permute.xlu0 %505 }
 0x16e   :  { %v508_v52 = vmul.f32 %v506_v51, %v502_v48 }
 0x1de   :  { %v516_v53 = vpop.permute.xlu1 %515 }
 0x1df   :  { %v1468_v54 = vadd.f32 %v516_v53, %v508_v52 }
 0x1e1   :  { %1288 = vtanh.f32 %v1468_v54 }
 0x1ee   :  { %v1289_v59 = vpop.eup %1288 }
 0x1ef   :  { %521 = vrot.lane.b32.xlu1 %v1289_v59, %s1334_s3 }
 0x261   :  { %v522_v1 = vpop.permute.xlu1 %521 }
 0x262   :  { %v1506_v2 = vmul.f32 %v522_v1, %v502_v48  ;;  %v608_v48 = vld [vmem:[#allocation2 + $0x4] sm:$0x3] }
 0x264   :  { %v532_v3 = vpack.c.bf16 %v1506_v2, %v1506_v2 }
 0x266   :  { %534 = vrot.lane.b32.xlu0 %v532_v3, %s1335_s5 }
 0x2d8   :  { %v535_v27 = vpop.permute.xlu0 %534 }
 0x2d9   :  { %1225 = vmatmul.mubr.msk.bf16.vlgmr.msra.gmra.mxu1 %vm454_vm3, %v535_v27 }
 0x2da   :  { %1237 = vmatpush3.bf16.msra.mxu1 %v1431_v11  ;;  %1240 = vmatprep.mubr.msk.bf16.mxu1 %vm1333_vm0, %v1332_v0 }
 0x2db   :  { %1238 = vmatprep.subr.bf16.mxu1 %v1332_v0 }
 0x2de   :  { %1239 = vmatpush3.bf16.msra.mxu1 %v1438_v12 }
 0x2df   :  { %1252 = vmatprep.subr.bf16.mxu1 %v1332_v0 }
 0x399   :  { %v573_v16 = vpop.f32.mrf.mxu1 }
 0x39a   :  { %v579_v29 = vadd.f32 %v573_v16, %v531_v28 }
 0x39b   :  { %v1226_v30 = vpop.f32.mrf.mxu1 }
 0x39c   :  { %1290 = vtanh.f32 %v579_v29  ;;  %v580_v34 = vmul.f32 0.5, %v579_v29  ;;  %v762_v30 = vld [vmem:[#allocation2 + $0x8] sm:$0x3] }
 0x39d   :  { %v576_v31 = vpop.f32.mrf.mxu1 }
 0x39e   :  { %1292 = vtanh.f32 %v580_v34 }
 0x39f   :  { %v1227_v32 = vpop.f32.mrf.mxu1 }
 0x3a9   :  { %v1291_v33 = vpop.eup %1290 }
 0x3aa   :  { %587 = vrot.lane.b32.xlu1 %v1291_v33, %s1334_s3 }
 0x3ab   :  { %v1293_v35 = vpop.eup %1292 }
 0x3ac   :  { %v582_v36 = vmul.f32 0.5, %v1293_v35 }
 0x3ae   :  { %v583_v37 = vadd.f32 0.5, %v582_v36 }
 0x3b0   :  { %v585_v40 = vmul.f32 %v583_v37, %v1468_v54 }
 0x41c   :  { %v588_v38 = vpop.permute.xlu1 %587 }
 0x41d   :  { %v590_v39 = vmul.f32 %v588_v38, %v583_v37 }
 0x41f   :  { %592 = vrot.lane.b32.xlu0 %v590_v39, %s1335_s5 }
 0x491   :  { %v593_v41 = vpop.permute.xlu0 %592 }
 0x492   :  { %v595_v42 = vadd.f32 %v593_v41, %v585_v40 }
 0x494   :  { %1294 = vtanh.f32 %v595_v42 }
 0x4a1   :  { %v1295_v43 = vpop.eup %1294 }
 0x4a2   :  { %598 = vrot.lane.b32.xlu1 %v1295_v43, %s1334_s3 }
 0x514   :  { %v599_v44 = vpop.permute.xlu1 %598 }
 0x515   :  { %v1526_v45 = vmul.f32 %v599_v44, %v583_v37 }
 0x517   :  { %v609_v46 = vpack.c.bf16 %v1526_v45, %v1526_v45 }
 0x519   :  { %611 = vrot.lane.b32.xlu0 %v609_v46, %s1335_s5 }
 0x58b   :  { %v612_v47 = vpop.permute.xlu0 %611 }
 0x58c   :  { %1233 = vmatmul.mubr.msk.bf16.vlgmr.msra.gmra.mxu0 %vm454_vm3, %v612_v47 }
 0x58d   :  { %1245 = vmatpush3.bf16.msra.mxu0 %v1431_v11  ;;  %1248 = vmatprep.mubr.msk.bf16.mxu0 %vm1333_vm0, %v1332_v0 }
 0x58e   :  { %1246 = vmatprep.subr.bf16.mxu0 %v1332_v0 }
 0x591   :  { %1247 = vmatpush3.bf16.msra.mxu0 %v1438_v12 }
 0x592   :  { %1260 = vmatprep.subr.bf16.mxu0 %v1332_v0 }
 0x64c   :  { %v650_v49 = vpop.f32.mrf.mxu0 }
 0x64d   :  { %v656_v50 = vadd.f32 %v650_v49, %v608_v48 }
 0x64e   :  { %v1234_v51 = vpop.f32.mrf.mxu0 }
 0x64f   :  { %1296 = vtanh.f32 %v656_v50  ;;  %v657_v55 = vmul.f32 0.5, %v656_v50 }
 0x650   :  { %v653_v52 = vpop.f32.mrf.mxu0 }
 0x651   :  { %1298 = vtanh.f32 %v657_v55  ;;  %v839_v52 = vld [vmem:[#allocation2 + $0xa] sm:$0x3] }
 0x652   :  { %v1235_v53 = vpop.f32.mrf.mxu0 }
 0x65c   :  { %v1297_v54 = vpop.eup %1296 }
 0x65d   :  { %664 = vrot.lane.b32.xlu1 %v1297_v54, %s1334_s3 }
 0x65e   :  { %v1299_v56 = vpop.eup %1298 }
 0x65f   :  { %v659_v57 = vmul.f32 0.5, %v1299_v56 }
 0x661   :  { %v660_v58 = vadd.f32 0.5, %v659_v57 }
 0x663   :  { %v662_v61 = vmul.f32 %v660_v58, %v595_v42 }
 0x6cf   :  { %v665_v59 = vpop.permute.xlu1 %664 }
 0x6d0   :  { %v667_v60 = vmul.f32 %v665_v59, %v660_v58 }
 0x6d2   :  { %669 = vrot.lane.b32.xlu0 %v667_v60, %s1335_s5 }
 0x744   :  { %v670_v62 = vpop.permute.xlu0 %669 }
 0x745   :  { %v672_v63 = vadd.f32 %v670_v62, %v662_v61 }
 0x747   :  { %1300 = vtanh.f32 %v672_v63 }
 0x754   :  { %v1301_v1 = vpop.eup %1300 }
 0x755   :  { %675 = vrot.lane.b32.xlu1 %v1301_v1, %s1334_s3 }
 0x7c7   :  { %v676_v3 = vpop.permute.xlu1 %675 }
 0x7c8   :  { %v1541_v4 = vmul.f32 %v676_v3, %v660_v58 }
 0x7ca   :  { %v686_v5 = vpack.c.bf16 %v1541_v4, %v1541_v4 }
 0x7cc   :  { %688 = vrot.lane.b32.xlu0 %v686_v5, %s1335_s5 }
 0x83e   :  { %v689_v6 = vpop.permute.xlu0 %688 }
 0x83f   :  { %1241 = vmatmul.mubr.msk.bf16.vlgmr.msra.gmra.mxu1 %vm454_vm3, %v689_v6 }
 0x840   :  { %1253 = vmatpush3.bf16.msra.mxu1 %v1431_v11  ;;  %1256 = vmatprep.mubr.msk.bf16.mxu1 %vm1333_vm0, %v1332_v0 }
 0x841   :  { %1254 = vmatprep.subr.bf16.mxu1 %v1332_v0 }
 0x844   :  { %1255 = vmatpush3.bf16.msra.mxu1 %v1438_v12 }
 0x845   :  { %1268 = vmatprep.subr.bf16.mxu1 %v1332_v0 }
 0x8ff   :  { %v727_v8 = vpop.f32.mrf.mxu1 }
 0x900   :  { %v733_v9 = vadd.f32 %v727_v8, %v685_v7 }
 0x901   :  { %v1242_v10 = vpop.f32.mrf.mxu1 }
 0x902   :  { %1302 = vtanh.f32 %v733_v9  ;;  %v734_v17 = vmul.f32 0.5, %v733_v9  ;;  %v916_v9 = vld [vmem:[#allocation2 + $0xc] sm:$0x3] }
 0x903   :  { %v730_v13 = vpop.f32.mrf.mxu1 }
 0x904   :  { %1304 = vtanh.f32 %v734_v17 }
 0x905   :  { %v1243_v14 = vpop.f32.mrf.mxu1 }
 0x90f   :  { %v1303_v15 = vpop.eup %1302 }
 0x910   :  { %741 = vrot.lane.b32.xlu1 %v1303_v15, %s1334_s3 }
 0x911   :  { %v1305_v18 = vpop.eup %1304 }
 0x912   :  { %v736_v19 = vmul.f32 0.5, %v1305_v18 }
 0x914   :  { %v737_v20 = vadd.f32 0.5, %v736_v19 }
 0x916   :  { %v739_v23 = vmul.f32 %v737_v20, %v672_v63 }
 0x982   :  { %v742_v21 = vpop.permute.xlu1 %741 }
 0x983   :  { %v744_v22 = vmul.f32 %v742_v21, %v737_v20 }
 0x985   :  { %746 = vrot.lane.b32.xlu0 %v744_v22, %s1335_s5 }
 0x9f7   :  { %v747_v24 = vpop.permute.xlu0 %746 }
 0x9f8   :  { %v749_v25 = vadd.f32 %v747_v24, %v739_v23 }
 0x9fa   :  { %1306 = vtanh.f32 %v749_v25 }
 0xa07   :  { %v1307_v26 = vpop.eup %1306 }
 0xa08   :  { %752 = vrot.lane.b32.xlu1 %v1307_v26, %s1334_s3 }
 0xa7a   :  { %v753_v27 = vpop.permute.xlu1 %752 }
 0xa7b   :  { %v1556_v28 = vmul.f32 %v753_v27, %v737_v20 }
 0xa7d   :  { %v763_v16 = vpack.c.bf16 %v1556_v28, %v1556_v28 }
 0xa7f   :  { %765 = vrot.lane.b32.xlu0 %v763_v16, %s1335_s5 }
 0xaf1   :  { %v766_v29 = vpop.permute.xlu0 %765 }
 0xaf2   :  { %1249 = vmatmul.mubr.msk.bf16.vlgmr.msra.gmra.mxu0 %vm454_vm3, %v766_v29 }
 0xaf3   :  { %1261 = vmatpush3.bf16.msra.mxu0 %v1431_v11  ;;  %1264 = vmatprep.mubr.msk.bf16.mxu0 %vm1333_vm0, %v1332_v0 }
 0xaf4   :  { %1262 = vmatprep.subr.bf16.mxu0 %v1332_v0 }
 0xaf7   :  { %1263 = vmatpush3.bf16.msra.mxu0 %v1438_v12 }
 0xbb2   :  { %v804_v31 = vpop.f32.mrf.mxu0 }
 0xbb3   :  { %v810_v32 = vadd.f32 %v804_v31, %v762_v30 }
 0xbb4   :  { %v1250_v33 = vpop.f32.mrf.mxu0 }
 0xbb5   :  { %1308 = vtanh.f32 %v810_v32  ;;  %v811_v37 = vmul.f32 0.5, %v810_v32  ;;  %v993_v33 = vld [vmem:[#allocation2 + $0xe] sm:$0x3] }
 0xbb6   :  { %v807_v34 = vpop.f32.mrf.mxu0 }
 0xbb7   :  { %1310 = vtanh.f32 %v811_v37 }
 0xbb8   :  { %v1251_v35 = vpop.f32.mrf.mxu0 }
 0xbc2   :  { %v1309_v36 = vpop.eup %1308 }
 0xbc3   :  { %818 = vrot.lane.b32.xlu1 %v1309_v36, %s1334_s3 }
 0xbc4   :  { %v1311_v38 = vpop.eup %1310 }
 0xbc5   :  { %v813_v39 = vmul.f32 0.5, %v1311_v38 }
 0xbc7   :  { %v814_v40 = vadd.f32 0.5, %v813_v39 }
 0xbc9   :  { %v816_v43 = vmul.f32 %v814_v40, %v749_v25 }
 0xc35   :  { %v819_v41 = vpop.permute.xlu1 %818 }
 0xc36   :  { %v821_v42 = vmul.f32 %v819_v41, %v814_v40 }
 0xc38   :  { %823 = vrot.lane.b32.xlu0 %v821_v42, %s1335_s5 }
 0xcaa   :  { %v824_v44 = vpop.permute.xlu0 %823 }
 0xcab   :  { %v826_v46 = vadd.f32 %v824_v44, %v816_v43 }
 0xcad   :  { %1312 = vtanh.f32 %v826_v46 }
 0xcba   :  { %v1313_v47 = vpop.eup %1312 }
 0xcbb   :  { %829 = vrot.lane.b32.xlu1 %v1313_v47, %s1334_s3 }
 0xd2d   :  { %v830_v48 = vpop.permute.xlu1 %829 }
 0xd2e   :  { %v1570_v49 = vmul.f32 %v830_v48, %v814_v40 }
 0xd30   :  { %v840_v50 = vpack.c.bf16 %v1570_v49, %v1570_v49 }
 0xd32   :  { %842 = vrot.lane.b32.xlu0 %v840_v50, %s1335_s5 }
 0xda4   :  { %v843_v51 = vpop.permute.xlu0 %842 }
 0xda5   :  { %1257 = vmatmul.mubr.msk.bf16.vlgmr.msra.gmra.mxu1 %vm454_vm3, %v843_v51 }
 0xda6   :  { %1269 = vmatpush3.bf16.msra.mxu1 %v1431_v11  ;;  %1272 = vmatprep.mubr.msk.bf16.mxu1 %vm1333_vm0, %v1332_v0 }
 0xda7   :  { %1270 = vmatprep.subr.bf16.mxu1 %v1332_v0 }
 0xdaa   :  { %1271 = vmatpush3.bf16.msra.mxu1 %v1438_v12 }
 0xe65   :  { %v881_v53 = vpop.f32.mrf.mxu1 }
 0xe66   :  { %v887_v54 = vadd.f32 %v881_v53, %v839_v52 }
 0xe67   :  { %v1258_v55 = vpop.f32.mrf.mxu1 }
 0xe68   :  { %1314 = vtanh.f32 %v887_v54  ;;  %v888_v59 = vmul.f32 0.5, %v887_v54 }
 0xe69   :  { %v884_v56 = vpop.f32.mrf.mxu1 }
 0xe6a   :  { %1316 = vtanh.f32 %v888_v59 }
 0xe6b   :  { %v1259_v57 = vpop.f32.mrf.mxu1 }
 0xe75   :  { %v1315_v58 = vpop.eup %1314 }
 0xe76   :  { %895 = vrot.lane.b32.xlu1 %v1315_v58, %s1334_s3 }
 0xe77   :  { %v1317_v11 = vpop.eup %1316 }
 0xe78   :  { %v890_v60 = vmul.f32 0.5, %v1317_v11 }
 0xe7a   :  { %v891_v61 = vadd.f32 0.5, %v890_v60 }
 0xe7c   :  { %v893_v0 = vmul.f32 %v891_v61, %v826_v46 }
 0xee8   :  { %v896_v62 = vpop.permute.xlu1 %895 }
 0xee9   :  { %v898_v63 = vmul.f32 %v896_v62, %v891_v61 }
 0xeeb   :  { %900 = vrot.lane.b32.xlu0 %v898_v63, %s1335_s5 }
 0xf5d   :  { %v901_v12 = vpop.permute.xlu0 %900 }
 0xf5e   :  { %v903_v1 = vadd.f32 %v901_v12, %v893_v0 }
 0xf60   :  { %1318 = vtanh.f32 %v903_v1 }
 0xf6d   :  { %v1319_v3 = vpop.eup %1318 }
 0xf6e   :  { %906 = vrot.lane.b32.xlu1 %v1319_v3, %s1334_s3 }
 0xfe0   :  { %v907_v5 = vpop.permute.xlu1 %906 }
 0xfe1   :  { %v1584_v6 = vmul.f32 %v907_v5, %v891_v61 }
 0xfe3   :  { %v917_v7 = vpack.c.bf16 %v1584_v6, %v1584_v6 }
 0xfe5   :  { %919 = vrot.lane.b32.xlu0 %v917_v7, %s1335_s5 }
0x1057   :  { %v920_v8 = vpop.permute.xlu0 %919 }
0x1058   :  { %1265 = vmatmul.mubr.msk.bf16.vlgmr.msra.gmra.mxu0 %vm454_vm3, %v920_v8 }
0x1118   :  { %v958_v10 = vpop.f32.mrf.mxu0 }
0x1119   :  { %v964_v13 = vadd.f32 %v958_v10, %v916_v9 }
0x111a   :  { %v1266_v14 = vpop.f32.mrf.mxu0 }
0x111b   :  { %1320 = vtanh.f32 %v964_v13  ;;  %v965_v19 = vmul.f32 0.5, %v964_v13 }
0x111c   :  { %v961_v15 = vpop.f32.mrf.mxu0 }
0x111d   :  { %1322 = vtanh.f32 %v965_v19 }
0x111e   :  { %v1267_v17 = vpop.f32.mrf.mxu0 }
0x1128   :  { %v1321_v18 = vpop.eup %1320 }
0x1129   :  { %972 = vrot.lane.b32.xlu1 %v1321_v18, %s1334_s3 }
0x112a   :  { %v1323_v20 = vpop.eup %1322 }
0x112b   :  { %v967_v21 = vmul.f32 0.5, %v1323_v20 }
0x112d   :  { %v968_v22 = vadd.f32 0.5, %v967_v21 }
0x112f   :  { %v970_v25 = vmul.f32 %v968_v22, %v903_v1 }
0x119b   :  { %v973_v23 = vpop.permute.xlu1 %972 }
0x119c   :  { %v975_v24 = vmul.f32 %v973_v23, %v968_v22 }
0x119e   :  { %977 = vrot.lane.b32.xlu0 %v975_v24, %s1335_s5 }
0x1210   :  { %v978_v26 = vpop.permute.xlu0 %977 }
0x1211   :  { %v980_v27 = vadd.f32 %v978_v26, %v970_v25 }
0x1213   :  { %1324 = vtanh.f32 %v980_v27 }
0x1220   :  { %v1325_v16 = vpop.eup %1324 }
0x1221   :  { %983 = vrot.lane.b32.xlu1 %v1325_v16, %s1334_s3 }
0x1293   :  { %v984_v29 = vpop.permute.xlu1 %983 }
0x1294   :  { %v986_v30 = vmul.f32 %v984_v29, %v968_v22 }
0x1296   :  { %v994_v31 = vpack.c.bf16 %v986_v30, %v986_v30 }
0x1298   :  { %996 = vrot.lane.b32.xlu0 %v994_v31, %s1335_s5 }
0x130a   :  { %v997_v32 = vpop.permute.xlu0 %996 }
0x130b   :  { %1273 = vmatmul.mubr.msk.bf16.vlgmr.msra.gmra.mxu1 %vm454_vm3, %v997_v32 }
0x13cb   :  { %v1035_v34 = vpop.f32.mrf.mxu1 }
0x13cc   :  { %v1041_v35 = vadd.f32 %v1035_v34, %v993_v33 }
0x13cd   :  { %v1274_v36 = vpop.f32.mrf.mxu1 }
0x13ce   :  { %1326 = vtanh.f32 %v1041_v35  ;;  %v1042_v40 = vmul.f32 0.5, %v1041_v35 }
0x13cf   :  { %v1038_v37 = vpop.f32.mrf.mxu1 }
0x13d0   :  { %1328 = vtanh.f32 %v1042_v40 }
0x13d1   :  { %v1275_v38 = vpop.f32.mrf.mxu1 }
0x13db   :  { %v1327_v39 = vpop.eup %1326 }
0x13dc   :  { %1049 = vrot.lane.b32.xlu1 %v1327_v39, %s1334_s3 }
0x13dd   :  { %v1329_v41 = vpop.eup %1328 }
0x13de   :  { %v1044_v42 = vmul.f32 0.5, %v1329_v41 }
0x13e0   :  { %v1045_v43 = vadd.f32 0.5, %v1044_v42 }
0x13e2   :  { %v1047_v47 = vmul.f32 %v1045_v43, %v980_v27 }
0x144e   :  { %v1050_v44 = vpop.permute.xlu1 %1049 }
0x144f   :  { %v1052_v46 = vmul.f32 %v1050_v44, %v1045_v43 }
0x1451   :  { %1054 = vrot.lane.b32.xlu0 %v1052_v46, %s1335_s5 }
0x1455   :  { %526 = vrot.lane.b32.xlu0 %v1506_v2, %s1335_s5 }
0x1459   :  { %680 = vrot.lane.b32.xlu0 %v1541_v4, %s1335_s5 }
0x145d   :  { %834 = vrot.lane.b32.xlu0 %v1570_v49, %s1335_s5 }
0x1461   :  { %988 = vrot.lane.b32.xlu0 %v986_v30, %s1335_s5 }
0x14c3   :  { %v1055_v48 = vpop.permute.xlu0 %1054 }
0x14c4   :  { %v1057_v50 = vadd.f32 %v1055_v48, %v1047_v47 }
0x14c6   :  { %1330 = vtanh.f32 %v1057_v50  ;;  %1072 = vrot.lane.b32.xlu0 %v1057_v50, %s1336_s0 }
0x14c7   :  { %v527_v51 = vpop.permute.xlu0 %526 }
0x14c8   :  { %530 = vst.msk [vmem:[%s1660_s6] sm:$0x3] %vm32_vm2, %v527_v51 }
0x14cb   :  { %v681_v2 = vpop.permute.xlu0 %680 }
0x14cc   :  { %1113 = vst.msk [vmem:[%s1660_s6 + $0x4] sm:$0x3] %vm32_vm2, %v681_v2 }
0x14cf   :  { %v835_v4 = vpop.permute.xlu0 %834 }
0x14d0   :  { %1117 = vst.msk [vmem:[%s1660_s6 + $0x8] sm:$0x3] %vm32_vm2, %v835_v4 }
0x14d3   :  { %v1331_v49 = vpop.eup %1330  ;;  %v989_v52 = vpop.permute.xlu0 %988 }
0x14d4   :  { %1121 = vst.msk [vmem:[%s1660_s6 + $0xc] sm:$0x3] %vm32_vm2, %v989_v52  ;;  %1060 = vrot.lane.b32.xlu1 %v1331_v49, %s1334_s3 }
0x14d8   :  { %603 = vrot.lane.b32.xlu1 %v1526_v45, %s1335_s5 }
0x14dc   :  { %757 = vrot.lane.b32.xlu1 %v1556_v28, %s1335_s5 }
0x14e0   :  { %911 = vrot.lane.b32.xlu1 %v1584_v6, %s1335_s5 }
0x1538   :  { %v1073_v53 = vpop.permute.xlu0 %1072 }
0x1539   :  { %1075 = vst.msk [vmem:[#allocation4] sm:$0x3] %vm32_vm2, %v1073_v53  ;;  %1077 = vst.msk [vmem:[%s1661_s8] sm:$0x3] %vm32_vm2, %v1073_v53 }
0x1546   :  { %v1061_v54 = vpop.permute.xlu1 %1060 }
0x1547   :  { %v1063_v55 = vmul.f32 %v1061_v54, %v1045_v43 }
0x1549   :  { %1065 = vrot.lane.b32.xlu1 %v1063_v55, %s1335_s5 }
0x154a   :  { %v604_v56 = vpop.permute.xlu1 %603 }
0x154b   :  { %1111 = vst.msk [vmem:[%s1660_s6 + $0x2] sm:$0x3] %vm32_vm2, %v604_v56 }
0x154e   :  { %v758_v45 = vpop.permute.xlu1 %757 }
0x154f   :  { %1115 = vst.msk [vmem:[%s1660_s6 + $0x6] sm:$0x3] %vm32_vm2, %v758_v45 }
0x1552   :  { %v912_v28 = vpop.permute.xlu1 %911 }
0x1553   :  { %1119 = vst.msk [vmem:[%s1660_s6 + $0xa] sm:$0x3] %vm32_vm2, %v912_v28 }
0x15bb   :  { %v1066_v57 = vpop.permute.xlu1 %1065 }
0x15bc   :  { %1123 = vst.msk [vmem:[%s1660_s6 + $0xe] sm:$0x3] %vm32_vm2, %v1066_v57  ;;  %1070 = vst.msk [vmem:[#allocation3] sm:$0x3] %vm32_vm2, %v1066_v57 }
0x15bd   :  { %1076 = vst.msk [vmem:[%s1662_s7] sm:$0x3] %vm32_vm2, %v1066_v57 }

</bundles_post_ra>
